<compile_context>
chip_gen: v7x
topology: tpu7x:2x2x1
jax: 0.10.0
libtpu: 0.0.40
codegen_flags: <defaults>
</compile_context>

<pallas_src>
import jax
import jax.numpy as jnp
from jax.experimental import pallas as pl
from jax.experimental.pallas import tpu as pltpu

JOINT_DIM = 6
GOAL_DIM = 6
OBS_DIM = JOINT_DIM + GOAL_DIM  # == 12, matches self.shape = (12,)
_ROW_ALIGN = 32                 # multiple of 16 (bf16 packing) and 8 (f32 sublanes)


def _concat_kernel(joint_ref, goal_ref, out_ref):
    # Two static column-slice stores into the output tile; dtype promotion is
    # done here (in-vreg, essentially free on the VPU).  The kernel is DMA /
    # grid-overhead bound, so the extra masked store per tile is not on the
    # critical path (see TODO above for the fully lane-dense variant).
    out_ref[:, 0:JOINT_DIM] = joint_ref[...].astype(out_ref.dtype)
    out_ref[:, JOINT_DIM:OBS_DIM] = goal_ref[...].astype(out_ref.dtype)


def _align_up(n: int, m: int) -> int:
    return -(-int(n) // m) * m


def _default_tile_rows() -> int:
    """~16K-row tiles where VMEM is 128 MiB (v5e/v6e), ~8K rows on v7x (64 MiB)."""
    try:
        vmem_bytes = getattr(pltpu.get_tpu_info(), "vmem_capacity_bytes",
                             64 * 1024 * 1024)
    except Exception:  # conservative fallback if the query is unavailable
        vmem_bytes = 64 * 1024 * 1024
    return 16384 if vmem_bytes >= 100 * 1024 * 1024 else 8192


def robot_arm_obs_encoder(joint_pos: jax.Array, goal_pos: jax.Array,
                          *, tile_b: int | None = None,
                          min_pallas_rows: int = 2048) -> jax.Array:
    """Pallas equivalent of RobotArmObsEncoder.forward.

    joint_pos: (B, JOINT_DIM)
    goal_pos:  (B, GOAL_DIM)
    returns:   (B, OBS_DIM) = concat along the last axis.
    """
    assert joint_pos.ndim == 2 and goal_pos.ndim == 2
    assert joint_pos.shape[0] == goal_pos.shape[0]
    assert joint_pos.shape[1] == JOINT_DIM
    assert goal_pos.shape[1] == GOAL_DIM
    b = joint_pos.shape[0]
    out_dtype = jnp.result_type(joint_pos.dtype, goal_pos.dtype)

    # ---- Small-batch fast path (per-env usage, B of a few rows) -------------
    if b < max(min_pallas_rows, 2):
        return jnp.concatenate(
            (joint_pos.astype(out_dtype), goal_pos.astype(out_dtype)), axis=-1)

    # ---- Batch tiling --------------------------------------------------------
    tile_cap = _default_tile_rows() if tile_b is None else max(int(tile_b),
                                                               _ROW_ALIGN)
    tb = min(tile_cap, b)
    num_tiles = int(pl.cdiv(b, tb))
    # Force an even grid length (>= 2) for a balanced megacore split on v7x.
    if num_tiles == 1:
        num_tiles = 2
    elif num_tiles % 2 == 1:
        num_tiles += 1
    tb = _align_up(pl.cdiv(b, num_tiles), _ROW_ALIGN)
    tb = min(tb, _align_up(b, _ROW_ALIGN))
    grid = (int(pl.cdiv(b, tb)),)

    # Double-buffered, lane-padded VMEM footprint (worst case 4-byte elements):
    # 3 arrays x 2 pipeline buffers x tb rows x 128 lanes x 4 B.
    vmem_need = 3 * 2 * tb * 128 * 4
    vmem_limit = max(32 * 1024 * 1024, vmem_need + 8 * 1024 * 1024)

    bytes_accessed = (
        b * JOINT_DIM * jnp.dtype(joint_pos.dtype).itemsize
        + b * GOAL_DIM * jnp.dtype(goal_pos.dtype).itemsize
        + b * OBS_DIM * jnp.dtype(out_dtype).itemsize)

    return pl.pallas_call(
        _concat_kernel,
        out_shape=jax.ShapeDtypeStruct((b, OBS_DIM), out_dtype),
        grid=grid,
        in_specs=[
            pl.BlockSpec((tb, JOINT_DIM), lambda i: (i, 0)),
            pl.BlockSpec((tb, GOAL_DIM), lambda i: (i, 0)),
        ],
        out_specs=pl.BlockSpec((tb, OBS_DIM), lambda i: (i, 0)),
        compiler_params=pltpu.CompilerParams(
            dimension_semantics=("parallel",),   # shard batch tiles on v7x's 2 TCs
            vmem_limit_bytes=vmem_limit,
        ),
        cost_estimate=pl.CostEstimate(
            flops=0, transcendentals=0, bytes_accessed=bytes_accessed),
    )(joint_pos, goal_pos)


if __name__ == "__main__":
    key = jax.random.PRNGKey(0)
    k1, k2, k3, k4, k5, k6 = jax.random.split(key, 6)

    # Case 1: tiny per-env batch (B=2) -> fast path (fused XLA concat).
    b_small = 2
    jp_s = jax.random.normal(k1, (b_small, JOINT_DIM), dtype=jnp.float32)
    gp_s = jax.random.normal(k2, (b_small, GOAL_DIM), dtype=jnp.float32)
    out_s = jax.block_until_ready(robot_arm_obs_encoder(jp_s, gp_s))
    ref_s = jnp.concatenate((jp_s, gp_s), axis=-1)
    assert out_s.shape == (b_small, OBS_DIM)
    assert jnp.array_equal(out_s, ref_s), "concat mismatch (fast path)"

    # Case 2: rollout buffer with mixed dtypes -> Pallas kernel, even grid of
    # two large batch tiles, in-kernel bf16->f32 promotion, parallel semantics.
    b_big = 4096
    jp_b = jax.random.normal(k3, (b_big, JOINT_DIM), dtype=jnp.float32)
    gp_b = jax.random.normal(k4, (b_big, GOAL_DIM), dtype=jnp.bfloat16)
    out_b = jax.block_until_ready(robot_arm_obs_encoder(jp_b, gp_b))
    ref_b = jnp.concatenate((jp_b, gp_b.astype(jnp.float32)), axis=-1)
    assert out_b.shape == (b_big, OBS_DIM)
    assert out_b.dtype == jnp.float32
    assert jnp.allclose(out_b, ref_b), "concat mismatch (Pallas, big batch)"

    # Case 3: ragged batch forced through the kernel (exercises the clipped
    # edge block; the copy is elementwise so padded OOB rows are ignored).
    b_rag = 712
    jp_r = jax.random.normal(k5, (b_rag, JOINT_DIM), dtype=jnp.float32)
    gp_r = jax.random.normal(k6, (b_rag, GOAL_DIM), dtype=jnp.float32)
    out_r = jax.block_until_ready(
        robot_arm_obs_encoder(jp_r, gp_r, min_pallas_rows=0))
    ref_r = jnp.concatenate((jp_r, gp_r), axis=-1)
    assert out_r.shape == (b_rag, OBS_DIM)
    assert jnp.array_equal(out_r, ref_r), "concat mismatch (Pallas, ragged)"

    print("KERNEL_OK")
</pallas_src>

<mosaic_0001>
module attributes {stable_mosaic.version = 11 : i64} {
  func.func @_concat_kernel(%arg0: i32, %arg1: memref<2048x6xf32, #tpu.memory_space<vmem>>, %arg2: memref<2048x6xbf16, #tpu.memory_space<vmem>>, %arg3: memref<2048x12xf32, #tpu.memory_space<vmem>>) attributes {dimension_semantics = [#tpu.dimension_semantics<parallel>], iteration_bounds = array<i64: 2>, scalar_prefetch = 0 : i64, scratch_operands = 0 : i64, tpu.core_type = #tpu.core_type<tc>, window_params = [{transform_indices = @transform_0, window_bounds = array<i64: 2048, 6>}, {transform_indices = @transform_1, window_bounds = array<i64: 2048, 6>}, {transform_indices = @transform_2, window_bounds = array<i64: 2048, 12>}]} {
    %c0 = arith.constant 0 : index
    %c0_0 = arith.constant 0 : index
    %0 = vector.load %arg1[%c0, %c0_0] : memref<2048x6xf32, #tpu.memory_space<vmem>>, vector<2048x6xf32>
    %c0_1 = arith.constant 0 : index
    %c0_2 = arith.constant 0 : index
    %1 = vector.load %arg3[%c0_1, %c0_2] : memref<2048x12xf32, #tpu.memory_space<vmem>>, vector<2048x6xf32>
    tpu.vector_store %arg3[%c0_1, %c0_2], %0 {strides = array<i32>} : memref<2048x12xf32, #tpu.memory_space<vmem>>, vector<2048x6xf32>,
    %c0_3 = arith.constant 0 : index
    %c0_4 = arith.constant 0 : index
    %2 = vector.load %arg2[%c0_3, %c0_4] : memref<2048x6xbf16, #tpu.memory_space<vmem>>, vector<2048x6xbf16>
    %3 = arith.extf %2 : vector<2048x6xbf16> to vector<2048x6xf32>
    %c0_5 = arith.constant 0 : index
    %c6 = arith.constant 6 : index
    %4 = vector.load %arg3[%c0_5, %c6] : memref<2048x12xf32, #tpu.memory_space<vmem>>, vector<2048x6xf32>
    tpu.vector_store %arg3[%c0_5, %c6], %3 {strides = array<i32>} : memref<2048x12xf32, #tpu.memory_space<vmem>>, vector<2048x6xf32>,
    return
  }
  func.func @transform_0(%arg0: i32) -> (i32, i32) {
    %c0_i32 = arith.constant 0 : i32
    %c0_i32_0 = arith.constant 0 : i32
    return %arg0, %c0_i32 : i32, i32
  }
  func.func @transform_1(%arg0: i32) -> (i32, i32) {
    %c0_i32 = arith.constant 0 : i32
    %c0_i32_0 = arith.constant 0 : i32
    return %arg0, %c0_i32 : i32, i32
  }
  func.func @transform_2(%arg0: i32) -> (i32, i32) {
    %c0_i32 = arith.constant 0 : i32
    %c0_i32_0 = arith.constant 0 : i32
    return %arg0, %c0_i32 : i32, i32
  }
}

</mosaic_0001>

<bundles_post_ra>
// kernel: tpu_custom_call.1
= control target key start
LH: loop header
LB: loop body
LE: loop exit
PB: predicated region body
PF: predicated region fallthrough
CT: control target
= control target key end

     0   :  { %s3868_s9 = smov 0   ;;  %s5470_s0 = inlined_call_operand.vmem [shape: f32[4096,6], index: 0, kind: input, shape index: {}]   ;;  %s5471_s1 = inlined_call_operand.vmem [shape: bf16[4096,6], index: 1, kind: input, shape index: {}]   ;;  %s5472_s2 = inlined_call_operand.vmem [shape: f32[4096,12], index: 2, kind: output, shape index: {}]  }
   0x1 LB: > { %s2543_s10 = sadd.s32 4294967295, %s3850_s9   ;;  %p2547_p0 = scmp.ge.s32.totalorder %s3850_s9, 1  ;;  %s3850_s9 = sphi %s3868_s9, %s12_s9  }
   0x2   : > { %p124_p1 = scmp.lt.s32.totalorder %s3850_s9, 3 }
   0x4   : > { %p125_p2 = pnand %p2547_p0, %p124_p1 }
   0x5   : > { %s2548_s11 = sshll.u32 (!%p125_p2), %s2543_s10, 8  ;;  %s3852_s16 = smov (!%p125_p2), 6   ;;  %vm425_vm0 = vcmask (!%p125_p2), 48128   ;;  %vm2218_vm1 = vcmask (!%p125_p2), 97328  }
   0x6   : > { %128 = sbr.rel (%p125_p2) target bundleno = 392 (0x188), region = 28  ;;  %p152_p3 = scmp.lt.s32.totalorder (!%p125_p2), %s2548_s11, 511 }
   0xd   : > { %s5474_s11 = smov (!%p152_p3, %s2548_s11), 511 }
   0xe   : > { %s2551_s12 = sshll.u32 %s5474_s11, 2  ;;  %s2549_s17 = sshll.u32 %s5474_s11, 3 }
   0xf   : > { %s3882_s15 = scalar_lea.vmem %s5471_s1, %s2551_s12  ;;  %s3906_s20 = scalar_lea.vmem %s5470_s0, %s2549_s17 }
  0x10   : > { %v3069_v0 = vld [vmem:[%s3882_s15 + $0x10] sm:$0xff]   ;;  %v2557_v1 = vld [vmem:[%s3882_s15] sm:$0xff]   ;;  %v3070_v2 = vld [vmem:[%s3882_s15 + $0x18] sm:$0xff]   ;;  %s3914_s23 = scalar_lea.vmem %s5472_s2, %s2549_s17 }
  0x11   : > { %v2566_v3 = vunpack.c.l.bf16 %v3069_v0  ;;  %v2567_v4 = vunpack.c.h.bf16 %v3069_v0  ;;  %v2558_v5 = vunpack.c.l.bf16 %v2557_v1  ;;  %v2559_v6 = vunpack.c.h.bf16 %v2557_v1  ;;  %v3068_v7 = vld [vmem:[%s3882_s15 + $0x8] sm:$0xff]   ;;  %v3071_v13 = vld [vmem:[%s3882_s15 + $0x20] sm:$0xff]   ;;  %v3074_v22 = vld [vmem:[%s3882_s15 + $0x38] sm:$0xff]  }
  0x12   : > { %v3072_v8 = vld [vmem:[%s3882_s15 + $0x28] sm:$0xff]   ;;  %v2570_v9 = vunpack.c.l.bf16 %v3070_v2  ;;  %v2571_v10 = vunpack.c.h.bf16 %v3070_v2  ;;  %v2562_v11 = vunpack.c.l.bf16 %v3068_v7  ;;  %v2563_v12 = vunpack.c.h.bf16 %v3068_v7  ;;  %v3073_v23 = vld [vmem:[%s3882_s15 + $0x30] sm:$0xff]   ;;  %v3075_v31 = vld [vmem:[%s3882_s15 + $0x40] sm:$0xff]  }
  0x13   : > { %v3214_v14 = vpack.i.bf16 %v2567_v4, %v2566_v3  ;;  %v3204_v15 = vpack.i.bf16 %v2559_v6, %v2558_v5  ;;  %v2578_v16 = vunpack.c.l.bf16 %v3072_v8  ;;  %v2579_v17 = vunpack.c.h.bf16 %v3072_v8  ;;  %v3076_v30 = vld [vmem:[%s3882_s15 + $0x48] sm:$0xff]   ;;  %v3078_v38 = vld [vmem:[%s3882_s15 + $0x58] sm:$0xff]   ;;  %v3077_v39 = vld [vmem:[%s3882_s15 + $0x50] sm:$0xff]  }
  0x14   : > { %v3219_v18 = vpack.i.bf16 %v2571_v10, %v2570_v9  ;;  %v3209_v19 = vpack.i.bf16 %v2563_v12, %v2562_v11  ;;  %v2574_v20 = vunpack.c.l.bf16 %v3071_v13  ;;  %v2575_v21 = vunpack.c.h.bf16 %v3071_v13  ;;  %v3080_v46 = vld [vmem:[%s3882_s15 + $0x68] sm:$0xff]   ;;  %v3079_v47 = vld [vmem:[%s3882_s15 + $0x60] sm:$0xff]   ;;  %v3082_v50 = vld [vmem:[%s3882_s15 + $0x78] sm:$0xff]  }
  0x15   : > { %3215 = vrot.lane.b32.xlu1 %v3214_v14, %s3852_s16  ;;  %3205 = vrot.lane.b32.xlu0 %v3204_v15, %s3852_s16  ;;  %v3229_v24 = vpack.i.bf16 %v2579_v17, %v2578_v16  ;;  %v2586_v25 = vunpack.c.l.bf16 %v3074_v22  ;;  %v2587_v27 = vunpack.c.h.bf16 %v3074_v22  ;;  %v2582_v28 = vunpack.c.l.bf16 %v3073_v23  ;;  %v173_v51 = vld [vmem:[%s3906_s20 + $0x20] sm:$0xff]  ;;  %v174_v56 = vld [vmem:[%s3906_s20 + $0x28] sm:$0xff] }
  0x16   : > { %v3224_v26 = vpack.i.bf16 %v2575_v21, %v2574_v20  ;;  %v2583_v29 = vunpack.c.h.bf16 %v3073_v23  ;;  %v2594_v32 = vunpack.c.l.bf16 %v3076_v30  ;;  %v2595_v33 = vunpack.c.h.bf16 %v3076_v30  ;;  %430 = vst.msk [vmem:[%s3914_s23 + $0x20] sm:$0xff] %vm425_vm0, %v173_v51  ;;  %v169_v57 = vld [vmem:[%s3906_s20] sm:$0xff]  ;;  %v3081_v58 = vld [vmem:[%s3882_s15 + $0x70] sm:$0xff]   ;;  %431 = vst.msk [vmem:[%s3914_s23 + $0x28] sm:$0xff] %vm425_vm0, %v174_v56 }
  0x17   : > { %v3239_v34 = vpack.i.bf16 %v2587_v27, %v2586_v25  ;;  %v2590_v36 = vunpack.c.l.bf16 %v3075_v31  ;;  %v2591_v37 = vunpack.c.h.bf16 %v3075_v31  ;;  %v2602_v41 = vunpack.c.l.bf16 %v3078_v38  ;;  %v170_v59 = vld [vmem:[%s3906_s20 + $0x8] sm:$0xff]  ;;  %426 = vst.msk [vmem:[%s3914_s23] sm:$0xff] %vm425_vm0, %v169_v57  ;;  %v175_v60 = vld [vmem:[%s3906_s20 + $0x30] sm:$0xff]  ;;  %v176_v61 = vld [vmem:[%s3906_s20 + $0x38] sm:$0xff] }
  0x18   : > { %v3234_v35 = vpack.i.bf16 %v2583_v29, %v2582_v28  ;;  %v3249_v40 = vpack.i.bf16 %v2595_v33, %v2594_v32  ;;  %v2603_v43 = vunpack.c.h.bf16 %v3078_v38  ;;  %v2598_v44 = vunpack.c.l.bf16 %v3077_v39  ;;  %427 = vst.msk [vmem:[%s3914_s23 + $0x8] sm:$0xff] %vm425_vm0, %v170_v59  ;;  %v171_v62 = vld [vmem:[%s3906_s20 + $0x10] sm:$0xff]  ;;  %v3084_v1 = vld [vmem:[%s3882_s15 + $0x88] sm:$0xff]   ;;  %432 = vst.msk [vmem:[%s3914_s23 + $0x30] sm:$0xff] %vm425_vm0, %v175_v60 }
  0x19   : > { %3220 = vrot.lane.b32.xlu1 %v3219_v18, %s3852_s16  ;;  %3210 = vrot.lane.b32.xlu0 %v3209_v19, %s3852_s16  ;;  %v3244_v42 = vpack.i.bf16 %v2591_v37, %v2590_v36  ;;  %v2599_v45 = vunpack.c.h.bf16 %v3077_v39  ;;  %v2610_v48 = vunpack.c.l.bf16 %v3080_v46  ;;  %v2611_v49 = vunpack.c.h.bf16 %v3080_v46  ;;  %433 = vst.msk [vmem:[%s3914_s23 + $0x38] sm:$0xff] %vm425_vm0, %v176_v61  ;;  %v172_v2 = vld [vmem:[%s3906_s20 + $0x18] sm:$0xff] }
  0x1a   : > { %v3259_v52 = vpack.i.bf16 %v2603_v43, %v2602_v41  ;;  %v2606_v54 = vunpack.c.l.bf16 %v3079_v47  ;;  %v2607_v55 = vunpack.c.h.bf16 %v3079_v47  ;;  %v2618_v0 = vunpack.c.l.bf16 %v3082_v50  ;;  %428 = vst.msk [vmem:[%s3914_s23 + $0x10] sm:$0xff] %vm425_vm0, %v171_v62  ;;  %429 = vst.msk [vmem:[%s3914_s23 + $0x18] sm:$0xff] %vm425_vm0, %v172_v2  ;;  %v179_v7 = vld [vmem:[%s3906_s20 + $0x50] sm:$0xff]  ;;  %v180_v8 = vld [vmem:[%s3906_s20 + $0x58] sm:$0xff] }
  0x1b   : > { %v3254_v53 = vpack.i.bf16 %v2599_v45, %v2598_v44  ;;  %v3269_v63 = vpack.i.bf16 %v2611_v49, %v2610_v48  ;;  %v2619_v4 = vunpack.c.h.bf16 %v3082_v50  ;;  %v2614_v5 = vunpack.c.l.bf16 %v3081_v58  ;;  %v3083_v9 = vld [vmem:[%s3882_s15 + $0x80] sm:$0xff]   ;;  %436 = vst.msk [vmem:[%s3914_s23 + $0x50] sm:$0xff] %vm425_vm0, %v179_v7  ;;  %437 = vst.msk [vmem:[%s3914_s23 + $0x58] sm:$0xff] %vm425_vm0, %v180_v8  ;;  %v178_v11 = vld [vmem:[%s3906_s20 + $0x48] sm:$0xff] }
  0x1c   : > { %v3264_v3 = vpack.i.bf16 %v2607_v55, %v2606_v54  ;;  %v2615_v6 = vunpack.c.h.bf16 %v3081_v58  ;;  %v177_v10 = vld [vmem:[%s3906_s20 + $0x40] sm:$0xff]  ;;  %435 = vst.msk [vmem:[%s3914_s23 + $0x48] sm:$0xff] %vm425_vm0, %v178_v11  ;;  %v183_v12 = vld [vmem:[%s3906_s20 + $0x70] sm:$0xff]  ;;  %v184_v13 = vld [vmem:[%s3906_s20 + $0x78] sm:$0xff]  ;;  %v2626_v14 = vunpack.c.l.bf16 %v3084_v1  ;;  %v2627_v15 = vunpack.c.h.bf16 %v3084_v1 }
  0x1d   : > { %3230 = vrot.lane.b32.xlu1 %v3229_v24, %s3852_s16  ;;  %3225 = vrot.lane.b32.xlu0 %v3224_v26, %s3852_s16  ;;  %434 = vst.msk [vmem:[%s3914_s23 + $0x40] sm:$0xff] %vm425_vm0, %v177_v10  ;;  %v3086_v16 = vld [vmem:[%s3882_s15 + $0x98] sm:$0xff]   ;;  %v3279_v19 = vpack.i.bf16 %v2619_v4, %v2618_v0  ;;  %v2622_v21 = vunpack.c.l.bf16 %v3083_v9  ;;  %v2623_v22 = vunpack.c.h.bf16 %v3083_v9 }
  0x1e   : > { %440 = vst.msk [vmem:[%s3914_s23 + $0x70] sm:$0xff] %vm425_vm0, %v183_v12  ;;  %441 = vst.msk [vmem:[%s3914_s23 + $0x78] sm:$0xff] %vm425_vm0, %v184_v13  ;;  %v181_v17 = vld [vmem:[%s3906_s20 + $0x60] sm:$0xff]  ;;  %v182_v18 = vld [vmem:[%s3906_s20 + $0x68] sm:$0xff]  ;;  %v3274_v20 = vpack.i.bf16 %v2615_v6, %v2614_v5  ;;  %v3289_v29 = vpack.i.bf16 %v2627_v15, %v2626_v14  ;;  %v2634_v30 = vunpack.c.l.bf16 %v3086_v16 }
  0x1f   : > { %v3085_v23 = vld [vmem:[%s3882_s15 + $0x90] sm:$0xff]   ;;  %438 = vst.msk [vmem:[%s3914_s23 + $0x60] sm:$0xff] %vm425_vm0, %v181_v17  ;;  %439 = vst.msk [vmem:[%s3914_s23 + $0x68] sm:$0xff] %vm425_vm0, %v182_v18  ;;  %v188_v25 = vld [vmem:[%s3906_s20 + $0x98] sm:$0xff] }
  0x20   : > { %v187_v24 = vld [vmem:[%s3906_s20 + $0x90] sm:$0xff]  ;;  %v185_v26 = vld [vmem:[%s3906_s20 + $0x80] sm:$0xff]  ;;  %v186_v27 = vld [vmem:[%s3906_s20 + $0x88] sm:$0xff]  ;;  %445 = vst.msk [vmem:[%s3914_s23 + $0x98] sm:$0xff] %vm425_vm0, %v188_v25  ;;  %v2630_v36 = vunpack.c.l.bf16 %v3085_v23  ;;  %v2631_v37 = vunpack.c.h.bf16 %v3085_v23 }
  0x21   : > { %3240 = vrot.lane.b32.xlu1 %v3239_v34, %s3852_s16  ;;  %3235 = vrot.lane.b32.xlu0 %v3234_v35, %s3852_s16  ;;  %444 = vst.msk [vmem:[%s3914_s23 + $0x90] sm:$0xff] %vm425_vm0, %v187_v24  ;;  %442 = vst.msk [vmem:[%s3914_s23 + $0x80] sm:$0xff] %vm425_vm0, %v185_v26  ;;  %v3284_v34 = vpack.i.bf16 %v2623_v22, %v2622_v21  ;;  %v2635_v35 = vunpack.c.h.bf16 %v3086_v16 }
  0x22   : > { %443 = vst.msk [vmem:[%s3914_s23 + $0x88] sm:$0xff] %vm425_vm0, %v186_v27  ;;  %v191_v28 = vld [vmem:[%s3906_s20 + $0xb0] sm:$0xff]  ;;  %v192_v31 = vld [vmem:[%s3906_s20 + $0xb8] sm:$0xff]  ;;  %v189_v32 = vld [vmem:[%s3906_s20 + $0xa0] sm:$0xff]  ;;  %v3294_v50 = vpack.i.bf16 %v2631_v37, %v2630_v36 }
  0x23   : > { %448 = vst.msk [vmem:[%s3914_s23 + $0xb0] sm:$0xff] %vm425_vm0, %v191_v28  ;;  %v190_v33 = vld [vmem:[%s3906_s20 + $0xa8] sm:$0xff]  ;;  %v3087_v39 = vld [vmem:[%s3882_s15 + $0xa0] sm:$0xff]   ;;  %449 = vst.msk [vmem:[%s3914_s23 + $0xb8] sm:$0xff] %vm425_vm0, %v192_v31  ;;  %v3299_v49 = vpack.i.bf16 %v2635_v35, %v2634_v30 }
  0x24   : > { %v3088_v38 = vld [vmem:[%s3882_s15 + $0xa8] sm:$0xff]   ;;  %446 = vst.msk [vmem:[%s3914_s23 + $0xa0] sm:$0xff] %vm425_vm0, %v189_v32  ;;  %447 = vst.msk [vmem:[%s3914_s23 + $0xa8] sm:$0xff] %vm425_vm0, %v190_v33  ;;  %v196_v41 = vld [vmem:[%s3906_s20 + $0xd8] sm:$0xff]  ;;  %v2638_v51 = vunpack.c.l.bf16 %v3087_v39 }
  0x25   : > { %3250 = vrot.lane.b32.xlu1 %v3249_v40, %s3852_s16  ;;  %3245 = vrot.lane.b32.xlu0 %v3244_v42, %s3852_s16  ;;  %v195_v40 = vld [vmem:[%s3906_s20 + $0xd0] sm:$0xff]  ;;  %v193_v42 = vld [vmem:[%s3906_s20 + $0xc0] sm:$0xff]  ;;  %v2642_v44 = vunpack.c.l.bf16 %v3088_v38  ;;  %v2643_v45 = vunpack.c.h.bf16 %v3088_v38 }
  0x26   : > { %452 = vst.msk [vmem:[%s3914_s23 + $0xd0] sm:$0xff] %vm425_vm0, %v195_v40  ;;  %453 = vst.msk [vmem:[%s3914_s23 + $0xd8] sm:$0xff] %vm425_vm0, %v196_v41  ;;  %v194_v43 = vld [vmem:[%s3906_s20 + $0xc8] sm:$0xff]  ;;  %v199_v46 = vld [vmem:[%s3906_s20 + $0xf0] sm:$0xff] }
  0x27   : > { %450 = vst.msk [vmem:[%s3914_s23 + $0xc0] sm:$0xff] %vm425_vm0, %v193_v42  ;;  %451 = vst.msk [vmem:[%s3914_s23 + $0xc8] sm:$0xff] %vm425_vm0, %v194_v43  ;;  %v200_v47 = vld [vmem:[%s3906_s20 + $0xf8] sm:$0xff]  ;;  %v197_v48 = vld [vmem:[%s3906_s20 + $0xe0] sm:$0xff]  ;;  %v3309_v60 = vpack.i.bf16 %v2643_v45, %v2642_v44 }
  0x28   : > { %456 = vst.msk [vmem:[%s3914_s23 + $0xf0] sm:$0xff] %vm425_vm0, %v199_v46  ;;  %457 = vst.msk [vmem:[%s3914_s23 + $0xf8] sm:$0xff] %vm425_vm0, %v200_v47  ;;  %v198_v54 = vld [vmem:[%s3906_s20 + $0xe8] sm:$0xff]  ;;  %v3089_v55 = vld [vmem:[%s3882_s15 + $0xb0] sm:$0xff]  }
  0x29   : > { %3260 = vrot.lane.b32.xlu1 %v3259_v52, %s3852_s16  ;;  %3255 = vrot.lane.b32.xlu0 %v3254_v53, %s3852_s16  ;;  %v2639_v52 = vunpack.c.h.bf16 %v3087_v39  ;;  %v3090_v53 = vld [vmem:[%s3882_s15 + $0xb8] sm:$0xff]   ;;  %454 = vst.msk [vmem:[%s3914_s23 + $0xe0] sm:$0xff] %vm425_vm0, %v197_v48  ;;  %v2647_v4 = vunpack.c.h.bf16 %v3089_v55 }
  0x2a   : > { %455 = vst.msk [vmem:[%s3914_s23 + $0xe8] sm:$0xff] %vm425_vm0, %v198_v54  ;;  %v203_v56 = vld [vmem:[%s3906_s20 + $0x110] sm:$0xff]  ;;  %v204_v57 = vld [vmem:[%s3906_s20 + $0x118] sm:$0xff]  ;;  %v201_v58 = vld [vmem:[%s3906_s20 + $0x100] sm:$0xff]  ;;  %v2650_v61 = vunpack.c.l.bf16 %v3090_v53  ;;  %v2651_v2 = vunpack.c.h.bf16 %v3090_v53 }
  0x2b   : > { %460 = vst.msk [vmem:[%s3914_s23 + $0x110] sm:$0xff] %vm425_vm0, %v203_v56  ;;  %461 = vst.msk [vmem:[%s3914_s23 + $0x118] sm:$0xff] %vm425_vm0, %v204_v57  ;;  %v202_v59 = vld [vmem:[%s3906_s20 + $0x108] sm:$0xff]  ;;  %v208_v0 = vld [vmem:[%s3906_s20 + $0x138] sm:$0xff]  ;;  %v3304_v1 = vpack.i.bf16 %v2639_v52, %v2638_v51 }
  0x2c   : > { %v3092_v62 = vld [vmem:[%s3882_s15 + $0xc8] sm:$0xff]   ;;  %458 = vst.msk [vmem:[%s3914_s23 + $0x100] sm:$0xff] %vm425_vm0, %v201_v58  ;;  %459 = vst.msk [vmem:[%s3914_s23 + $0x108] sm:$0xff] %vm425_vm0, %v202_v59  ;;  %v205_v5 = vld [vmem:[%s3906_s20 + $0x120] sm:$0xff]  ;;  %v3319_v16 = vpack.i.bf16 %v2651_v2, %v2650_v61 }
  0x2d   : > { %3270 = vrot.lane.b32.xlu1 %v3269_v63, %s3852_s16  ;;  %3265 = vrot.lane.b32.xlu0 %v3264_v3, %s3852_s16  ;;  %v207_v63 = vld [vmem:[%s3906_s20 + $0x130] sm:$0xff]  ;;  %v2646_v3 = vunpack.c.l.bf16 %v3089_v55  ;;  %465 = vst.msk [vmem:[%s3914_s23 + $0x138] sm:$0xff] %vm425_vm0, %v208_v0  ;;  %v2658_v12 = vunpack.c.l.bf16 %v3092_v62  ;;  %v2659_v13 = vunpack.c.h.bf16 %v3092_v62 }
  0x2e   : > { %464 = vst.msk [vmem:[%s3914_s23 + $0x130] sm:$0xff] %vm425_vm0, %v207_v63  ;;  %v206_v6 = vld [vmem:[%s3906_s20 + $0x128] sm:$0xff]  ;;  %v3091_v7 = vld [vmem:[%s3882_s15 + $0xc0] sm:$0xff]   ;;  %462 = vst.msk [vmem:[%s3914_s23 + $0x120] sm:$0xff] %vm425_vm0, %v205_v5 }
  0x2f   : > { %463 = vst.msk [vmem:[%s3914_s23 + $0x128] sm:$0xff] %vm425_vm0, %v206_v6  ;;  %v211_v8 = vld [vmem:[%s3906_s20 + $0x150] sm:$0xff]  ;;  %v212_v9 = vld [vmem:[%s3906_s20 + $0x158] sm:$0xff]  ;;  %v209_v10 = vld [vmem:[%s3906_s20 + $0x140] sm:$0xff]  ;;  %v3314_v17 = vpack.i.bf16 %v2647_v4, %v2646_v3  ;;  %v2654_v18 = vunpack.c.l.bf16 %v3091_v7  ;;  %v3329_v27 = vpack.i.bf16 %v2659_v13, %v2658_v12 }
  0x30   : > { %468 = vst.msk [vmem:[%s3914_s23 + $0x150] sm:$0xff] %vm425_vm0, %v211_v8  ;;  %v210_v11 = vld [vmem:[%s3906_s20 + $0x148] sm:$0xff]  ;;  %v3094_v14 = vld [vmem:[%s3882_s15 + $0xd8] sm:$0xff]   ;;  %469 = vst.msk [vmem:[%s3914_s23 + $0x158] sm:$0xff] %vm425_vm0, %v212_v9 }
  0x31   : > { %3280 = vrot.lane.b32.xlu1 %v3279_v19, %s3852_s16  ;;  %3275 = vrot.lane.b32.xlu0 %v3274_v20, %s3852_s16  ;;  %466 = vst.msk [vmem:[%s3914_s23 + $0x140] sm:$0xff] %vm425_vm0, %v209_v10  ;;  %467 = vst.msk [vmem:[%s3914_s23 + $0x148] sm:$0xff] %vm425_vm0, %v210_v11  ;;  %v2655_v19 = vunpack.c.h.bf16 %v3091_v7  ;;  %v2666_v28 = vunpack.c.l.bf16 %v3094_v14  ;;  %v2667_v32 = vunpack.c.h.bf16 %v3094_v14 }
  0x32   : > { %v215_v15 = vld [vmem:[%s3906_s20 + $0x170] sm:$0xff]  ;;  %v216_v20 = vld [vmem:[%s3906_s20 + $0x178] sm:$0xff]  ;;  %v213_v21 = vld [vmem:[%s3906_s20 + $0x160] sm:$0xff] }
  0x33   : > { %472 = vst.msk [vmem:[%s3914_s23 + $0x170] sm:$0xff] %vm425_vm0, %v215_v15  ;;  %v3093_v22 = vld [vmem:[%s3882_s15 + $0xd0] sm:$0xff]   ;;  %473 = vst.msk [vmem:[%s3914_s23 + $0x178] sm:$0xff] %vm425_vm0, %v216_v20  ;;  %v214_v23 = vld [vmem:[%s3906_s20 + $0x168] sm:$0xff]  ;;  %v3324_v31 = vpack.i.bf16 %v2655_v19, %v2654_v18  ;;  %v3339_v47 = vpack.i.bf16 %v2667_v32, %v2666_v28 }
  0x34   : > { %470 = vst.msk [vmem:[%s3914_s23 + $0x160] sm:$0xff] %vm425_vm0, %v213_v21  ;;  %471 = vst.msk [vmem:[%s3914_s23 + $0x168] sm:$0xff] %vm425_vm0, %v214_v23  ;;  %v219_v24 = vld [vmem:[%s3906_s20 + $0x190] sm:$0xff]  ;;  %v220_v25 = vld [vmem:[%s3906_s20 + $0x198] sm:$0xff]  ;;  %v2662_v33 = vunpack.c.l.bf16 %v3093_v22 }
  0x35   : > { %3290 = vrot.lane.b32.xlu1 %v3289_v29, %s3852_s16  ;;  %3285 = vrot.lane.b32.xlu0 %v3284_v34, %s3852_s16  ;;  %v217_v26 = vld [vmem:[%s3906_s20 + $0x180] sm:$0xff]  ;;  %v3096_v29 = vld [vmem:[%s3882_s15 + $0xe8] sm:$0xff]   ;;  %v2663_v34 = vunpack.c.h.bf16 %v3093_v22 }
  0x36   : > { %476 = vst.msk [vmem:[%s3914_s23 + $0x190] sm:$0xff] %vm425_vm0, %v219_v24  ;;  %477 = vst.msk [vmem:[%s3914_s23 + $0x198] sm:$0xff] %vm425_vm0, %v220_v25  ;;  %v218_v30 = vld [vmem:[%s3906_s20 + $0x188] sm:$0xff]  ;;  %v223_v35 = vld [vmem:[%s3906_s20 + $0x1b0] sm:$0xff]  ;;  %v2674_v42 = vunpack.c.l.bf16 %v3096_v29  ;;  %v2675_v43 = vunpack.c.h.bf16 %v3096_v29 }
  0x37   : > { %474 = vst.msk [vmem:[%s3914_s23 + $0x180] sm:$0xff] %vm425_vm0, %v217_v26  ;;  %475 = vst.msk [vmem:[%s3914_s23 + $0x188] sm:$0xff] %vm425_vm0, %v218_v30  ;;  %v224_v36 = vld [vmem:[%s3906_s20 + $0x1b8] sm:$0xff]  ;;  %v3095_v37 = vld [vmem:[%s3882_s15 + $0xe0] sm:$0xff]   ;;  %v3334_v48 = vpack.i.bf16 %v2663_v34, %v2662_v33 }
  0x38   : > { %480 = vst.msk [vmem:[%s3914_s23 + $0x1b0] sm:$0xff] %vm425_vm0, %v223_v35  ;;  %481 = vst.msk [vmem:[%s3914_s23 + $0x1b8] sm:$0xff] %vm425_vm0, %v224_v36  ;;  %v221_v38 = vld [vmem:[%s3906_s20 + $0x1a0] sm:$0xff]  ;;  %v222_v39 = vld [vmem:[%s3906_s20 + $0x1a8] sm:$0xff]  ;;  %v3349_v56 = vpack.i.bf16 %v2675_v43, %v2674_v42 }
  0x39   : > { %3300 = vrot.lane.b32.xlu1 %v3299_v49, %s3852_s16  ;;  %3295 = vrot.lane.b32.xlu0 %v3294_v50, %s3852_s16  ;;  %478 = vst.msk [vmem:[%s3914_s23 + $0x1a0] sm:$0xff] %vm425_vm0, %v221_v38  ;;  %479 = vst.msk [vmem:[%s3914_s23 + $0x1a8] sm:$0xff] %vm425_vm0, %v222_v39  ;;  %v2670_v49 = vunpack.c.l.bf16 %v3095_v37  ;;  %v2671_v50 = vunpack.c.h.bf16 %v3095_v37 }
  0x3a   : > { %v227_v40 = vld [vmem:[%s3906_s20 + $0x1d0] sm:$0xff]  ;;  %v228_v41 = vld [vmem:[%s3906_s20 + $0x1d8] sm:$0xff]  ;;  %v225_v45 = vld [vmem:[%s3906_s20 + $0x1c0] sm:$0xff] }
  0x3b   : > { %v3098_v44 = vld [vmem:[%s3882_s15 + $0xf8] sm:$0xff]   ;;  %484 = vst.msk [vmem:[%s3914_s23 + $0x1d0] sm:$0xff] %vm425_vm0, %v227_v40  ;;  %485 = vst.msk [vmem:[%s3914_s23 + $0x1d8] sm:$0xff] %vm425_vm0, %v228_v41  ;;  %v226_v46 = vld [vmem:[%s3906_s20 + $0x1c8] sm:$0xff]  ;;  %v3344_v61 = vpack.i.bf16 %v2671_v50, %v2670_v49 }
  0x3c   : > { %v3097_v51 = vld [vmem:[%s3882_s15 + $0xf0] sm:$0xff]   ;;  %482 = vst.msk [vmem:[%s3914_s23 + $0x1c0] sm:$0xff] %vm425_vm0, %v225_v45  ;;  %483 = vst.msk [vmem:[%s3914_s23 + $0x1c8] sm:$0xff] %vm425_vm0, %v226_v46  ;;  %v232_v53 = vld [vmem:[%s3906_s20 + $0x1f8] sm:$0xff]  ;;  %v2682_v57 = vunpack.c.l.bf16 %v3098_v44  ;;  %v2683_v62 = vunpack.c.h.bf16 %v3098_v44 }
  0x3d   : > { %3310 = vrot.lane.b32.xlu1 %v3309_v60, %s3852_s16  ;;  %3305 = vrot.lane.b32.xlu0 %v3304_v1, %s3852_s16  ;;  %v231_v52 = vld [vmem:[%s3906_s20 + $0x1f0] sm:$0xff]  ;;  %v229_v54 = vld [vmem:[%s3906_s20 + $0x1e0] sm:$0xff]  ;;  %v2678_v63 = vunpack.c.l.bf16 %v3097_v51  ;;  %v2679_v0 = vunpack.c.h.bf16 %v3097_v51 }
  0x3e   : > { %488 = vst.msk [vmem:[%s3914_s23 + $0x1f0] sm:$0xff] %vm425_vm0, %v231_v52  ;;  %v230_v55 = vld [vmem:[%s3906_s20 + $0x1e8] sm:$0xff]  ;;  %489 = vst.msk [vmem:[%s3914_s23 + $0x1f8] sm:$0xff] %vm425_vm0, %v232_v53  ;;  %v235_v58 = vld [vmem:[%s3906_s20 + $0x210] sm:$0xff]  ;;  %v3359_v9 = vpack.i.bf16 %v2683_v62, %v2682_v57 }
  0x3f   : > { %486 = vst.msk [vmem:[%s3914_s23 + $0x1e0] sm:$0xff] %vm425_vm0, %v229_v54  ;;  %487 = vst.msk [vmem:[%s3914_s23 + $0x1e8] sm:$0xff] %vm425_vm0, %v230_v55  ;;  %v236_v59 = vld [vmem:[%s3906_s20 + $0x218] sm:$0xff]  ;;  %v233_v60 = vld [vmem:[%s3906_s20 + $0x200] sm:$0xff]  ;;  %v3354_v10 = vpack.i.bf16 %v2679_v0, %v2678_v63 }
  0x40   : > { %v3100_v1 = vld [vmem:[%s3882_s15 + $0x108] sm:$0xff]   ;;  %492 = vst.msk [vmem:[%s3914_s23 + $0x210] sm:$0xff] %vm425_vm0, %v235_v58  ;;  %493 = vst.msk [vmem:[%s3914_s23 + $0x218] sm:$0xff] %vm425_vm0, %v236_v59  ;;  %v3099_v3 = vld [vmem:[%s3882_s15 + $0x100] sm:$0xff]  }
  0x41   : > { %3320 = vrot.lane.b32.xlu1 %v3319_v16, %s3852_s16  ;;  %3315 = vrot.lane.b32.xlu0 %v3314_v17, %s3852_s16  ;;  %v234_v2 = vld [vmem:[%s3906_s20 + $0x208] sm:$0xff]  ;;  %490 = vst.msk [vmem:[%s3914_s23 + $0x200] sm:$0xff] %vm425_vm0, %v233_v60  ;;  %v2690_v4 = vunpack.c.l.bf16 %v3100_v1  ;;  %v2691_v5 = vunpack.c.h.bf16 %v3100_v1  ;;  %v2686_v11 = vunpack.c.l.bf16 %v3099_v3  ;;  %v2687_v12 = vunpack.c.h.bf16 %v3099_v3 }
  0x42   : > { %491 = vst.msk [vmem:[%s3914_s23 + $0x208] sm:$0xff] %vm425_vm0, %v234_v2  ;;  %v239_v6 = vld [vmem:[%s3906_s20 + $0x230] sm:$0xff]  ;;  %v240_v7 = vld [vmem:[%s3906_s20 + $0x238] sm:$0xff]  ;;  %v237_v8 = vld [vmem:[%s3906_s20 + $0x220] sm:$0xff] }
  0x43   : > { %v3102_v13 = vld [vmem:[%s3882_s15 + $0x118] sm:$0xff]   ;;  %496 = vst.msk [vmem:[%s3914_s23 + $0x230] sm:$0xff] %vm425_vm0, %v239_v6  ;;  %497 = vst.msk [vmem:[%s3914_s23 + $0x238] sm:$0xff] %vm425_vm0, %v240_v7  ;;  %v238_v14 = vld [vmem:[%s3906_s20 + $0x228] sm:$0xff]  ;;  %v3369_v16 = vpack.i.bf16 %v2691_v5, %v2690_v4  ;;  %v3364_v21 = vpack.i.bf16 %v2687_v12, %v2686_v11 }
  0x44   : > { %494 = vst.msk [vmem:[%s3914_s23 + $0x220] sm:$0xff] %vm425_vm0, %v237_v8  ;;  %v3101_v15 = vld [vmem:[%s3882_s15 + $0x110] sm:$0xff]   ;;  %495 = vst.msk [vmem:[%s3914_s23 + $0x228] sm:$0xff] %vm425_vm0, %v238_v14  ;;  %v2698_v17 = vunpack.c.l.bf16 %v3102_v13  ;;  %v244_v19 = vld [vmem:[%s3906_s20 + $0x258] sm:$0xff]  ;;  %v2699_v22 = vunpack.c.h.bf16 %v3102_v13 }
  0x45   : > { %3330 = vrot.lane.b32.xlu1 %v3329_v27, %s3852_s16  ;;  %3325 = vrot.lane.b32.xlu0 %v3324_v31, %s3852_s16  ;;  %v243_v18 = vld [vmem:[%s3906_s20 + $0x250] sm:$0xff]  ;;  %v241_v20 = vld [vmem:[%s3906_s20 + $0x240] sm:$0xff]  ;;  %v2694_v23 = vunpack.c.l.bf16 %v3101_v15  ;;  %v2695_v24 = vunpack.c.h.bf16 %v3101_v15 }
  0x46   : > { %v3104_v25 = vld [vmem:[%s3882_s15 + $0x128] sm:$0xff]   ;;  %500 = vst.msk [vmem:[%s3914_s23 + $0x250] sm:$0xff] %vm425_vm0, %v243_v18  ;;  %501 = vst.msk [vmem:[%s3914_s23 + $0x258] sm:$0xff] %vm425_vm0, %v244_v19  ;;  %v3103_v27 = vld [vmem:[%s3882_s15 + $0x120] sm:$0xff]   ;;  %v3379_v33 = vpack.i.bf16 %v2699_v22, %v2698_v17 }
  0x47   : > { %v242_v26 = vld [vmem:[%s3906_s20 + $0x248] sm:$0xff]  ;;  %498 = vst.msk [vmem:[%s3914_s23 + $0x240] sm:$0xff] %vm425_vm0, %v241_v20  ;;  %v2706_v28 = vunpack.c.l.bf16 %v3104_v25  ;;  %v2707_v29 = vunpack.c.h.bf16 %v3104_v25  ;;  %v247_v30 = vld [vmem:[%s3906_s20 + $0x270] sm:$0xff]  ;;  %v248_v31 = vld [vmem:[%s3906_s20 + $0x278] sm:$0xff]  ;;  %v3374_v34 = vpack.i.bf16 %v2695_v24, %v2694_v23  ;;  %v2702_v35 = vunpack.c.l.bf16 %v3103_v27 }
  0x48   : > { %499 = vst.msk [vmem:[%s3914_s23 + $0x248] sm:$0xff] %vm425_vm0, %v242_v26  ;;  %v245_v32 = vld [vmem:[%s3906_s20 + $0x260] sm:$0xff]  ;;  %v2703_v36 = vunpack.c.h.bf16 %v3103_v27  ;;  %v3106_v37 = vld [vmem:[%s3882_s15 + $0x138] sm:$0xff]   ;;  %504 = vst.msk [vmem:[%s3914_s23 + $0x270] sm:$0xff] %vm425_vm0, %v247_v30 }
  0x49   : > { %3340 = vrot.lane.b32.xlu1 %v3339_v47, %s3852_s16  ;;  %3335 = vrot.lane.b32.xlu0 %v3334_v48, %s3852_s16  ;;  %505 = vst.msk [vmem:[%s3914_s23 + $0x278] sm:$0xff] %vm425_vm0, %v248_v31  ;;  %v246_v38 = vld [vmem:[%s3906_s20 + $0x268] sm:$0xff]  ;;  %v3389_v40 = vpack.i.bf16 %v2707_v29, %v2706_v28  ;;  %v2714_v41 = vunpack.c.l.bf16 %v3106_v37  ;;  %v2715_v46 = vunpack.c.h.bf16 %v3106_v37 }
  0x4a   : > { %502 = vst.msk [vmem:[%s3914_s23 + $0x260] sm:$0xff] %vm425_vm0, %v245_v32  ;;  %v3105_v39 = vld [vmem:[%s3882_s15 + $0x130] sm:$0xff]   ;;  %503 = vst.msk [vmem:[%s3914_s23 + $0x268] sm:$0xff] %vm425_vm0, %v246_v38  ;;  %v252_v43 = vld [vmem:[%s3906_s20 + $0x298] sm:$0xff]  ;;  %v3384_v45 = vpack.i.bf16 %v2703_v36, %v2702_v35 }
  0x4b   : > { %v251_v42 = vld [vmem:[%s3906_s20 + $0x290] sm:$0xff]  ;;  %v249_v44 = vld [vmem:[%s3906_s20 + $0x280] sm:$0xff]  ;;  %v2710_v47 = vunpack.c.l.bf16 %v3105_v39  ;;  %v2711_v48 = vunpack.c.h.bf16 %v3105_v39  ;;  %v3108_v49 = vld [vmem:[%s3882_s15 + $0x148] sm:$0xff]   ;;  %509 = vst.msk [vmem:[%s3914_s23 + $0x298] sm:$0xff] %vm425_vm0, %v252_v43  ;;  %v3399_v57 = vpack.i.bf16 %v2715_v46, %v2714_v41 }
  0x4c   : > { %508 = vst.msk [vmem:[%s3914_s23 + $0x290] sm:$0xff] %vm425_vm0, %v251_v42  ;;  %v250_v50 = vld [vmem:[%s3906_s20 + $0x288] sm:$0xff]  ;;  %506 = vst.msk [vmem:[%s3914_s23 + $0x280] sm:$0xff] %vm425_vm0, %v249_v44  ;;  %v3107_v51 = vld [vmem:[%s3882_s15 + $0x140] sm:$0xff]   ;;  %v2722_v52 = vunpack.c.l.bf16 %v3108_v49  ;;  %v2723_v53 = vunpack.c.h.bf16 %v3108_v49 }
  0x4d   : > { %3350 = vrot.lane.b32.xlu1 %v3349_v56, %s3852_s16  ;;  %3345 = vrot.lane.b32.xlu0 %v3344_v61, %s3852_s16  ;;  %507 = vst.msk [vmem:[%s3914_s23 + $0x288] sm:$0xff] %vm425_vm0, %v250_v50  ;;  %v255_v54 = vld [vmem:[%s3906_s20 + $0x2b0] sm:$0xff]  ;;  %v3394_v58 = vpack.i.bf16 %v2711_v48, %v2710_v47  ;;  %v2718_v59 = vunpack.c.l.bf16 %v3107_v51  ;;  %v2719_v60 = vunpack.c.h.bf16 %v3107_v51 }
  0x4e   : > { %v256_v55 = vld [vmem:[%s3906_s20 + $0x2b8] sm:$0xff]  ;;  %v253_v56 = vld [vmem:[%s3906_s20 + $0x2a0] sm:$0xff]  ;;  %512 = vst.msk [vmem:[%s3914_s23 + $0x2b0] sm:$0xff] %vm425_vm0, %v255_v54  ;;  %v254_v62 = vld [vmem:[%s3906_s20 + $0x2a8] sm:$0xff]  ;;  %v3409_v0 = vpack.i.bf16 %v2723_v53, %v2722_v52 }
  0x4f   : > { %v3110_v61 = vld [vmem:[%s3882_s15 + $0x158] sm:$0xff]   ;;  %513 = vst.msk [vmem:[%s3914_s23 + $0x2b8] sm:$0xff] %vm425_vm0, %v256_v55  ;;  %510 = vst.msk [vmem:[%s3914_s23 + $0x2a0] sm:$0xff] %vm425_vm0, %v253_v56  ;;  %v3109_v63 = vld [vmem:[%s3882_s15 + $0x150] sm:$0xff]   ;;  %v3404_v5 = vpack.i.bf16 %v2719_v60, %v2718_v59 }
  0x50   : > { %511 = vst.msk [vmem:[%s3914_s23 + $0x2a8] sm:$0xff] %vm425_vm0, %v254_v62  ;;  %v2730_v1 = vunpack.c.l.bf16 %v3110_v61  ;;  %v259_v2 = vld [vmem:[%s3906_s20 + $0x2d0] sm:$0xff]  ;;  %v260_v3 = vld [vmem:[%s3906_s20 + $0x2d8] sm:$0xff]  ;;  %v257_v4 = vld [vmem:[%s3906_s20 + $0x2c0] sm:$0xff]  ;;  %v2731_v6 = vunpack.c.h.bf16 %v3110_v61  ;;  %v2726_v7 = vunpack.c.l.bf16 %v3109_v63  ;;  %v2727_v8 = vunpack.c.h.bf16 %v3109_v63 }
  0x51   : > { %3360 = vrot.lane.b32.xlu1 %v3359_v9, %s3852_s16  ;;  %3355 = vrot.lane.b32.xlu0 %v3354_v10, %s3852_s16  ;;  %v3112_v9 = vld [vmem:[%s3882_s15 + $0x168] sm:$0xff]   ;;  %516 = vst.msk [vmem:[%s3914_s23 + $0x2d0] sm:$0xff] %vm425_vm0, %v259_v2 }
  0x52   : > { %517 = vst.msk [vmem:[%s3914_s23 + $0x2d8] sm:$0xff] %vm425_vm0, %v260_v3  ;;  %v258_v10 = vld [vmem:[%s3906_s20 + $0x2c8] sm:$0xff]  ;;  %514 = vst.msk [vmem:[%s3914_s23 + $0x2c0] sm:$0xff] %vm425_vm0, %v257_v4  ;;  %v3111_v11 = vld [vmem:[%s3882_s15 + $0x160] sm:$0xff]   ;;  %v2738_v12 = vunpack.c.l.bf16 %v3112_v9  ;;  %v2739_v13 = vunpack.c.h.bf16 %v3112_v9  ;;  %v3419_v17 = vpack.i.bf16 %v2731_v6, %v2730_v1  ;;  %v3414_v18 = vpack.i.bf16 %v2727_v8, %v2726_v7 }
  0x53   : > { %515 = vst.msk [vmem:[%s3914_s23 + $0x2c8] sm:$0xff] %vm425_vm0, %v258_v10  ;;  %v263_v14 = vld [vmem:[%s3906_s20 + $0x2f0] sm:$0xff]  ;;  %v264_v15 = vld [vmem:[%s3906_s20 + $0x2f8] sm:$0xff]  ;;  %v2734_v19 = vunpack.c.l.bf16 %v3111_v11  ;;  %v2735_v20 = vunpack.c.h.bf16 %v3111_v11  ;;  %v262_v22 = vld [vmem:[%s3906_s20 + $0x2e8] sm:$0xff] }
  0x54   : > { %520 = vst.msk [vmem:[%s3914_s23 + $0x2f0] sm:$0xff] %vm425_vm0, %v263_v14  ;;  %521 = vst.msk [vmem:[%s3914_s23 + $0x2f8] sm:$0xff] %vm425_vm0, %v264_v15  ;;  %v3113_v23 = vld [vmem:[%s3882_s15 + $0x170] sm:$0xff]   ;;  %v3429_v24 = vpack.i.bf16 %v2739_v13, %v2738_v12  ;;  %v268_v27 = vld [vmem:[%s3906_s20 + $0x318] sm:$0xff] }
  0x55   : > { %3370 = vrot.lane.b32.xlu1 %v3369_v16, %s3852_s16  ;;  %3365 = vrot.lane.b32.xlu0 %v3364_v21, %s3852_s16  ;;  %v261_v16 = vld [vmem:[%s3906_s20 + $0x2e0] sm:$0xff]  ;;  %v3114_v21 = vld [vmem:[%s3882_s15 + $0x178] sm:$0xff]   ;;  %v3424_v29 = vpack.i.bf16 %v2735_v20, %v2734_v19  ;;  %v2742_v31 = vunpack.c.l.bf16 %v3113_v23  ;;  %v2743_v32 = vunpack.c.h.bf16 %v3113_v23 }
  0x56   : > { %518 = vst.msk [vmem:[%s3914_s23 + $0x2e0] sm:$0xff] %vm425_vm0, %v261_v16  ;;  %519 = vst.msk [vmem:[%s3914_s23 + $0x2e8] sm:$0xff] %vm425_vm0, %v262_v22  ;;  %v2746_v25 = vunpack.c.l.bf16 %v3114_v21  ;;  %v267_v26 = vld [vmem:[%s3906_s20 + $0x310] sm:$0xff]  ;;  %v265_v28 = vld [vmem:[%s3906_s20 + $0x300] sm:$0xff]  ;;  %v2747_v30 = vunpack.c.h.bf16 %v3114_v21 }
  0x57   : > { %524 = vst.msk [vmem:[%s3914_s23 + $0x310] sm:$0xff] %vm425_vm0, %v267_v26  ;;  %525 = vst.msk [vmem:[%s3914_s23 + $0x318] sm:$0xff] %vm425_vm0, %v268_v27  ;;  %v3115_v35 = vld [vmem:[%s3882_s15 + $0x180] sm:$0xff]   ;;  %v271_v38 = vld [vmem:[%s3906_s20 + $0x330] sm:$0xff]  ;;  %v3434_v42 = vpack.i.bf16 %v2743_v32, %v2742_v31 }
  0x58   : > { %522 = vst.msk [vmem:[%s3914_s23 + $0x300] sm:$0xff] %vm425_vm0, %v265_v28  ;;  %v272_v39 = vld [vmem:[%s3906_s20 + $0x338] sm:$0xff]  ;;  %v3439_v41 = vpack.i.bf16 %v2747_v30, %v2746_v25  ;;  %v2750_v43 = vunpack.c.l.bf16 %v3115_v35  ;;  %v2751_v44 = vunpack.c.h.bf16 %v3115_v35  ;;  %528 = vst.msk [vmem:[%s3914_s23 + $0x330] sm:$0xff] %vm425_vm0, %v271_v38  ;;  %v270_v46 = vld [vmem:[%s3906_s20 + $0x328] sm:$0xff] }
  0x59   : > { %3380 = vrot.lane.b32.xlu1 %v3379_v33, %s3852_s16  ;;  %3375 = vrot.lane.b32.xlu0 %v3374_v34, %s3852_s16  ;;  %v3116_v33 = vld [vmem:[%s3882_s15 + $0x188] sm:$0xff]   ;;  %529 = vst.msk [vmem:[%s3914_s23 + $0x338] sm:$0xff] %vm425_vm0, %v272_v39 }
  0x5a   : > { %v266_v34 = vld [vmem:[%s3906_s20 + $0x308] sm:$0xff]  ;;  %v2754_v36 = vunpack.c.l.bf16 %v3116_v33  ;;  %v2755_v37 = vunpack.c.h.bf16 %v3116_v33  ;;  %v3117_v47 = vld [vmem:[%s3882_s15 + $0x190] sm:$0xff]   ;;  %527 = vst.msk [vmem:[%s3914_s23 + $0x328] sm:$0xff] %vm425_vm0, %v270_v46  ;;  %v276_v51 = vld [vmem:[%s3906_s20 + $0x358] sm:$0xff]  ;;  %v3444_v53 = vpack.i.bf16 %v2751_v44, %v2750_v43 }
  0x5b   : > { %523 = vst.msk [vmem:[%s3914_s23 + $0x308] sm:$0xff] %vm425_vm0, %v266_v34  ;;  %v275_v50 = vld [vmem:[%s3906_s20 + $0x350] sm:$0xff]  ;;  %v273_v52 = vld [vmem:[%s3906_s20 + $0x340] sm:$0xff]  ;;  %v2758_v55 = vunpack.c.l.bf16 %v3117_v47  ;;  %v2759_v56 = vunpack.c.h.bf16 %v3117_v47  ;;  %533 = vst.msk [vmem:[%s3914_s23 + $0x358] sm:$0xff] %vm425_vm0, %v276_v51 }
  0x5c   : > { %v3449_v48 = vpack.i.bf16 %v2755_v37, %v2754_v36  ;;  %532 = vst.msk [vmem:[%s3914_s23 + $0x350] sm:$0xff] %vm425_vm0, %v275_v50  ;;  %530 = vst.msk [vmem:[%s3914_s23 + $0x340] sm:$0xff] %vm425_vm0, %v273_v52  ;;  %v3119_v59 = vld [vmem:[%s3882_s15 + $0x1a0] sm:$0xff]   ;;  %v279_v62 = vld [vmem:[%s3906_s20 + $0x370] sm:$0xff] }
  0x5d   : > { %3390 = vrot.lane.b32.xlu1 %v3389_v40, %s3852_s16  ;;  %3385 = vrot.lane.b32.xlu0 %v3384_v45, %s3852_s16  ;;  %v269_v40 = vld [vmem:[%s3906_s20 + $0x320] sm:$0xff]  ;;  %v3118_v45 = vld [vmem:[%s3882_s15 + $0x198] sm:$0xff]   ;;  %v3454_v2 = vpack.i.bf16 %v2759_v56, %v2758_v55  ;;  %v2766_v3 = vunpack.c.l.bf16 %v3119_v59  ;;  %v2767_v4 = vunpack.c.h.bf16 %v3119_v59 }
  0x5e   : > { %526 = vst.msk [vmem:[%s3914_s23 + $0x320] sm:$0xff] %vm425_vm0, %v269_v40  ;;  %v2762_v49 = vunpack.c.l.bf16 %v3118_v45  ;;  %v2763_v54 = vunpack.c.h.bf16 %v3118_v45  ;;  %v280_v63 = vld [vmem:[%s3906_s20 + $0x378] sm:$0xff]  ;;  %536 = vst.msk [vmem:[%s3914_s23 + $0x370] sm:$0xff] %vm425_vm0, %v279_v62  ;;  %v278_v6 = vld [vmem:[%s3906_s20 + $0x368] sm:$0xff] }
  0x5f   : > { %537 = vst.msk [vmem:[%s3914_s23 + $0x378] sm:$0xff] %vm425_vm0, %v280_v63  ;;  %v3121_v7 = vld [vmem:[%s3882_s15 + $0x1b0] sm:$0xff]   ;;  %535 = vst.msk [vmem:[%s3914_s23 + $0x368] sm:$0xff] %vm425_vm0, %v278_v6  ;;  %v284_v11 = vld [vmem:[%s3906_s20 + $0x398] sm:$0xff]  ;;  %v3464_v13 = vpack.i.bf16 %v2767_v4, %v2766_v3 }
  0x60   : > { %v3459_v1 = vpack.i.bf16 %v2763_v54, %v2762_v49  ;;  %v283_v10 = vld [vmem:[%s3906_s20 + $0x390] sm:$0xff]  ;;  %v281_v12 = vld [vmem:[%s3906_s20 + $0x380] sm:$0xff]  ;;  %v2774_v15 = vunpack.c.l.bf16 %v3121_v7  ;;  %v2775_v16 = vunpack.c.h.bf16 %v3121_v7  ;;  %541 = vst.msk [vmem:[%s3914_s23 + $0x398] sm:$0xff] %vm425_vm0, %v284_v11  ;;  %v288_v23 = vld [vmem:[%s3906_s20 + $0x3b8] sm:$0xff] }
  0x61   : > { %3400 = vrot.lane.b32.xlu1 %v3399_v57, %s3852_s16  ;;  %3395 = vrot.lane.b32.xlu0 %v3394_v58, %s3852_s16  ;;  %v3120_v57 = vld [vmem:[%s3882_s15 + $0x1a8] sm:$0xff]   ;;  %540 = vst.msk [vmem:[%s3914_s23 + $0x390] sm:$0xff] %vm425_vm0, %v283_v10 }
  0x62   : > { %v274_v58 = vld [vmem:[%s3906_s20 + $0x348] sm:$0xff]  ;;  %v2770_v60 = vunpack.c.l.bf16 %v3120_v57  ;;  %v2771_v61 = vunpack.c.h.bf16 %v3120_v57  ;;  %538 = vst.msk [vmem:[%s3914_s23 + $0x380] sm:$0xff] %vm425_vm0, %v281_v12  ;;  %v3123_v19 = vld [vmem:[%s3882_s15 + $0x1c0] sm:$0xff]   ;;  %v287_v22 = vld [vmem:[%s3906_s20 + $0x3b0] sm:$0xff]  ;;  %v3474_v26 = vpack.i.bf16 %v2775_v16, %v2774_v15 }
  0x63   : > { %531 = vst.msk [vmem:[%s3914_s23 + $0x348] sm:$0xff] %vm425_vm0, %v274_v58  ;;  %v2782_v27 = vunpack.c.l.bf16 %v3123_v19  ;;  %v2783_v28 = vunpack.c.h.bf16 %v3123_v19  ;;  %544 = vst.msk [vmem:[%s3914_s23 + $0x3b0] sm:$0xff] %vm425_vm0, %v287_v22  ;;  %v286_v30 = vld [vmem:[%s3906_s20 + $0x3a8] sm:$0xff]  ;;  %v3125_v31 = vld [vmem:[%s3882_s15 + $0x1d0] sm:$0xff]  }
  0x64   : > { %v3469_v8 = vpack.i.bf16 %v2771_v61, %v2770_v60  ;;  %545 = vst.msk [vmem:[%s3914_s23 + $0x3b8] sm:$0xff] %vm425_vm0, %v288_v23  ;;  %543 = vst.msk [vmem:[%s3914_s23 + $0x3a8] sm:$0xff] %vm425_vm0, %v286_v30  ;;  %v3128_v32 = vld [vmem:[%s3882_s15 + $0x1e8] sm:$0xff]   ;;  %v291_v35 = vld [vmem:[%s3906_s20 + $0x3d0] sm:$0xff]  ;;  %v2790_v40 = vunpack.c.l.bf16 %v3125_v31 }
  0x65   : > { %3410 = vrot.lane.b32.xlu1 %v3409_v0, %s3852_s16  ;;  %3405 = vrot.lane.b32.xlu0 %v3404_v5, %s3852_s16  ;;  %v277_v0 = vld [vmem:[%s3906_s20 + $0x360] sm:$0xff]  ;;  %v3122_v5 = vld [vmem:[%s3882_s15 + $0x1b8] sm:$0xff]   ;;  %v3484_v38 = vpack.i.bf16 %v2783_v28, %v2782_v27  ;;  %v2802_v44 = vunpack.c.l.bf16 %v3128_v32  ;;  %v2803_v45 = vunpack.c.h.bf16 %v3128_v32 }
  0x66   : > { %534 = vst.msk [vmem:[%s3914_s23 + $0x360] sm:$0xff] %vm425_vm0, %v277_v0  ;;  %v2778_v9 = vunpack.c.l.bf16 %v3122_v5  ;;  %v2779_v14 = vunpack.c.h.bf16 %v3122_v5  ;;  %v292_v36 = vld [vmem:[%s3906_s20 + $0x3d8] sm:$0xff]  ;;  %v289_v37 = vld [vmem:[%s3906_s20 + $0x3c0] sm:$0xff]  ;;  %548 = vst.msk [vmem:[%s3914_s23 + $0x3d0] sm:$0xff] %vm425_vm0, %v291_v35 }
  0x67   : > { %549 = vst.msk [vmem:[%s3914_s23 + $0x3d8] sm:$0xff] %vm425_vm0, %v292_v36  ;;  %546 = vst.msk [vmem:[%s3914_s23 + $0x3c0] sm:$0xff] %vm425_vm0, %v289_v37  ;;  %v3127_v43 = vld [vmem:[%s3882_s15 + $0x1e0] sm:$0xff]   ;;  %v3130_v46 = vld [vmem:[%s3882_s15 + $0x1f8] sm:$0xff]   ;;  %v3509_v58 = vpack.i.bf16 %v2803_v45, %v2802_v44 }
  0x68   : > { %v3479_v25 = vpack.i.bf16 %v2779_v14, %v2778_v9  ;;  %v295_v47 = vld [vmem:[%s3906_s20 + $0x3f0] sm:$0xff]  ;;  %v293_v49 = vld [vmem:[%s3906_s20 + $0x3e0] sm:$0xff]  ;;  %v2798_v52 = vunpack.c.l.bf16 %v3127_v43  ;;  %v294_v54 = vld [vmem:[%s3906_s20 + $0x3e8] sm:$0xff]  ;;  %v2810_v59 = vunpack.c.l.bf16 %v3130_v46  ;;  %v2811_v5 = vunpack.c.h.bf16 %v3130_v46 }
  0x69   : > { %3420 = vrot.lane.b32.xlu1 %v3419_v17, %s3852_s16  ;;  %3415 = vrot.lane.b32.xlu0 %v3414_v18, %s3852_s16  ;;  %v3124_v17 = vld [vmem:[%s3882_s15 + $0x1c8] sm:$0xff]   ;;  %552 = vst.msk [vmem:[%s3914_s23 + $0x3f0] sm:$0xff] %vm425_vm0, %v295_v47 }
  0x6a   : > { %v282_v18 = vld [vmem:[%s3906_s20 + $0x388] sm:$0xff]  ;;  %v2786_v20 = vunpack.c.l.bf16 %v3124_v17  ;;  %v2787_v21 = vunpack.c.h.bf16 %v3124_v17  ;;  %550 = vst.msk [vmem:[%s3914_s23 + $0x3e0] sm:$0xff] %vm425_vm0, %v293_v49  ;;  %v3129_v55 = vld [vmem:[%s3882_s15 + $0x1f0] sm:$0xff]   ;;  %551 = vst.msk [vmem:[%s3914_s23 + $0x3e8] sm:$0xff] %vm425_vm0, %v294_v54  ;;  %v3519_v22 = vpack.i.bf16 %v2811_v5, %v2810_v59 }
  0x6b   : > { %539 = vst.msk [vmem:[%s3914_s23 + $0x388] sm:$0xff] %vm425_vm0, %v282_v18  ;;  %v3132_v60 = vld [vmem:[%s3882_s15 + $0x208] sm:$0xff]   ;;  %v297_v3 = vld [vmem:[%s3906_s20 + $0x400] sm:$0xff]  ;;  %v2806_v6 = vunpack.c.l.bf16 %v3129_v55  ;;  %v2807_v7 = vunpack.c.h.bf16 %v3129_v55  ;;  %v4426_v14 = vld [vmem:[%s3882_s15 + $0x218] sm:$0xff]  }
  0x6c   : > { %v3489_v33 = vpack.i.bf16 %v2787_v21, %v2786_v20  ;;  %554 = vst.msk [vmem:[%s3914_s23 + $0x400] sm:$0xff] %vm425_vm0, %v297_v3  ;;  %v3131_v9 = vld [vmem:[%s3882_s15 + $0x200] sm:$0xff]   ;;  %v2818_v12 = vunpack.c.l.bf16 %v3132_v60  ;;  %v303_v19 = vld [vmem:[%s3906_s20 + $0x430] sm:$0xff]  ;;  %v304_v20 = vld [vmem:[%s3906_s20 + $0x438] sm:$0xff] }
  0x6d   : > { %3430 = vrot.lane.b32.xlu1 %v3429_v24, %s3852_s16  ;;  %3425 = vrot.lane.b32.xlu0 %v3424_v29, %s3852_s16  ;;  %v285_v24 = vld [vmem:[%s3906_s20 + $0x3a0] sm:$0xff]  ;;  %v3126_v29 = vld [vmem:[%s3882_s15 + $0x1d8] sm:$0xff]   ;;  %v3514_v23 = vpack.i.bf16 %v2807_v7, %v2806_v6 }
  0x6e   : > { %542 = vst.msk [vmem:[%s3914_s23 + $0x3a0] sm:$0xff] %vm425_vm0, %v285_v24  ;;  %v2794_v34 = vunpack.c.l.bf16 %v3126_v29  ;;  %v2795_v39 = vunpack.c.h.bf16 %v3126_v29  ;;  %v301_v21 = vld [vmem:[%s3906_s20 + $0x420] sm:$0xff]  ;;  %v2814_v24 = vunpack.c.l.bf16 %v3131_v9  ;;  %560 = vst.msk [vmem:[%s3914_s23 + $0x430] sm:$0xff] %vm425_vm0, %v303_v19  ;;  %v3133_v27 = vld [vmem:[%s3882_s15 + $0x210] sm:$0xff]  }
  0x6f   : > { %561 = vst.msk [vmem:[%s3914_s23 + $0x438] sm:$0xff] %vm425_vm0, %v304_v20  ;;  %558 = vst.msk [vmem:[%s3914_s23 + $0x420] sm:$0xff] %vm425_vm0, %v301_v21  ;;  %v3136_v32 = vld [vmem:[%s3882_s15 + $0x228] sm:$0xff]   ;;  %v307_v37 = vld [vmem:[%s3906_s20 + $0x450] sm:$0xff] }
  0x70   : > { %v3499_v50 = vpack.i.bf16 %v2795_v39, %v2794_v34  ;;  %v305_v39 = vld [vmem:[%s3906_s20 + $0x440] sm:$0xff]  ;;  %564 = vst.msk [vmem:[%s3914_s23 + $0x450] sm:$0xff] %vm425_vm0, %v307_v37  ;;  %v306_v44 = vld [vmem:[%s3906_s20 + $0x448] sm:$0xff]  ;;  %v2835_v49 = vunpack.c.h.bf16 %v3136_v32  ;;  %v311_v55 = vld [vmem:[%s3906_s20 + $0x470] sm:$0xff] }
  0x71   : > { %3440 = vrot.lane.b32.xlu1 %v3439_v41, %s3852_s16  ;;  %3435 = vrot.lane.b32.xlu0 %v3434_v42, %s3852_s16  ;;  %v2791_v41 = vunpack.c.h.bf16 %v3125_v31  ;;  %v290_v42 = vld [vmem:[%s3906_s20 + $0x3c8] sm:$0xff]  ;;  %v2826_v31 = vunpack.c.l.bf16 %v4426_v14  ;;  %562 = vst.msk [vmem:[%s3914_s23 + $0x440] sm:$0xff] %vm425_vm0, %v305_v39 }
  0x72   : > { %547 = vst.msk [vmem:[%s3914_s23 + $0x3c8] sm:$0xff] %vm425_vm0, %v290_v42  ;;  %v2822_v42 = vunpack.c.l.bf16 %v3133_v27  ;;  %v3135_v45 = vld [vmem:[%s3882_s15 + $0x220] sm:$0xff]   ;;  %563 = vst.msk [vmem:[%s3914_s23 + $0x448] sm:$0xff] %vm425_vm0, %v306_v44 }
  0x73   : > { %v3494_v51 = vpack.i.bf16 %v2791_v41, %v2790_v40  ;;  %v2827_v41 = vunpack.c.h.bf16 %v4426_v14  ;;  %568 = vst.msk [vmem:[%s3914_s23 + $0x470] sm:$0xff] %vm425_vm0, %v311_v55 }
  0x75   : > { %3450 = vrot.lane.b32.xlu1 %v3449_v48, %s3852_s16  ;;  %3445 = vrot.lane.b32.xlu0 %v3444_v53, %s3852_s16  ;;  %v296_v48 = vld [vmem:[%s3906_s20 + $0x3f8] sm:$0xff]  ;;  %v2799_v53 = vunpack.c.h.bf16 %v3127_v43  ;;  %v2823_v43 = vunpack.c.h.bf16 %v3133_v27  ;;  %v319_v27 = vld [vmem:[%s3906_s20 + $0x4b0] sm:$0xff] }
  0x76   : > { %553 = vst.msk [vmem:[%s3914_s23 + $0x3f8] sm:$0xff] %vm425_vm0, %v296_v48  ;;  %v2834_v48 = vunpack.c.l.bf16 %v3136_v32  ;;  %576 = vst.msk [vmem:[%s3914_s23 + $0x4b0] sm:$0xff] %vm425_vm0, %v319_v27 }
  0x77   : > { %v3504_v4 = vpack.i.bf16 %v2799_v53, %v2798_v52  ;;  %v3534_v59 = vpack.i.bf16 %v2823_v43, %v2822_v42 }
  0x79   : > { %3460 = vrot.lane.b32.xlu1 %v3459_v1, %s3852_s16  ;;  %3455 = vrot.lane.b32.xlu0 %v3454_v2, %s3852_s16  ;;  %v299_v1 = vld [vmem:[%s3906_s20 + $0x410] sm:$0xff]  ;;  %v300_v2 = vld [vmem:[%s3906_s20 + $0x418] sm:$0xff] }
  0x7a   : > { %556 = vst.msk [vmem:[%s3914_s23 + $0x410] sm:$0xff] %vm425_vm0, %v299_v1  ;;  %557 = vst.msk [vmem:[%s3914_s23 + $0x418] sm:$0xff] %vm425_vm0, %v300_v2  ;;  %v3549_v2 = vpack.i.bf16 %v2835_v49, %v2834_v48 }
  0x7d   : > { %3470 = vrot.lane.b32.xlu1 %v3469_v8, %s3852_s16  ;;  %3465 = vrot.lane.b32.xlu0 %v3464_v13, %s3852_s16  ;;  %v298_v8 = vld [vmem:[%s3906_s20 + $0x408] sm:$0xff]  ;;  %v2819_v13 = vunpack.c.h.bf16 %v3132_v60  ;;  %v2830_v60 = vunpack.c.l.bf16 %v3135_v45 }
  0x7e   : > { %555 = vst.msk [vmem:[%s3914_s23 + $0x408] sm:$0xff] %vm425_vm0, %v298_v8 }
  0x7f   : > { %v3529_v30 = vpack.i.bf16 %v2819_v13, %v2818_v12 }
  0x81   : > { %3480 = vrot.lane.b32.xlu1 %v3479_v25, %s3852_s16  ;;  %3475 = vrot.lane.b32.xlu0 %v3474_v26, %s3852_s16  ;;  %v2815_v25 = vunpack.c.h.bf16 %v3131_v9  ;;  %v302_v26 = vld [vmem:[%s3906_s20 + $0x428] sm:$0xff]  ;;  %v315_v9 = vld [vmem:[%s3906_s20 + $0x490] sm:$0xff] }
  0x82   : > { %559 = vst.msk [vmem:[%s3914_s23 + $0x428] sm:$0xff] %vm425_vm0, %v302_v26  ;;  %572 = vst.msk [vmem:[%s3914_s23 + $0x490] sm:$0xff] %vm425_vm0, %v315_v9 }
  0x83   : > { %v3524_v40 = vpack.i.bf16 %v2815_v25, %v2814_v24 }
  0x85   : > { %3490 = vrot.lane.b32.xlu1 %v3489_v33, %s3852_s16  ;;  %3485 = vrot.lane.b32.xlu0 %v3484_v38, %s3852_s16  ;;  %v308_v38 = vld [vmem:[%s3906_s20 + $0x458] sm:$0xff] }
  0x86   : > { %565 = vst.msk [vmem:[%s3914_s23 + $0x458] sm:$0xff] %vm425_vm0, %v308_v38 }
  0x87   : > { %v3216_v56 = vpop.permute.xlu1 %3215  ;;  %v3206_v57 = vpop.permute.xlu0 %3205 }
  0x88   : > { %v3218_v61 = vunpack.i.h.bf16 %v3216_v56  ;;  %v3217_v62 = vunpack.i.l.bf16 %v3216_v56  ;;  %v3208_v63 = vunpack.i.h.bf16 %v3206_v57  ;;  %v3207_v0 = vunpack.i.l.bf16 %v3206_v57  ;;  %v312_v56 = vld [vmem:[%s3906_s20 + $0x478] sm:$0xff]  ;;  %v309_v57 = vld [vmem:[%s3906_s20 + $0x460] sm:$0xff] }
  0x89   : > { %3500 = vrot.lane.b32.xlu1 %v3499_v50, %s3852_s16  ;;  %3495 = vrot.lane.b32.xlu0 %v3494_v51, %s3852_s16  ;;  %v4478_v50 = vld [vmem:[%s3882_s15 + $0x238] sm:$0xff]   ;;  %569 = vst.msk [vmem:[%s3914_s23 + $0x478] sm:$0xff] %vm425_vm0, %v312_v56 }
  0x8a   : > { %2223 = vst.msk [vmem:[%s3914_s23 + $0x20] sm:$0xff] %vm2218_vm1, %v3217_v62  ;;  %2224 = vst.msk [vmem:[%s3914_s23 + $0x28] sm:$0xff] %vm2218_vm1, %v3218_v61  ;;  %v2831_v61 = vunpack.c.h.bf16 %v3135_v45  ;;  %v310_v62 = vld [vmem:[%s3906_s20 + $0x468] sm:$0xff]  ;;  %v2842_v3 = vunpack.c.l.bf16 %v4478_v50  ;;  %v2843_v13 = vunpack.c.h.bf16 %v4478_v50  ;;  %v323_v45 = vld [vmem:[%s3906_s20 + $0x4d0] sm:$0xff] }
  0x8b   : > { %2219 = vst.msk [vmem:[%s3914_s23] sm:$0xff] %vm2218_vm1, %v3207_v0  ;;  %2220 = vst.msk [vmem:[%s3914_s23 + $0x8] sm:$0xff] %vm2218_vm1, %v3208_v63  ;;  %v3221_v10 = vpop.permute.xlu1 %3220  ;;  %v3211_v11 = vpop.permute.xlu0 %3210  ;;  %v3137_v63 = vld [vmem:[%s3882_s15 + $0x230] sm:$0xff]  }
  0x8c   : > { %v3223_v15 = vunpack.i.h.bf16 %v3221_v10  ;;  %v3222_v16 = vunpack.i.l.bf16 %v3221_v10  ;;  %v3213_v17 = vunpack.i.h.bf16 %v3211_v11  ;;  %v3212_v18 = vunpack.i.l.bf16 %v3211_v11  ;;  %566 = vst.msk [vmem:[%s3914_s23 + $0x460] sm:$0xff] %vm425_vm0, %v309_v57  ;;  %567 = vst.msk [vmem:[%s3914_s23 + $0x468] sm:$0xff] %vm425_vm0, %v310_v62  ;;  %v316_v10 = vld [vmem:[%s3906_s20 + $0x498] sm:$0xff]  ;;  %v313_v11 = vld [vmem:[%s3906_s20 + $0x480] sm:$0xff] }
  0x8d   : > { %3510 = vrot.lane.b32.xlu1 %v3509_v58, %s3852_s16  ;;  %3505 = vrot.lane.b32.xlu0 %v3504_v4, %s3852_s16  ;;  %v3539_v58 = vpack.i.bf16 %v2827_v41, %v2826_v31  ;;  %v3140_v4 = vld [vmem:[%s3882_s15 + $0x248] sm:$0xff]   ;;  %v3544_v12 = vpack.i.bf16 %v2831_v61, %v2830_v60  ;;  %v2838_v14 = vunpack.c.l.bf16 %v3137_v63  ;;  %573 = vst.msk [vmem:[%s3914_s23 + $0x498] sm:$0xff] %vm425_vm0, %v316_v10 }
  0x8e   : > { %2225 = vst.msk [vmem:[%s3914_s23 + $0x30] sm:$0xff] %vm2218_vm1, %v3222_v16  ;;  %2226 = vst.msk [vmem:[%s3914_s23 + $0x38] sm:$0xff] %vm2218_vm1, %v3223_v15  ;;  %v2839_v15 = vunpack.c.h.bf16 %v3137_v63  ;;  %v314_v16 = vld [vmem:[%s3906_s20 + $0x488] sm:$0xff]  ;;  %v2850_v20 = vunpack.c.l.bf16 %v3140_v4  ;;  %v2851_v21 = vunpack.c.h.bf16 %v3140_v4  ;;  %v327_v63 = vld [vmem:[%s3906_s20 + $0x4f0] sm:$0xff] }
  0x8f   : > { %2221 = vst.msk [vmem:[%s3914_s23 + $0x10] sm:$0xff] %vm2218_vm1, %v3212_v18  ;;  %2222 = vst.msk [vmem:[%s3914_s23 + $0x18] sm:$0xff] %vm2218_vm1, %v3213_v17  ;;  %v3231_v28 = vpop.permute.xlu1 %3230  ;;  %v3226_v29 = vpop.permute.xlu0 %3225  ;;  %v3139_v17 = vld [vmem:[%s3882_s15 + $0x240] sm:$0xff]  }
  0x90   : > { %v3233_v33 = vunpack.i.h.bf16 %v3231_v28  ;;  %v3232_v34 = vunpack.i.l.bf16 %v3231_v28  ;;  %v3228_v35 = vunpack.i.h.bf16 %v3226_v29  ;;  %v3227_v36 = vunpack.i.l.bf16 %v3226_v29  ;;  %570 = vst.msk [vmem:[%s3914_s23 + $0x480] sm:$0xff] %vm425_vm0, %v313_v11  ;;  %571 = vst.msk [vmem:[%s3914_s23 + $0x488] sm:$0xff] %vm425_vm0, %v314_v16  ;;  %v320_v28 = vld [vmem:[%s3906_s20 + $0x4b8] sm:$0xff]  ;;  %v317_v29 = vld [vmem:[%s3906_s20 + $0x4a0] sm:$0xff] }
  0x91   : > { %3520 = vrot.lane.b32.xlu1 %v3519_v22, %s3852_s16  ;;  %3515 = vrot.lane.b32.xlu0 %v3514_v23, %s3852_s16  ;;  %v4530_v22 = vld [vmem:[%s3882_s15 + $0x258] sm:$0xff]   ;;  %v3554_v31 = vpack.i.bf16 %v2839_v15, %v2838_v14  ;;  %v2846_v32 = vunpack.c.l.bf16 %v3139_v17  ;;  %577 = vst.msk [vmem:[%s3914_s23 + $0x4b8] sm:$0xff] %vm425_vm0, %v320_v28  ;;  %v3569_v38 = vpack.i.bf16 %v2851_v21, %v2850_v20 }
  0x92   : > { %2229 = vst.msk [vmem:[%s3914_s23 + $0x50] sm:$0xff] %vm2218_vm1, %v3232_v34  ;;  %2230 = vst.msk [vmem:[%s3914_s23 + $0x58] sm:$0xff] %vm2218_vm1, %v3233_v33  ;;  %v2847_v33 = vunpack.c.h.bf16 %v3139_v17  ;;  %v318_v34 = vld [vmem:[%s3906_s20 + $0x4a8] sm:$0xff]  ;;  %v2858_v39 = vunpack.c.l.bf16 %v4530_v22  ;;  %v2859_v49 = vunpack.c.h.bf16 %v4530_v22  ;;  %v331_v17 = vld [vmem:[%s3906_s20 + $0x510] sm:$0xff] }
  0x93   : > { %2227 = vst.msk [vmem:[%s3914_s23 + $0x40] sm:$0xff] %vm2218_vm1, %v3227_v36  ;;  %2228 = vst.msk [vmem:[%s3914_s23 + $0x48] sm:$0xff] %vm2218_vm1, %v3228_v35  ;;  %v3241_v46 = vpop.permute.xlu1 %3240  ;;  %v3236_v47 = vpop.permute.xlu0 %3235  ;;  %v3141_v35 = vld [vmem:[%s3882_s15 + $0x250] sm:$0xff]  }
  0x94   : > { %v3243_v51 = vunpack.i.h.bf16 %v3241_v46  ;;  %v3242_v52 = vunpack.i.l.bf16 %v3241_v46  ;;  %v3238_v53 = vunpack.i.h.bf16 %v3236_v47  ;;  %v3237_v54 = vunpack.i.l.bf16 %v3236_v47  ;;  %574 = vst.msk [vmem:[%s3914_s23 + $0x4a0] sm:$0xff] %vm425_vm0, %v317_v29  ;;  %575 = vst.msk [vmem:[%s3914_s23 + $0x4a8] sm:$0xff] %vm425_vm0, %v318_v34  ;;  %v324_v46 = vld [vmem:[%s3906_s20 + $0x4d8] sm:$0xff]  ;;  %v321_v47 = vld [vmem:[%s3906_s20 + $0x4c0] sm:$0xff] }
  0x95   : > { %3530 = vrot.lane.b32.xlu1 %v3529_v30, %s3852_s16  ;;  %3525 = vrot.lane.b32.xlu0 %v3524_v40, %s3852_s16  ;;  %v3559_v30 = vpack.i.bf16 %v2843_v13, %v2842_v3  ;;  %v3144_v40 = vld [vmem:[%s3882_s15 + $0x268] sm:$0xff]   ;;  %v3564_v48 = vpack.i.bf16 %v2847_v33, %v2846_v32  ;;  %v2854_v50 = vunpack.c.l.bf16 %v3141_v35  ;;  %580 = vst.msk [vmem:[%s3914_s23 + $0x4d0] sm:$0xff] %vm425_vm0, %v323_v45 }
  0x96   : > { %2233 = vst.msk [vmem:[%s3914_s23 + $0x70] sm:$0xff] %vm2218_vm1, %v3242_v52  ;;  %2234 = vst.msk [vmem:[%s3914_s23 + $0x78] sm:$0xff] %vm2218_vm1, %v3243_v51  ;;  %v2855_v51 = vunpack.c.h.bf16 %v3141_v35  ;;  %v322_v52 = vld [vmem:[%s3906_s20 + $0x4c8] sm:$0xff]  ;;  %v2866_v56 = vunpack.c.l.bf16 %v3144_v40  ;;  %v2867_v57 = vunpack.c.h.bf16 %v3144_v40  ;;  %v335_v35 = vld [vmem:[%s3906_s20 + $0x530] sm:$0xff] }
  0x97   : > { %2231 = vst.msk [vmem:[%s3914_s23 + $0x60] sm:$0xff] %vm2218_vm1, %v3237_v54  ;;  %2232 = vst.msk [vmem:[%s3914_s23 + $0x68] sm:$0xff] %vm2218_vm1, %v3238_v53  ;;  %v3251_v0 = vpop.permute.xlu1 %3250  ;;  %v3246_v1 = vpop.permute.xlu0 %3245  ;;  %v3143_v53 = vld [vmem:[%s3882_s15 + $0x260] sm:$0xff]  }
  0x98   : > { %v3253_v5 = vunpack.i.h.bf16 %v3251_v0  ;;  %v3252_v6 = vunpack.i.l.bf16 %v3251_v0  ;;  %v3248_v7 = vunpack.i.h.bf16 %v3246_v1  ;;  %v3247_v8 = vunpack.i.l.bf16 %v3246_v1  ;;  %581 = vst.msk [vmem:[%s3914_s23 + $0x4d8] sm:$0xff] %vm425_vm0, %v324_v46  ;;  %578 = vst.msk [vmem:[%s3914_s23 + $0x4c0] sm:$0xff] %vm425_vm0, %v321_v47  ;;  %v328_v0 = vld [vmem:[%s3906_s20 + $0x4f8] sm:$0xff]  ;;  %v325_v1 = vld [vmem:[%s3906_s20 + $0x4e0] sm:$0xff] }
  0x99   : > { %3540 = vrot.lane.b32.xlu1 %v3539_v58, %s3852_s16  ;;  %3535 = vrot.lane.b32.xlu0 %v3534_v59, %s3852_s16  ;;  %579 = vst.msk [vmem:[%s3914_s23 + $0x4c8] sm:$0xff] %vm425_vm0, %v322_v52  ;;  %v4582_v58 = vld [vmem:[%s3882_s15 + $0x278] sm:$0xff]   ;;  %v3574_v3 = vpack.i.bf16 %v2855_v51, %v2854_v50  ;;  %v2862_v4 = vunpack.c.l.bf16 %v3143_v53  ;;  %v3589_v10 = vpack.i.bf16 %v2867_v57, %v2866_v56 }
  0x9a   : > { %2237 = vst.msk [vmem:[%s3914_s23 + $0x90] sm:$0xff] %vm2218_vm1, %v3252_v6  ;;  %2238 = vst.msk [vmem:[%s3914_s23 + $0x98] sm:$0xff] %vm2218_vm1, %v3253_v5  ;;  %v2863_v5 = vunpack.c.h.bf16 %v3143_v53  ;;  %v326_v6 = vld [vmem:[%s3906_s20 + $0x4e8] sm:$0xff]  ;;  %v2874_v11 = vunpack.c.l.bf16 %v4582_v58  ;;  %v2875_v21 = vunpack.c.h.bf16 %v4582_v58  ;;  %v339_v53 = vld [vmem:[%s3906_s20 + $0x550] sm:$0xff] }
  0x9b   : > { %2235 = vst.msk [vmem:[%s3914_s23 + $0x80] sm:$0xff] %vm2218_vm1, %v3247_v8  ;;  %2236 = vst.msk [vmem:[%s3914_s23 + $0x88] sm:$0xff] %vm2218_vm1, %v3248_v7  ;;  %v3261_v18 = vpop.permute.xlu1 %3260  ;;  %v3256_v19 = vpop.permute.xlu0 %3255  ;;  %v3145_v7 = vld [vmem:[%s3882_s15 + $0x270] sm:$0xff]  }
  0x9c   : > { %v3263_v23 = vunpack.i.h.bf16 %v3261_v18  ;;  %v3262_v24 = vunpack.i.l.bf16 %v3261_v18  ;;  %v3258_v25 = vunpack.i.h.bf16 %v3256_v19  ;;  %v3257_v26 = vunpack.i.l.bf16 %v3256_v19  ;;  %584 = vst.msk [vmem:[%s3914_s23 + $0x4f0] sm:$0xff] %vm425_vm0, %v327_v63  ;;  %585 = vst.msk [vmem:[%s3914_s23 + $0x4f8] sm:$0xff] %vm425_vm0, %v328_v0  ;;  %v332_v18 = vld [vmem:[%s3906_s20 + $0x518] sm:$0xff]  ;;  %v329_v19 = vld [vmem:[%s3906_s20 + $0x500] sm:$0xff] }
  0x9d   : > { %3550 = vrot.lane.b32.xlu1 %v3549_v2, %s3852_s16  ;;  %3545 = vrot.lane.b32.xlu0 %v3544_v12, %s3852_s16  ;;  %v3579_v2 = vpack.i.bf16 %v2859_v49, %v2858_v39  ;;  %582 = vst.msk [vmem:[%s3914_s23 + $0x4e0] sm:$0xff] %vm425_vm0, %v325_v1  ;;  %583 = vst.msk [vmem:[%s3914_s23 + $0x4e8] sm:$0xff] %vm425_vm0, %v326_v6  ;;  %v3584_v20 = vpack.i.bf16 %v2863_v5, %v2862_v4  ;;  %v2870_v22 = vunpack.c.l.bf16 %v3145_v7 }
  0x9e   : > { %2241 = vst.msk [vmem:[%s3914_s23 + $0xb0] sm:$0xff] %vm2218_vm1, %v3262_v24  ;;  %2242 = vst.msk [vmem:[%s3914_s23 + $0xb8] sm:$0xff] %vm2218_vm1, %v3263_v23  ;;  %v3148_v12 = vld [vmem:[%s3882_s15 + $0x288] sm:$0xff]   ;;  %v2871_v23 = vunpack.c.h.bf16 %v3145_v7  ;;  %v343_v7 = vld [vmem:[%s3906_s20 + $0x570] sm:$0xff] }
  0x9f   : > { %2239 = vst.msk [vmem:[%s3914_s23 + $0xa0] sm:$0xff] %vm2218_vm1, %v3257_v26  ;;  %2240 = vst.msk [vmem:[%s3914_s23 + $0xa8] sm:$0xff] %vm2218_vm1, %v3258_v25  ;;  %v3271_v36 = vpop.permute.xlu1 %3270  ;;  %v3266_v37 = vpop.permute.xlu0 %3265  ;;  %v330_v24 = vld [vmem:[%s3906_s20 + $0x508] sm:$0xff]  ;;  %v3147_v25 = vld [vmem:[%s3882_s15 + $0x280] sm:$0xff]   ;;  %v2882_v28 = vunpack.c.l.bf16 %v3148_v12  ;;  %v2883_v29 = vunpack.c.h.bf16 %v3148_v12 }
  0xa0   : > { %v3273_v41 = vunpack.i.h.bf16 %v3271_v36  ;;  %v3272_v42 = vunpack.i.l.bf16 %v3271_v36  ;;  %v3268_v43 = vunpack.i.h.bf16 %v3266_v37  ;;  %v3267_v44 = vunpack.i.l.bf16 %v3266_v37  ;;  %588 = vst.msk [vmem:[%s3914_s23 + $0x510] sm:$0xff] %vm425_vm0, %v331_v17  ;;  %589 = vst.msk [vmem:[%s3914_s23 + $0x518] sm:$0xff] %vm425_vm0, %v332_v18  ;;  %v336_v36 = vld [vmem:[%s3906_s20 + $0x538] sm:$0xff]  ;;  %v333_v37 = vld [vmem:[%s3906_s20 + $0x520] sm:$0xff] }
  0xa1   : > { %3560 = vrot.lane.b32.xlu1 %v3559_v30, %s3852_s16  ;;  %3555 = vrot.lane.b32.xlu0 %v3554_v31, %s3852_s16  ;;  %586 = vst.msk [vmem:[%s3914_s23 + $0x500] sm:$0xff] %vm425_vm0, %v329_v19  ;;  %587 = vst.msk [vmem:[%s3914_s23 + $0x508] sm:$0xff] %vm425_vm0, %v330_v24  ;;  %v3594_v39 = vpack.i.bf16 %v2871_v23, %v2870_v22  ;;  %v2878_v40 = vunpack.c.l.bf16 %v3147_v25  ;;  %v3609_v46 = vpack.i.bf16 %v2883_v29, %v2882_v28 }
  0xa2   : > { %2245 = vst.msk [vmem:[%s3914_s23 + $0xd0] sm:$0xff] %vm2218_vm1, %v3272_v42  ;;  %2246 = vst.msk [vmem:[%s3914_s23 + $0xd8] sm:$0xff] %vm2218_vm1, %v3273_v41  ;;  %v4634_v30 = vld [vmem:[%s3882_s15 + $0x298] sm:$0xff]   ;;  %v2879_v41 = vunpack.c.h.bf16 %v3147_v25  ;;  %v334_v42 = vld [vmem:[%s3906_s20 + $0x528] sm:$0xff] }
  0xa3   : > { %2243 = vst.msk [vmem:[%s3914_s23 + $0xc0] sm:$0xff] %vm2218_vm1, %v3267_v44  ;;  %2244 = vst.msk [vmem:[%s3914_s23 + $0xc8] sm:$0xff] %vm2218_vm1, %v3268_v43  ;;  %v3281_v54 = vpop.permute.xlu1 %3280  ;;  %v3276_v55 = vpop.permute.xlu0 %3275  ;;  %v3149_v43 = vld [vmem:[%s3882_s15 + $0x290] sm:$0xff]   ;;  %v2890_v47 = vunpack.c.l.bf16 %v4634_v30  ;;  %v2891_v57 = vunpack.c.h.bf16 %v4634_v30 }
  0xa4   : > { %v3283_v59 = vunpack.i.h.bf16 %v3281_v54  ;;  %v3282_v60 = vunpack.i.l.bf16 %v3281_v54  ;;  %v3278_v61 = vunpack.i.h.bf16 %v3276_v55  ;;  %v3277_v62 = vunpack.i.l.bf16 %v3276_v55  ;;  %592 = vst.msk [vmem:[%s3914_s23 + $0x530] sm:$0xff] %vm425_vm0, %v335_v35  ;;  %593 = vst.msk [vmem:[%s3914_s23 + $0x538] sm:$0xff] %vm425_vm0, %v336_v36  ;;  %v340_v54 = vld [vmem:[%s3906_s20 + $0x558] sm:$0xff]  ;;  %v337_v55 = vld [vmem:[%s3906_s20 + $0x540] sm:$0xff] }
  0xa5   : > { %3570 = vrot.lane.b32.xlu1 %v3569_v38, %s3852_s16  ;;  %3565 = vrot.lane.b32.xlu0 %v3564_v48, %s3852_s16  ;;  %v3599_v38 = vpack.i.bf16 %v2875_v21, %v2874_v11  ;;  %590 = vst.msk [vmem:[%s3914_s23 + $0x520] sm:$0xff] %vm425_vm0, %v333_v37  ;;  %591 = vst.msk [vmem:[%s3914_s23 + $0x528] sm:$0xff] %vm425_vm0, %v334_v42  ;;  %v3604_v56 = vpack.i.bf16 %v2879_v41, %v2878_v40  ;;  %v2886_v58 = vunpack.c.l.bf16 %v3149_v43 }
  0xa6   : > { %2249 = vst.msk [vmem:[%s3914_s23 + $0xf0] sm:$0xff] %vm2218_vm1, %v3282_v60  ;;  %2250 = vst.msk [vmem:[%s3914_s23 + $0xf8] sm:$0xff] %vm2218_vm1, %v3283_v59  ;;  %v3152_v48 = vld [vmem:[%s3882_s15 + $0x2a8] sm:$0xff]   ;;  %v2887_v59 = vunpack.c.h.bf16 %v3149_v43  ;;  %v347_v25 = vld [vmem:[%s3906_s20 + $0x590] sm:$0xff] }
  0xa7   : > { %2247 = vst.msk [vmem:[%s3914_s23 + $0xe0] sm:$0xff] %vm2218_vm1, %v3277_v62  ;;  %2248 = vst.msk [vmem:[%s3914_s23 + $0xe8] sm:$0xff] %vm2218_vm1, %v3278_v61  ;;  %v3291_v8 = vpop.permute.xlu1 %3290  ;;  %v3286_v9 = vpop.permute.xlu0 %3285  ;;  %v338_v60 = vld [vmem:[%s3906_s20 + $0x548] sm:$0xff]  ;;  %v3151_v61 = vld [vmem:[%s3882_s15 + $0x2a0] sm:$0xff]   ;;  %v2898_v0 = vunpack.c.l.bf16 %v3152_v48  ;;  %v2899_v1 = vunpack.c.h.bf16 %v3152_v48 }
  0xa8   : > { %v3293_v13 = vunpack.i.h.bf16 %v3291_v8  ;;  %v3292_v14 = vunpack.i.l.bf16 %v3291_v8  ;;  %v3288_v15 = vunpack.i.h.bf16 %v3286_v9  ;;  %v3287_v16 = vunpack.i.l.bf16 %v3286_v9  ;;  %596 = vst.msk [vmem:[%s3914_s23 + $0x550] sm:$0xff] %vm425_vm0, %v339_v53  ;;  %597 = vst.msk [vmem:[%s3914_s23 + $0x558] sm:$0xff] %vm425_vm0, %v340_v54  ;;  %v344_v8 = vld [vmem:[%s3906_s20 + $0x578] sm:$0xff]  ;;  %v341_v9 = vld [vmem:[%s3906_s20 + $0x560] sm:$0xff] }
  0xa9   : > { %3580 = vrot.lane.b32.xlu1 %v3579_v2, %s3852_s16  ;;  %3575 = vrot.lane.b32.xlu0 %v3574_v3, %s3852_s16  ;;  %594 = vst.msk [vmem:[%s3914_s23 + $0x540] sm:$0xff] %vm425_vm0, %v337_v55  ;;  %595 = vst.msk [vmem:[%s3914_s23 + $0x548] sm:$0xff] %vm425_vm0, %v338_v60  ;;  %v3614_v11 = vpack.i.bf16 %v2887_v59, %v2886_v58  ;;  %v2894_v12 = vunpack.c.l.bf16 %v3151_v61  ;;  %v3629_v18 = vpack.i.bf16 %v2899_v1, %v2898_v0 }
  0xaa   : > { %2253 = vst.msk [vmem:[%s3914_s23 + $0x110] sm:$0xff] %vm2218_vm1, %v3292_v14  ;;  %2254 = vst.msk [vmem:[%s3914_s23 + $0x118] sm:$0xff] %vm2218_vm1, %v3293_v13  ;;  %v4686_v2 = vld [vmem:[%s3882_s15 + $0x2b8] sm:$0xff]   ;;  %v2895_v13 = vunpack.c.h.bf16 %v3151_v61  ;;  %v342_v14 = vld [vmem:[%s3906_s20 + $0x568] sm:$0xff] }
  0xab   : > { %2251 = vst.msk [vmem:[%s3914_s23 + $0x100] sm:$0xff] %vm2218_vm1, %v3287_v16  ;;  %2252 = vst.msk [vmem:[%s3914_s23 + $0x108] sm:$0xff] %vm2218_vm1, %v3288_v15  ;;  %v3301_v26 = vpop.permute.xlu1 %3300  ;;  %v3296_v27 = vpop.permute.xlu0 %3295  ;;  %v3153_v15 = vld [vmem:[%s3882_s15 + $0x2b0] sm:$0xff]   ;;  %v2906_v19 = vunpack.c.l.bf16 %v4686_v2  ;;  %v2907_v29 = vunpack.c.h.bf16 %v4686_v2 }
  0xac   : > { %v3303_v31 = vunpack.i.h.bf16 %v3301_v26  ;;  %v3302_v32 = vunpack.i.l.bf16 %v3301_v26  ;;  %v3298_v33 = vunpack.i.h.bf16 %v3296_v27  ;;  %v3297_v34 = vunpack.i.l.bf16 %v3296_v27  ;;  %600 = vst.msk [vmem:[%s3914_s23 + $0x570] sm:$0xff] %vm425_vm0, %v343_v7  ;;  %601 = vst.msk [vmem:[%s3914_s23 + $0x578] sm:$0xff] %vm425_vm0, %v344_v8  ;;  %v348_v26 = vld [vmem:[%s3906_s20 + $0x598] sm:$0xff]  ;;  %v345_v27 = vld [vmem:[%s3906_s20 + $0x580] sm:$0xff] }
  0xad   : > { %3590 = vrot.lane.b32.xlu1 %v3589_v10, %s3852_s16  ;;  %3585 = vrot.lane.b32.xlu0 %v3584_v20, %s3852_s16  ;;  %v3619_v10 = vpack.i.bf16 %v2891_v57, %v2890_v47  ;;  %598 = vst.msk [vmem:[%s3914_s23 + $0x560] sm:$0xff] %vm425_vm0, %v341_v9  ;;  %599 = vst.msk [vmem:[%s3914_s23 + $0x568] sm:$0xff] %vm425_vm0, %v342_v14  ;;  %v3624_v28 = vpack.i.bf16 %v2895_v13, %v2894_v12  ;;  %v2902_v30 = vunpack.c.l.bf16 %v3153_v15 }
  0xae   : > { %2257 = vst.msk [vmem:[%s3914_s23 + $0x130] sm:$0xff] %vm2218_vm1, %v3302_v32  ;;  %2258 = vst.msk [vmem:[%s3914_s23 + $0x138] sm:$0xff] %vm2218_vm1, %v3303_v31  ;;  %v3156_v20 = vld [vmem:[%s3882_s15 + $0x2c8] sm:$0xff]   ;;  %v2903_v31 = vunpack.c.h.bf16 %v3153_v15  ;;  %v351_v43 = vld [vmem:[%s3906_s20 + $0x5b0] sm:$0xff] }
  0xaf   : > { %2255 = vst.msk [vmem:[%s3914_s23 + $0x120] sm:$0xff] %vm2218_vm1, %v3297_v34  ;;  %2256 = vst.msk [vmem:[%s3914_s23 + $0x128] sm:$0xff] %vm2218_vm1, %v3298_v33  ;;  %v3311_v44 = vpop.permute.xlu1 %3310  ;;  %v3306_v45 = vpop.permute.xlu0 %3305  ;;  %v346_v32 = vld [vmem:[%s3906_s20 + $0x588] sm:$0xff]  ;;  %v3155_v33 = vld [vmem:[%s3882_s15 + $0x2c0] sm:$0xff]   ;;  %v2914_v36 = vunpack.c.l.bf16 %v3156_v20  ;;  %v2915_v37 = vunpack.c.h.bf16 %v3156_v20 }
  0xb0   : > { %v3313_v49 = vunpack.i.h.bf16 %v3311_v44  ;;  %v3312_v50 = vunpack.i.l.bf16 %v3311_v44  ;;  %v3308_v51 = vunpack.i.h.bf16 %v3306_v45  ;;  %v3307_v52 = vunpack.i.l.bf16 %v3306_v45  ;;  %604 = vst.msk [vmem:[%s3914_s23 + $0x590] sm:$0xff] %vm425_vm0, %v347_v25  ;;  %605 = vst.msk [vmem:[%s3914_s23 + $0x598] sm:$0xff] %vm425_vm0, %v348_v26  ;;  %v352_v44 = vld [vmem:[%s3906_s20 + $0x5b8] sm:$0xff]  ;;  %v349_v45 = vld [vmem:[%s3906_s20 + $0x5a0] sm:$0xff] }
  0xb1   : > { %3600 = vrot.lane.b32.xlu1 %v3599_v38, %s3852_s16  ;;  %3595 = vrot.lane.b32.xlu0 %v3594_v39, %s3852_s16  ;;  %602 = vst.msk [vmem:[%s3914_s23 + $0x580] sm:$0xff] %vm425_vm0, %v345_v27  ;;  %603 = vst.msk [vmem:[%s3914_s23 + $0x588] sm:$0xff] %vm425_vm0, %v346_v32  ;;  %v3634_v47 = vpack.i.bf16 %v2903_v31, %v2902_v30  ;;  %v2910_v48 = vunpack.c.l.bf16 %v3155_v33  ;;  %v3649_v54 = vpack.i.bf16 %v2915_v37, %v2914_v36 }
  0xb2   : > { %2261 = vst.msk [vmem:[%s3914_s23 + $0x150] sm:$0xff] %vm2218_vm1, %v3312_v50  ;;  %2262 = vst.msk [vmem:[%s3914_s23 + $0x158] sm:$0xff] %vm2218_vm1, %v3313_v49  ;;  %v4738_v38 = vld [vmem:[%s3882_s15 + $0x2d8] sm:$0xff]   ;;  %v2911_v49 = vunpack.c.h.bf16 %v3155_v33  ;;  %v350_v50 = vld [vmem:[%s3906_s20 + $0x5a8] sm:$0xff] }
  0xb3   : > { %2259 = vst.msk [vmem:[%s3914_s23 + $0x140] sm:$0xff] %vm2218_vm1, %v3307_v52  ;;  %2260 = vst.msk [vmem:[%s3914_s23 + $0x148] sm:$0xff] %vm2218_vm1, %v3308_v51  ;;  %v3321_v62 = vpop.permute.xlu1 %3320  ;;  %v3316_v63 = vpop.permute.xlu0 %3315  ;;  %v3157_v51 = vld [vmem:[%s3882_s15 + $0x2d0] sm:$0xff]   ;;  %v2922_v55 = vunpack.c.l.bf16 %v4738_v38  ;;  %v2923_v1 = vunpack.c.h.bf16 %v4738_v38 }
  0xb4   : > { %v3323_v3 = vunpack.i.h.bf16 %v3321_v62  ;;  %v3322_v4 = vunpack.i.l.bf16 %v3321_v62  ;;  %v3318_v5 = vunpack.i.h.bf16 %v3316_v63  ;;  %v3317_v6 = vunpack.i.l.bf16 %v3316_v63  ;;  %608 = vst.msk [vmem:[%s3914_s23 + $0x5b0] sm:$0xff] %vm425_vm0, %v351_v43  ;;  %609 = vst.msk [vmem:[%s3914_s23 + $0x5b8] sm:$0xff] %vm425_vm0, %v352_v44  ;;  %v355_v61 = vld [vmem:[%s3906_s20 + $0x5d0] sm:$0xff]  ;;  %v356_v62 = vld [vmem:[%s3906_s20 + $0x5d8] sm:$0xff] }
  0xb5   : > { %3610 = vrot.lane.b32.xlu1 %v3609_v46, %s3852_s16  ;;  %3605 = vrot.lane.b32.xlu0 %v3604_v56, %s3852_s16  ;;  %v3639_v46 = vpack.i.bf16 %v2907_v29, %v2906_v19  ;;  %606 = vst.msk [vmem:[%s3914_s23 + $0x5a0] sm:$0xff] %vm425_vm0, %v349_v45  ;;  %607 = vst.msk [vmem:[%s3914_s23 + $0x5a8] sm:$0xff] %vm425_vm0, %v350_v50  ;;  %v3644_v0 = vpack.i.bf16 %v2911_v49, %v2910_v48  ;;  %v2918_v2 = vunpack.c.l.bf16 %v3157_v51 }
  0xb6   : > { %2265 = vst.msk [vmem:[%s3914_s23 + $0x170] sm:$0xff] %vm2218_vm1, %v3322_v4  ;;  %2266 = vst.msk [vmem:[%s3914_s23 + $0x178] sm:$0xff] %vm2218_vm1, %v3323_v3  ;;  %v3160_v56 = vld [vmem:[%s3882_s15 + $0x2e8] sm:$0xff]   ;;  %v353_v63 = vld [vmem:[%s3906_s20 + $0x5c0] sm:$0xff]  ;;  %v2919_v3 = vunpack.c.h.bf16 %v3157_v51 }
  0xb7   : > { %2263 = vst.msk [vmem:[%s3914_s23 + $0x160] sm:$0xff] %vm2218_vm1, %v3317_v6  ;;  %2264 = vst.msk [vmem:[%s3914_s23 + $0x168] sm:$0xff] %vm2218_vm1, %v3318_v5  ;;  %v3331_v16 = vpop.permute.xlu1 %3330  ;;  %v3326_v17 = vpop.permute.xlu0 %3325  ;;  %v354_v4 = vld [vmem:[%s3906_s20 + $0x5c8] sm:$0xff]  ;;  %v3159_v5 = vld [vmem:[%s3882_s15 + $0x2e0] sm:$0xff]   ;;  %v2930_v8 = vunpack.c.l.bf16 %v3160_v56  ;;  %v2931_v9 = vunpack.c.h.bf16 %v3160_v56 }
  0xb8   : > { %v3333_v21 = vunpack.i.h.bf16 %v3331_v16  ;;  %v3332_v22 = vunpack.i.l.bf16 %v3331_v16  ;;  %v3328_v23 = vunpack.i.h.bf16 %v3326_v17  ;;  %v3327_v24 = vunpack.i.l.bf16 %v3326_v17  ;;  %612 = vst.msk [vmem:[%s3914_s23 + $0x5d0] sm:$0xff] %vm425_vm0, %v355_v61  ;;  %613 = vst.msk [vmem:[%s3914_s23 + $0x5d8] sm:$0xff] %vm425_vm0, %v356_v62  ;;  %v359_v15 = vld [vmem:[%s3906_s20 + $0x5f0] sm:$0xff]  ;;  %v360_v16 = vld [vmem:[%s3906_s20 + $0x5f8] sm:$0xff] }
  0xb9   : > { %3620 = vrot.lane.b32.xlu1 %v3619_v10, %s3852_s16  ;;  %3615 = vrot.lane.b32.xlu0 %v3614_v11, %s3852_s16  ;;  %610 = vst.msk [vmem:[%s3914_s23 + $0x5c0] sm:$0xff] %vm425_vm0, %v353_v63  ;;  %611 = vst.msk [vmem:[%s3914_s23 + $0x5c8] sm:$0xff] %vm425_vm0, %v354_v4  ;;  %v3654_v19 = vpack.i.bf16 %v2919_v3, %v2918_v2  ;;  %v2926_v20 = vunpack.c.l.bf16 %v3159_v5  ;;  %v3669_v26 = vpack.i.bf16 %v2931_v9, %v2930_v8 }
  0xba   : > { %2269 = vst.msk [vmem:[%s3914_s23 + $0x190] sm:$0xff] %vm2218_vm1, %v3332_v22  ;;  %2270 = vst.msk [vmem:[%s3914_s23 + $0x198] sm:$0xff] %vm2218_vm1, %v3333_v21  ;;  %v4790_v10 = vld [vmem:[%s3882_s15 + $0x2f8] sm:$0xff]   ;;  %v357_v17 = vld [vmem:[%s3906_s20 + $0x5e0] sm:$0xff]  ;;  %v2927_v21 = vunpack.c.h.bf16 %v3159_v5 }
  0xbb   : > { %2267 = vst.msk [vmem:[%s3914_s23 + $0x180] sm:$0xff] %vm2218_vm1, %v3327_v24  ;;  %2268 = vst.msk [vmem:[%s3914_s23 + $0x188] sm:$0xff] %vm2218_vm1, %v3328_v23  ;;  %v3341_v34 = vpop.permute.xlu1 %3340  ;;  %v3336_v35 = vpop.permute.xlu0 %3335  ;;  %v358_v22 = vld [vmem:[%s3906_s20 + $0x5e8] sm:$0xff]  ;;  %v3161_v23 = vld [vmem:[%s3882_s15 + $0x2f0] sm:$0xff]   ;;  %v2938_v27 = vunpack.c.l.bf16 %v4790_v10  ;;  %v2939_v37 = vunpack.c.h.bf16 %v4790_v10 }
  0xbc   : > { %v3343_v39 = vunpack.i.h.bf16 %v3341_v34  ;;  %v3342_v40 = vunpack.i.l.bf16 %v3341_v34  ;;  %v3338_v41 = vunpack.i.h.bf16 %v3336_v35  ;;  %v3337_v42 = vunpack.i.l.bf16 %v3336_v35  ;;  %616 = vst.msk [vmem:[%s3914_s23 + $0x5f0] sm:$0xff] %vm425_vm0, %v359_v15  ;;  %617 = vst.msk [vmem:[%s3914_s23 + $0x5f8] sm:$0xff] %vm425_vm0, %v360_v16  ;;  %v363_v33 = vld [vmem:[%s3906_s20 + $0x610] sm:$0xff]  ;;  %v364_v34 = vld [vmem:[%s3906_s20 + $0x618] sm:$0xff] }
  0xbd   : > { %3630 = vrot.lane.b32.xlu1 %v3629_v18, %s3852_s16  ;;  %3625 = vrot.lane.b32.xlu0 %v3624_v28, %s3852_s16  ;;  %v3659_v18 = vpack.i.bf16 %v2923_v1, %v2922_v55  ;;  %614 = vst.msk [vmem:[%s3914_s23 + $0x5e0] sm:$0xff] %vm425_vm0, %v357_v17  ;;  %615 = vst.msk [vmem:[%s3914_s23 + $0x5e8] sm:$0xff] %vm425_vm0, %v358_v22  ;;  %v3664_v36 = vpack.i.bf16 %v2927_v21, %v2926_v20  ;;  %v2934_v38 = vunpack.c.l.bf16 %v3161_v23 }
  0xbe   : > { %2273 = vst.msk [vmem:[%s3914_s23 + $0x1b0] sm:$0xff] %vm2218_vm1, %v3342_v40  ;;  %2274 = vst.msk [vmem:[%s3914_s23 + $0x1b8] sm:$0xff] %vm2218_vm1, %v3343_v39  ;;  %v3164_v28 = vld [vmem:[%s3882_s15 + $0x308] sm:$0xff]   ;;  %v361_v35 = vld [vmem:[%s3906_s20 + $0x600] sm:$0xff]  ;;  %v2935_v39 = vunpack.c.h.bf16 %v3161_v23 }
  0xbf   : > { %2271 = vst.msk [vmem:[%s3914_s23 + $0x1a0] sm:$0xff] %vm2218_vm1, %v3337_v42  ;;  %2272 = vst.msk [vmem:[%s3914_s23 + $0x1a8] sm:$0xff] %vm2218_vm1, %v3338_v41  ;;  %v3351_v52 = vpop.permute.xlu1 %3350  ;;  %v3346_v53 = vpop.permute.xlu0 %3345  ;;  %v362_v40 = vld [vmem:[%s3906_s20 + $0x608] sm:$0xff]  ;;  %v3163_v41 = vld [vmem:[%s3882_s15 + $0x300] sm:$0xff]   ;;  %v2946_v44 = vunpack.c.l.bf16 %v3164_v28  ;;  %v2947_v45 = vunpack.c.h.bf16 %v3164_v28 }
  0xc0   : > { %v3353_v57 = vunpack.i.h.bf16 %v3351_v52  ;;  %v3352_v58 = vunpack.i.l.bf16 %v3351_v52  ;;  %v3348_v59 = vunpack.i.h.bf16 %v3346_v53  ;;  %v3347_v60 = vunpack.i.l.bf16 %v3346_v53  ;;  %620 = vst.msk [vmem:[%s3914_s23 + $0x610] sm:$0xff] %vm425_vm0, %v363_v33  ;;  %621 = vst.msk [vmem:[%s3914_s23 + $0x618] sm:$0xff] %vm425_vm0, %v364_v34  ;;  %v367_v51 = vld [vmem:[%s3906_s20 + $0x630] sm:$0xff]  ;;  %v368_v52 = vld [vmem:[%s3906_s20 + $0x638] sm:$0xff] }
  0xc1   : > { %3640 = vrot.lane.b32.xlu1 %v3639_v46, %s3852_s16  ;;  %3635 = vrot.lane.b32.xlu0 %v3634_v47, %s3852_s16  ;;  %618 = vst.msk [vmem:[%s3914_s23 + $0x600] sm:$0xff] %vm425_vm0, %v361_v35  ;;  %619 = vst.msk [vmem:[%s3914_s23 + $0x608] sm:$0xff] %vm425_vm0, %v362_v40  ;;  %v3674_v55 = vpack.i.bf16 %v2935_v39, %v2934_v38  ;;  %v2942_v56 = vunpack.c.l.bf16 %v3163_v41  ;;  %v3689_v62 = vpack.i.bf16 %v2947_v45, %v2946_v44 }
  0xc2   : > { %2277 = vst.msk [vmem:[%s3914_s23 + $0x1d0] sm:$0xff] %vm2218_vm1, %v3352_v58  ;;  %2278 = vst.msk [vmem:[%s3914_s23 + $0x1d8] sm:$0xff] %vm2218_vm1, %v3353_v57  ;;  %v4842_v46 = vld [vmem:[%s3882_s15 + $0x318] sm:$0xff]   ;;  %v365_v53 = vld [vmem:[%s3906_s20 + $0x620] sm:$0xff]  ;;  %v2943_v57 = vunpack.c.h.bf16 %v3163_v41 }
  0xc3   : > { %2275 = vst.msk [vmem:[%s3914_s23 + $0x1c0] sm:$0xff] %vm2218_vm1, %v3347_v60  ;;  %2276 = vst.msk [vmem:[%s3914_s23 + $0x1c8] sm:$0xff] %vm2218_vm1, %v3348_v59  ;;  %v3361_v6 = vpop.permute.xlu1 %3360  ;;  %v3356_v7 = vpop.permute.xlu0 %3355  ;;  %v366_v58 = vld [vmem:[%s3906_s20 + $0x628] sm:$0xff]  ;;  %v3165_v59 = vld [vmem:[%s3882_s15 + $0x310] sm:$0xff]   ;;  %v2954_v63 = vunpack.c.l.bf16 %v4842_v46  ;;  %v2955_v10 = vunpack.c.h.bf16 %v4842_v46 }
  0xc4   : > { %v3363_v11 = vunpack.i.h.bf16 %v3361_v6  ;;  %v3362_v12 = vunpack.i.l.bf16 %v3361_v6  ;;  %v3358_v13 = vunpack.i.h.bf16 %v3356_v7  ;;  %v3357_v14 = vunpack.i.l.bf16 %v3356_v7  ;;  %624 = vst.msk [vmem:[%s3914_s23 + $0x630] sm:$0xff] %vm425_vm0, %v367_v51  ;;  %625 = vst.msk [vmem:[%s3914_s23 + $0x638] sm:$0xff] %vm425_vm0, %v368_v52  ;;  %v3167_v1 = vld [vmem:[%s3882_s15 + $0x320] sm:$0xff]   ;;  %v371_v6 = vld [vmem:[%s3906_s20 + $0x650] sm:$0xff] }
  0xc5   : > { %3650 = vrot.lane.b32.xlu1 %v3649_v54, %s3852_s16  ;;  %3645 = vrot.lane.b32.xlu0 %v3644_v0, %s3852_s16  ;;  %v3679_v54 = vpack.i.bf16 %v2939_v37, %v2938_v27  ;;  %622 = vst.msk [vmem:[%s3914_s23 + $0x620] sm:$0xff] %vm425_vm0, %v365_v53  ;;  %623 = vst.msk [vmem:[%s3914_s23 + $0x628] sm:$0xff] %vm425_vm0, %v366_v58  ;;  %v3684_v9 = vpack.i.bf16 %v2943_v57, %v2942_v56 }
  0xc6   : > { %2281 = vst.msk [vmem:[%s3914_s23 + $0x1f0] sm:$0xff] %vm2218_vm1, %v3362_v12  ;;  %2282 = vst.msk [vmem:[%s3914_s23 + $0x1f8] sm:$0xff] %vm2218_vm1, %v3363_v11  ;;  %v3168_v0 = vld [vmem:[%s3882_s15 + $0x328] sm:$0xff]   ;;  %v372_v7 = vld [vmem:[%s3906_s20 + $0x658] sm:$0xff]  ;;  %v2950_v11 = vunpack.c.l.bf16 %v3165_v59  ;;  %v2951_v12 = vunpack.c.h.bf16 %v3165_v59  ;;  %v3699_v27 = vpack.i.bf16 %v2955_v10, %v2954_v63 }
  0xc7   : > { %2279 = vst.msk [vmem:[%s3914_s23 + $0x1e0] sm:$0xff] %vm2218_vm1, %v3357_v14  ;;  %2280 = vst.msk [vmem:[%s3914_s23 + $0x1e8] sm:$0xff] %vm2218_vm1, %v3358_v13  ;;  %v3371_v24 = vpop.permute.xlu1 %3370  ;;  %v3366_v25 = vpop.permute.xlu0 %3365  ;;  %v369_v8 = vld [vmem:[%s3906_s20 + $0x640] sm:$0xff]  ;;  %v370_v13 = vld [vmem:[%s3906_s20 + $0x648] sm:$0xff]  ;;  %v2962_v16 = vunpack.c.l.bf16 %v3168_v0  ;;  %v2963_v17 = vunpack.c.h.bf16 %v3168_v0 }
  0xc8   : > { %v3373_v29 = vunpack.i.h.bf16 %v3371_v24  ;;  %v3372_v30 = vunpack.i.l.bf16 %v3371_v24  ;;  %v3368_v31 = vunpack.i.h.bf16 %v3366_v25  ;;  %v3367_v32 = vunpack.i.l.bf16 %v3366_v25  ;;  %628 = vst.msk [vmem:[%s3914_s23 + $0x650] sm:$0xff] %vm425_vm0, %v371_v6  ;;  %629 = vst.msk [vmem:[%s3914_s23 + $0x658] sm:$0xff] %vm425_vm0, %v372_v7  ;;  %v375_v24 = vld [vmem:[%s3906_s20 + $0x670] sm:$0xff]  ;;  %v376_v25 = vld [vmem:[%s3906_s20 + $0x678] sm:$0xff] }
  0xc9   : > { %3660 = vrot.lane.b32.xlu1 %v3659_v18, %s3852_s16  ;;  %3655 = vrot.lane.b32.xlu0 %v3654_v19, %s3852_s16  ;;  %626 = vst.msk [vmem:[%s3914_s23 + $0x640] sm:$0xff] %vm425_vm0, %v369_v8  ;;  %627 = vst.msk [vmem:[%s3914_s23 + $0x648] sm:$0xff] %vm425_vm0, %v370_v13  ;;  %v2958_v18 = vunpack.c.l.bf16 %v3167_v1  ;;  %v2959_v19 = vunpack.c.h.bf16 %v3167_v1  ;;  %v3694_v28 = vpack.i.bf16 %v2951_v12, %v2950_v11 }
  0xca   : > { %2285 = vst.msk [vmem:[%s3914_s23 + $0x210] sm:$0xff] %vm2218_vm1, %v3372_v30  ;;  %2286 = vst.msk [vmem:[%s3914_s23 + $0x218] sm:$0xff] %vm2218_vm1, %v3373_v29  ;;  %v374_v29 = vld [vmem:[%s3906_s20 + $0x668] sm:$0xff]  ;;  %v3170_v30 = vld [vmem:[%s3882_s15 + $0x338] sm:$0xff]   ;;  %v3709_v34 = vpack.i.bf16 %v2963_v17, %v2962_v16 }
  0xcb   : > { %2283 = vst.msk [vmem:[%s3914_s23 + $0x200] sm:$0xff] %vm2218_vm1, %v3367_v32  ;;  %2284 = vst.msk [vmem:[%s3914_s23 + $0x208] sm:$0xff] %vm2218_vm1, %v3368_v31  ;;  %v3381_v42 = vpop.permute.xlu1 %3380  ;;  %v3376_v43 = vpop.permute.xlu0 %3375  ;;  %v3169_v31 = vld [vmem:[%s3882_s15 + $0x330] sm:$0xff]   ;;  %v3704_v35 = vpack.i.bf16 %v2959_v19, %v2958_v18  ;;  %v3171_v37 = vld [vmem:[%s3882_s15 + $0x340] sm:$0xff]   ;;  %v2970_v45 = vunpack.c.l.bf16 %v3170_v30  ;;  %v2971_v46 = vunpack.c.h.bf16 %v3170_v30 }
  0xcc   : > { %v3383_v47 = vunpack.i.h.bf16 %v3381_v42  ;;  %v3382_v48 = vunpack.i.l.bf16 %v3381_v42  ;;  %v3378_v49 = vunpack.i.h.bf16 %v3376_v43  ;;  %v3377_v50 = vunpack.i.l.bf16 %v3376_v43  ;;  %632 = vst.msk [vmem:[%s3914_s23 + $0x670] sm:$0xff] %vm425_vm0, %v375_v24  ;;  %633 = vst.msk [vmem:[%s3914_s23 + $0x678] sm:$0xff] %vm425_vm0, %v376_v25  ;;  %v379_v42 = vld [vmem:[%s3906_s20 + $0x690] sm:$0xff]  ;;  %v380_v43 = vld [vmem:[%s3906_s20 + $0x698] sm:$0xff] }
  0xcd   : > { %3670 = vrot.lane.b32.xlu1 %v3669_v26, %s3852_s16  ;;  %3665 = vrot.lane.b32.xlu0 %v3664_v36, %s3852_s16  ;;  %v373_v26 = vld [vmem:[%s3906_s20 + $0x660] sm:$0xff]  ;;  %631 = vst.msk [vmem:[%s3914_s23 + $0x668] sm:$0xff] %vm425_vm0, %v374_v29  ;;  %v3719_v63 = vpack.i.bf16 %v2971_v46, %v2970_v45 }
  0xce   : > { %2289 = vst.msk [vmem:[%s3914_s23 + $0x230] sm:$0xff] %vm2218_vm1, %v3382_v48  ;;  %2290 = vst.msk [vmem:[%s3914_s23 + $0x238] sm:$0xff] %vm2218_vm1, %v3383_v47  ;;  %v3172_v36 = vld [vmem:[%s3882_s15 + $0x348] sm:$0xff]   ;;  %v377_v44 = vld [vmem:[%s3906_s20 + $0x680] sm:$0xff]  ;;  %v2966_v47 = vunpack.c.l.bf16 %v3169_v31  ;;  %v2967_v48 = vunpack.c.h.bf16 %v3169_v31 }
  0xcf   : > { %2287 = vst.msk [vmem:[%s3914_s23 + $0x220] sm:$0xff] %vm2218_vm1, %v3377_v50  ;;  %2288 = vst.msk [vmem:[%s3914_s23 + $0x228] sm:$0xff] %vm2218_vm1, %v3378_v49  ;;  %v3391_v60 = vpop.permute.xlu1 %3390  ;;  %v3386_v61 = vpop.permute.xlu0 %3385  ;;  %v378_v49 = vld [vmem:[%s3906_s20 + $0x688] sm:$0xff]  ;;  %v2978_v52 = vunpack.c.l.bf16 %v3172_v36  ;;  %v2979_v53 = vunpack.c.h.bf16 %v3172_v36  ;;  %v385_v16 = vld [vmem:[%s3906_s20 + $0x6c0] sm:$0xff] }
  0xd0   : > { %v3393_v2 = vunpack.i.h.bf16 %v3391_v60  ;;  %v3392_v3 = vunpack.i.l.bf16 %v3391_v60  ;;  %v3388_v4 = vunpack.i.h.bf16 %v3386_v61  ;;  %v3387_v5 = vunpack.i.l.bf16 %v3386_v61  ;;  %630 = vst.msk [vmem:[%s3914_s23 + $0x660] sm:$0xff] %vm425_vm0, %v373_v26  ;;  %636 = vst.msk [vmem:[%s3914_s23 + $0x690] sm:$0xff] %vm425_vm0, %v379_v42  ;;  %v383_v60 = vld [vmem:[%s3906_s20 + $0x6b0] sm:$0xff]  ;;  %v384_v61 = vld [vmem:[%s3906_s20 + $0x6b8] sm:$0xff] }
  0xd1   : > { %3680 = vrot.lane.b32.xlu1 %v3679_v54, %s3852_s16  ;;  %3675 = vrot.lane.b32.xlu0 %v3674_v55, %s3852_s16  ;;  %637 = vst.msk [vmem:[%s3914_s23 + $0x698] sm:$0xff] %vm425_vm0, %v380_v43  ;;  %634 = vst.msk [vmem:[%s3914_s23 + $0x680] sm:$0xff] %vm425_vm0, %v377_v44  ;;  %v2974_v54 = vunpack.c.l.bf16 %v3171_v37  ;;  %v2975_v55 = vunpack.c.h.bf16 %v3171_v37  ;;  %v3714_v0 = vpack.i.bf16 %v2967_v48, %v2966_v47 }
  0xd2   : > { %2293 = vst.msk [vmem:[%s3914_s23 + $0x250] sm:$0xff] %vm2218_vm1, %v3392_v3  ;;  %2294 = vst.msk [vmem:[%s3914_s23 + $0x258] sm:$0xff] %vm2218_vm1, %v3393_v2  ;;  %v382_v1 = vld [vmem:[%s3906_s20 + $0x6a8] sm:$0xff]  ;;  %v3174_v2 = vld [vmem:[%s3882_s15 + $0x358] sm:$0xff]   ;;  %v3729_v6 = vpack.i.bf16 %v2979_v53, %v2978_v52 }
  0xd3   : > { %2291 = vst.msk [vmem:[%s3914_s23 + $0x240] sm:$0xff] %vm2218_vm1, %v3387_v5  ;;  %2292 = vst.msk [vmem:[%s3914_s23 + $0x248] sm:$0xff] %vm2218_vm1, %v3388_v4  ;;  %v3401_v14 = vpop.permute.xlu1 %3400  ;;  %v3396_v15 = vpop.permute.xlu0 %3395  ;;  %v3173_v3 = vld [vmem:[%s3882_s15 + $0x350] sm:$0xff]   ;;  %v3724_v7 = vpack.i.bf16 %v2975_v55, %v2974_v54  ;;  %v3176_v8 = vld [vmem:[%s3882_s15 + $0x368] sm:$0xff]   ;;  %v2986_v17 = vunpack.c.l.bf16 %v3174_v2  ;;  %v2987_v18 = vunpack.c.h.bf16 %v3174_v2 }
  0xd4   : > { %v3403_v20 = vunpack.i.h.bf16 %v3401_v14  ;;  %v3402_v21 = vunpack.i.l.bf16 %v3401_v14  ;;  %v3398_v22 = vunpack.i.h.bf16 %v3396_v15  ;;  %v3397_v23 = vunpack.i.l.bf16 %v3396_v15  ;;  %635 = vst.msk [vmem:[%s3914_s23 + $0x688] sm:$0xff] %vm425_vm0, %v378_v49  ;;  %640 = vst.msk [vmem:[%s3914_s23 + $0x6b0] sm:$0xff] %vm425_vm0, %v383_v60  ;;  %v387_v14 = vld [vmem:[%s3906_s20 + $0x6d0] sm:$0xff]  ;;  %v388_v15 = vld [vmem:[%s3906_s20 + $0x6d8] sm:$0xff] }
  0xd5   : > { %3690 = vrot.lane.b32.xlu1 %v3689_v62, %s3852_s16  ;;  %3685 = vrot.lane.b32.xlu0 %v3684_v9, %s3852_s16  ;;  %v381_v62 = vld [vmem:[%s3906_s20 + $0x6a0] sm:$0xff]  ;;  %641 = vst.msk [vmem:[%s3914_s23 + $0x6b8] sm:$0xff] %vm425_vm0, %v384_v61  ;;  %v2982_v19 = vunpack.c.l.bf16 %v3173_v3  ;;  %v2994_v24 = vunpack.c.l.bf16 %v3176_v8  ;;  %v2995_v25 = vunpack.c.h.bf16 %v3176_v8 }
  0xd6   : > { %2297 = vst.msk [vmem:[%s3914_s23 + $0x270] sm:$0xff] %vm2218_vm1, %v3402_v21  ;;  %2298 = vst.msk [vmem:[%s3914_s23 + $0x278] sm:$0xff] %vm2218_vm1, %v3403_v20  ;;  %v3175_v9 = vld [vmem:[%s3882_s15 + $0x360] sm:$0xff]   ;;  %v2983_v20 = vunpack.c.h.bf16 %v3173_v3  ;;  %v386_v21 = vld [vmem:[%s3906_s20 + $0x6c8] sm:$0xff] }
  0xd7   : > { %2295 = vst.msk [vmem:[%s3914_s23 + $0x260] sm:$0xff] %vm2218_vm1, %v3397_v23  ;;  %2296 = vst.msk [vmem:[%s3914_s23 + $0x268] sm:$0xff] %vm2218_vm1, %v3398_v22  ;;  %v3411_v32 = vpop.permute.xlu1 %3410  ;;  %v3406_v33 = vpop.permute.xlu0 %3405  ;;  %v2990_v26 = vunpack.c.l.bf16 %v3175_v9  ;;  %v390_v37 = vld [vmem:[%s3906_s20 + $0x6e8] sm:$0xff]  ;;  %v3749_v42 = vpack.i.bf16 %v2995_v25, %v2994_v24  ;;  %v3179_v45 = vld [vmem:[%s3882_s15 + $0x380] sm:$0xff]  }
  0xd8   : > { %v3413_v38 = vunpack.i.h.bf16 %v3411_v32  ;;  %v3412_v39 = vunpack.i.l.bf16 %v3411_v32  ;;  %v3408_v40 = vunpack.i.h.bf16 %v3406_v33  ;;  %v3407_v41 = vunpack.i.l.bf16 %v3406_v33  ;;  %638 = vst.msk [vmem:[%s3914_s23 + $0x6a0] sm:$0xff] %vm425_vm0, %v381_v62  ;;  %639 = vst.msk [vmem:[%s3914_s23 + $0x6a8] sm:$0xff] %vm425_vm0, %v382_v1  ;;  %v391_v32 = vld [vmem:[%s3906_s20 + $0x6f0] sm:$0xff]  ;;  %v392_v33 = vld [vmem:[%s3906_s20 + $0x6f8] sm:$0xff] }
  0xd9   : > { %3700 = vrot.lane.b32.xlu1 %v3699_v27, %s3852_s16  ;;  %3695 = vrot.lane.b32.xlu0 %v3694_v28, %s3852_s16  ;;  %644 = vst.msk [vmem:[%s3914_s23 + $0x6d0] sm:$0xff] %vm425_vm0, %v387_v14  ;;  %645 = vst.msk [vmem:[%s3914_s23 + $0x6d8] sm:$0xff] %vm425_vm0, %v388_v15  ;;  %v2991_v27 = vunpack.c.h.bf16 %v3175_v9  ;;  %v3734_v36 = vpack.i.bf16 %v2983_v20, %v2982_v19  ;;  %v3006_v62 = vunpack.c.l.bf16 %v3179_v45 }
  0xda   : > { %2301 = vst.msk [vmem:[%s3914_s23 + $0x290] sm:$0xff] %vm2218_vm1, %v3412_v39  ;;  %2302 = vst.msk [vmem:[%s3914_s23 + $0x298] sm:$0xff] %vm2218_vm1, %v3413_v38  ;;  %v3178_v38 = vld [vmem:[%s3882_s15 + $0x378] sm:$0xff]   ;;  %v3177_v39 = vld [vmem:[%s3882_s15 + $0x370] sm:$0xff]  }
  0xdb   : > { %2299 = vst.msk [vmem:[%s3914_s23 + $0x280] sm:$0xff] %vm2218_vm1, %v3407_v41  ;;  %2300 = vst.msk [vmem:[%s3914_s23 + $0x288] sm:$0xff] %vm2218_vm1, %v3408_v40  ;;  %v3421_v50 = vpop.permute.xlu1 %3420  ;;  %v3416_v51 = vpop.permute.xlu0 %3415  ;;  %v3744_v43 = vpack.i.bf16 %v2991_v27, %v2990_v26  ;;  %v3180_v44 = vld [vmem:[%s3882_s15 + $0x388] sm:$0xff]   ;;  %v393_v52 = vld [vmem:[%s3906_s20 + $0x700] sm:$0xff]  ;;  %v3002_v53 = vunpack.c.l.bf16 %v3178_v38  ;;  %v3003_v54 = vunpack.c.h.bf16 %v3178_v38  ;;  %v2998_v55 = vunpack.c.l.bf16 %v3177_v39 }
  0xdc   : > { %v3423_v56 = vunpack.i.h.bf16 %v3421_v50  ;;  %v3422_v57 = vunpack.i.l.bf16 %v3421_v50  ;;  %v3418_v58 = vunpack.i.h.bf16 %v3416_v51  ;;  %v3417_v59 = vunpack.i.l.bf16 %v3416_v51  ;;  %642 = vst.msk [vmem:[%s3914_s23 + $0x6c0] sm:$0xff] %vm425_vm0, %v385_v16  ;;  %643 = vst.msk [vmem:[%s3914_s23 + $0x6c8] sm:$0xff] %vm425_vm0, %v386_v21  ;;  %v395_v50 = vld [vmem:[%s3906_s20 + $0x710] sm:$0xff]  ;;  %v396_v51 = vld [vmem:[%s3906_s20 + $0x718] sm:$0xff] }
  0xdd   : > { %3710 = vrot.lane.b32.xlu1 %v3709_v34, %s3852_s16  ;;  %3705 = vrot.lane.b32.xlu0 %v3704_v35, %s3852_s16  ;;  %v389_v34 = vld [vmem:[%s3906_s20 + $0x6e0] sm:$0xff]  ;;  %v3739_v35 = vpack.i.bf16 %v2987_v18, %v2986_v17  ;;  %648 = vst.msk [vmem:[%s3914_s23 + $0x6f0] sm:$0xff] %vm425_vm0, %v391_v32  ;;  %v3010_v60 = vunpack.c.l.bf16 %v3180_v44  ;;  %v3011_v61 = vunpack.c.h.bf16 %v3180_v44 }
  0xde   : > { %2305 = vst.msk [vmem:[%s3914_s23 + $0x2b0] sm:$0xff] %vm2218_vm1, %v3422_v57  ;;  %2306 = vst.msk [vmem:[%s3914_s23 + $0x2b8] sm:$0xff] %vm2218_vm1, %v3423_v56  ;;  %v2999_v56 = vunpack.c.h.bf16 %v3177_v39  ;;  %v394_v57 = vld [vmem:[%s3906_s20 + $0x708] sm:$0xff]  ;;  %v3183_v17 = vld [vmem:[%s3882_s15 + $0x3a0] sm:$0xff]  }
  0xdf   : > { %2303 = vst.msk [vmem:[%s3914_s23 + $0x2a0] sm:$0xff] %vm2218_vm1, %v3417_v59  ;;  %2304 = vst.msk [vmem:[%s3914_s23 + $0x2a8] sm:$0xff] %vm2218_vm1, %v3418_v58  ;;  %v3431_v4 = vpop.permute.xlu1 %3430  ;;  %v3426_v5 = vpop.permute.xlu0 %3425  ;;  %v398_v9 = vld [vmem:[%s3906_s20 + $0x728] sm:$0xff]  ;;  %v3769_v14 = vpack.i.bf16 %v3011_v61, %v3010_v60  ;;  %v401_v24 = vld [vmem:[%s3906_s20 + $0x740] sm:$0xff] }
  0xe0   : > { %v3433_v10 = vunpack.i.h.bf16 %v3431_v4  ;;  %v3432_v11 = vunpack.i.l.bf16 %v3431_v4  ;;  %v3428_v12 = vunpack.i.h.bf16 %v3426_v5  ;;  %v3427_v13 = vunpack.i.l.bf16 %v3426_v5  ;;  %649 = vst.msk [vmem:[%s3914_s23 + $0x6f8] sm:$0xff] %vm425_vm0, %v392_v33  ;;  %646 = vst.msk [vmem:[%s3914_s23 + $0x6e0] sm:$0xff] %vm425_vm0, %v389_v34  ;;  %v399_v4 = vld [vmem:[%s3906_s20 + $0x730] sm:$0xff]  ;;  %v400_v5 = vld [vmem:[%s3906_s20 + $0x738] sm:$0xff] }
  0xe1   : > { %3720 = vrot.lane.b32.xlu1 %v3719_v63, %s3852_s16  ;;  %3715 = vrot.lane.b32.xlu0 %v3714_v0, %s3852_s16  ;;  %647 = vst.msk [vmem:[%s3914_s23 + $0x6e8] sm:$0xff] %vm425_vm0, %v390_v37  ;;  %652 = vst.msk [vmem:[%s3914_s23 + $0x710] sm:$0xff] %vm425_vm0, %v395_v50  ;;  %v3007_v63 = vunpack.c.h.bf16 %v3179_v45  ;;  %v3754_v8 = vpack.i.bf16 %v2999_v56, %v2998_v55  ;;  %v3022_v34 = vunpack.c.l.bf16 %v3183_v17 }
  0xe2   : > { %2309 = vst.msk [vmem:[%s3914_s23 + $0x2d0] sm:$0xff] %vm2218_vm1, %v3432_v11  ;;  %2310 = vst.msk [vmem:[%s3914_s23 + $0x2d8] sm:$0xff] %vm2218_vm1, %v3433_v10  ;;  %v3182_v10 = vld [vmem:[%s3882_s15 + $0x398] sm:$0xff]   ;;  %v3181_v11 = vld [vmem:[%s3882_s15 + $0x390] sm:$0xff]  }
  0xe3   : > { %2307 = vst.msk [vmem:[%s3914_s23 + $0x2c0] sm:$0xff] %vm2218_vm1, %v3427_v13  ;;  %2308 = vst.msk [vmem:[%s3914_s23 + $0x2c8] sm:$0xff] %vm2218_vm1, %v3428_v12  ;;  %v3441_v22 = vpop.permute.xlu1 %3440  ;;  %v3436_v23 = vpop.permute.xlu0 %3435  ;;  %v3764_v15 = vpack.i.bf16 %v3007_v63, %v3006_v62  ;;  %v3184_v16 = vld [vmem:[%s3882_s15 + $0x3a8] sm:$0xff]   ;;  %v3018_v25 = vunpack.c.l.bf16 %v3182_v10  ;;  %v3019_v26 = vunpack.c.h.bf16 %v3182_v10  ;;  %v3014_v27 = vunpack.c.l.bf16 %v3181_v11  ;;  %v409_v60 = vld [vmem:[%s3906_s20 + $0x780] sm:$0xff] }
  0xe4   : > { %v3443_v28 = vunpack.i.h.bf16 %v3441_v22  ;;  %v3442_v29 = vunpack.i.l.bf16 %v3441_v22  ;;  %v3438_v30 = vunpack.i.h.bf16 %v3436_v23  ;;  %v3437_v31 = vunpack.i.l.bf16 %v3436_v23  ;;  %653 = vst.msk [vmem:[%s3914_s23 + $0x718] sm:$0xff] %vm425_vm0, %v396_v51  ;;  %650 = vst.msk [vmem:[%s3914_s23 + $0x700] sm:$0xff] %vm425_vm0, %v393_v52  ;;  %v403_v22 = vld [vmem:[%s3906_s20 + $0x750] sm:$0xff]  ;;  %v404_v23 = vld [vmem:[%s3906_s20 + $0x758] sm:$0xff] }
  0xe5   : > { %3730 = vrot.lane.b32.xlu1 %v3729_v6, %s3852_s16  ;;  %3725 = vrot.lane.b32.xlu0 %v3724_v7, %s3852_s16  ;;  %651 = vst.msk [vmem:[%s3914_s23 + $0x708] sm:$0xff] %vm425_vm0, %v394_v57  ;;  %v397_v6 = vld [vmem:[%s3906_s20 + $0x720] sm:$0xff]  ;;  %v3759_v7 = vpack.i.bf16 %v3003_v54, %v3002_v53  ;;  %v3026_v32 = vunpack.c.l.bf16 %v3184_v16  ;;  %v3027_v33 = vunpack.c.h.bf16 %v3184_v16 }
  0xe6   : > { %2313 = vst.msk [vmem:[%s3914_s23 + $0x2f0] sm:$0xff] %vm2218_vm1, %v3442_v29  ;;  %2314 = vst.msk [vmem:[%s3914_s23 + $0x2f8] sm:$0xff] %vm2218_vm1, %v3443_v28  ;;  %v3015_v28 = vunpack.c.h.bf16 %v3181_v11  ;;  %v402_v29 = vld [vmem:[%s3906_s20 + $0x748] sm:$0xff]  ;;  %v3187_v53 = vld [vmem:[%s3882_s15 + $0x3c0] sm:$0xff]  }
  0xe7   : > { %2311 = vst.msk [vmem:[%s3914_s23 + $0x2e0] sm:$0xff] %vm2218_vm1, %v3437_v31  ;;  %2312 = vst.msk [vmem:[%s3914_s23 + $0x2e8] sm:$0xff] %vm2218_vm1, %v3438_v30  ;;  %v3451_v40 = vpop.permute.xlu1 %3450  ;;  %v3446_v41 = vpop.permute.xlu0 %3445  ;;  %v406_v45 = vld [vmem:[%s3906_s20 + $0x768] sm:$0xff]  ;;  %v3789_v50 = vpack.i.bf16 %v3027_v33, %v3026_v32  ;;  %v417_v32 = vld [vmem:[%s3906_s20 + $0x7c0] sm:$0xff] }
  0xe8   : > { %v3453_v46 = vunpack.i.h.bf16 %v3451_v40  ;;  %v3452_v47 = vunpack.i.l.bf16 %v3451_v40  ;;  %v3448_v48 = vunpack.i.h.bf16 %v3446_v41  ;;  %v3447_v49 = vunpack.i.l.bf16 %v3446_v41  ;;  %656 = vst.msk [vmem:[%s3914_s23 + $0x730] sm:$0xff] %vm425_vm0, %v399_v4  ;;  %657 = vst.msk [vmem:[%s3914_s23 + $0x738] sm:$0xff] %vm425_vm0, %v400_v5  ;;  %v407_v40 = vld [vmem:[%s3906_s20 + $0x770] sm:$0xff]  ;;  %v408_v41 = vld [vmem:[%s3906_s20 + $0x778] sm:$0xff] }
  0xe9   : > { %3740 = vrot.lane.b32.xlu1 %v3739_v35, %s3852_s16  ;;  %3735 = vrot.lane.b32.xlu0 %v3734_v36, %s3852_s16  ;;  %654 = vst.msk [vmem:[%s3914_s23 + $0x720] sm:$0xff] %vm425_vm0, %v397_v6  ;;  %655 = vst.msk [vmem:[%s3914_s23 + $0x728] sm:$0xff] %vm425_vm0, %v398_v9  ;;  %v3023_v35 = vunpack.c.h.bf16 %v3183_v17  ;;  %v3774_v44 = vpack.i.bf16 %v3015_v28, %v3014_v27  ;;  %v3038_v6 = vunpack.c.l.bf16 %v3187_v53 }
  0xea   : > { %2317 = vst.msk [vmem:[%s3914_s23 + $0x310] sm:$0xff] %vm2218_vm1, %v3452_v47  ;;  %2318 = vst.msk [vmem:[%s3914_s23 + $0x318] sm:$0xff] %vm2218_vm1, %v3453_v46  ;;  %v3186_v46 = vld [vmem:[%s3882_s15 + $0x3b8] sm:$0xff]   ;;  %v3185_v47 = vld [vmem:[%s3882_s15 + $0x3b0] sm:$0xff]  }
  0xeb   : > { %2315 = vst.msk [vmem:[%s3914_s23 + $0x300] sm:$0xff] %vm2218_vm1, %v3447_v49  ;;  %2316 = vst.msk [vmem:[%s3914_s23 + $0x308] sm:$0xff] %vm2218_vm1, %v3448_v48  ;;  %v3461_v58 = vpop.permute.xlu1 %3460  ;;  %v3456_v59 = vpop.permute.xlu0 %3455  ;;  %v3784_v51 = vpack.i.bf16 %v3023_v35, %v3022_v34  ;;  %v3188_v52 = vld [vmem:[%s3882_s15 + $0x3c8] sm:$0xff]   ;;  %v3034_v61 = vunpack.c.l.bf16 %v3186_v46  ;;  %v3035_v62 = vunpack.c.h.bf16 %v3186_v46  ;;  %v3030_v63 = vunpack.c.l.bf16 %v3185_v47 }
  0xec   : > { %v3463_v0 = vunpack.i.h.bf16 %v3461_v58  ;;  %v3462_v1 = vunpack.i.l.bf16 %v3461_v58  ;;  %v3458_v2 = vunpack.i.h.bf16 %v3456_v59  ;;  %v3457_v3 = vunpack.i.l.bf16 %v3456_v59  ;;  %660 = vst.msk [vmem:[%s3914_s23 + $0x750] sm:$0xff] %vm425_vm0, %v403_v22  ;;  %661 = vst.msk [vmem:[%s3914_s23 + $0x758] sm:$0xff] %vm425_vm0, %v404_v23  ;;  %v411_v58 = vld [vmem:[%s3906_s20 + $0x790] sm:$0xff]  ;;  %v412_v59 = vld [vmem:[%s3906_s20 + $0x798] sm:$0xff] }
  0xed   : > { %3750 = vrot.lane.b32.xlu1 %v3749_v42, %s3852_s16  ;;  %3745 = vrot.lane.b32.xlu0 %v3744_v43, %s3852_s16  ;;  %658 = vst.msk [vmem:[%s3914_s23 + $0x740] sm:$0xff] %vm425_vm0, %v401_v24  ;;  %659 = vst.msk [vmem:[%s3914_s23 + $0x748] sm:$0xff] %vm425_vm0, %v402_v29  ;;  %v3779_v43 = vpack.i.bf16 %v3019_v26, %v3018_v25  ;;  %v3042_v4 = vunpack.c.l.bf16 %v3188_v52  ;;  %v3043_v5 = vunpack.c.h.bf16 %v3188_v52 }
  0xee   : > { %2321 = vst.msk [vmem:[%s3914_s23 + $0x330] sm:$0xff] %vm2218_vm1, %v3462_v1  ;;  %2322 = vst.msk [vmem:[%s3914_s23 + $0x338] sm:$0xff] %vm2218_vm1, %v3463_v0  ;;  %v405_v42 = vld [vmem:[%s3906_s20 + $0x760] sm:$0xff]  ;;  %v3031_v0 = vunpack.c.h.bf16 %v3185_v47  ;;  %v410_v1 = vld [vmem:[%s3906_s20 + $0x788] sm:$0xff] }
  0xef   : > { %2319 = vst.msk [vmem:[%s3914_s23 + $0x320] sm:$0xff] %vm2218_vm1, %v3457_v3  ;;  %2320 = vst.msk [vmem:[%s3914_s23 + $0x328] sm:$0xff] %vm2218_vm1, %v3458_v2  ;;  %v3471_v12 = vpop.permute.xlu1 %3470  ;;  %v3466_v13 = vpop.permute.xlu0 %3465  ;;  %v414_v17 = vld [vmem:[%s3906_s20 + $0x7a8] sm:$0xff]  ;;  %v3809_v22 = vpack.i.bf16 %v3043_v5, %v3042_v4  ;;  %v3191_v25 = vld [vmem:[%s3882_s15 + $0x3e0] sm:$0xff]  }
  0xf0   : > { %v3473_v18 = vunpack.i.h.bf16 %v3471_v12  ;;  %v3472_v19 = vunpack.i.l.bf16 %v3471_v12  ;;  %v3468_v20 = vunpack.i.h.bf16 %v3466_v13  ;;  %v3467_v21 = vunpack.i.l.bf16 %v3466_v13  ;;  %664 = vst.msk [vmem:[%s3914_s23 + $0x770] sm:$0xff] %vm425_vm0, %v407_v40  ;;  %665 = vst.msk [vmem:[%s3914_s23 + $0x778] sm:$0xff] %vm425_vm0, %v408_v41  ;;  %v415_v12 = vld [vmem:[%s3906_s20 + $0x7b0] sm:$0xff]  ;;  %v416_v13 = vld [vmem:[%s3906_s20 + $0x7b8] sm:$0xff] }
  0xf1   : > { %3760 = vrot.lane.b32.xlu1 %v3759_v7, %s3852_s16  ;;  %3755 = vrot.lane.b32.xlu0 %v3754_v8, %s3852_s16  ;;  %662 = vst.msk [vmem:[%s3914_s23 + $0x760] sm:$0xff] %vm425_vm0, %v405_v42  ;;  %663 = vst.msk [vmem:[%s3914_s23 + $0x768] sm:$0xff] %vm425_vm0, %v406_v45  ;;  %v3039_v7 = vunpack.c.h.bf16 %v3187_v53  ;;  %v3794_v16 = vpack.i.bf16 %v3031_v0, %v3030_v63  ;;  %v3054_v42 = vunpack.c.l.bf16 %v3191_v25 }
  0xf2   : > { %2325 = vst.msk [vmem:[%s3914_s23 + $0x350] sm:$0xff] %vm2218_vm1, %v3472_v19  ;;  %2326 = vst.msk [vmem:[%s3914_s23 + $0x358] sm:$0xff] %vm2218_vm1, %v3473_v18  ;;  %v3190_v18 = vld [vmem:[%s3882_s15 + $0x3d8] sm:$0xff]   ;;  %v3189_v19 = vld [vmem:[%s3882_s15 + $0x3d0] sm:$0xff]  }
  0xf3   : > { %2323 = vst.msk [vmem:[%s3914_s23 + $0x340] sm:$0xff] %vm2218_vm1, %v3467_v21  ;;  %2324 = vst.msk [vmem:[%s3914_s23 + $0x348] sm:$0xff] %vm2218_vm1, %v3468_v20  ;;  %v3481_v30 = vpop.permute.xlu1 %3480  ;;  %v3476_v31 = vpop.permute.xlu0 %3475  ;;  %v3804_v23 = vpack.i.bf16 %v3039_v7, %v3038_v6  ;;  %v3192_v24 = vld [vmem:[%s3882_s15 + $0x3e8] sm:$0xff]   ;;  %v3050_v33 = vunpack.c.l.bf16 %v3190_v18  ;;  %v3051_v34 = vunpack.c.h.bf16 %v3190_v18  ;;  %v3046_v35 = vunpack.c.l.bf16 %v3189_v19 }
  0xf4   : > { %v3483_v36 = vunpack.i.h.bf16 %v3481_v30  ;;  %v3482_v37 = vunpack.i.l.bf16 %v3481_v30  ;;  %v3478_v38 = vunpack.i.h.bf16 %v3476_v31  ;;  %v3477_v39 = vunpack.i.l.bf16 %v3476_v31  ;;  %668 = vst.msk [vmem:[%s3914_s23 + $0x790] sm:$0xff] %vm425_vm0, %v411_v58  ;;  %669 = vst.msk [vmem:[%s3914_s23 + $0x798] sm:$0xff] %vm425_vm0, %v412_v59  ;;  %v419_v30 = vld [vmem:[%s3906_s20 + $0x7d0] sm:$0xff]  ;;  %v420_v31 = vld [vmem:[%s3906_s20 + $0x7d8] sm:$0xff] }
  0xf5   : > { %3770 = vrot.lane.b32.xlu1 %v3769_v14, %s3852_s16  ;;  %3765 = vrot.lane.b32.xlu0 %v3764_v15, %s3852_s16  ;;  %666 = vst.msk [vmem:[%s3914_s23 + $0x780] sm:$0xff] %vm425_vm0, %v409_v60  ;;  %667 = vst.msk [vmem:[%s3914_s23 + $0x788] sm:$0xff] %vm425_vm0, %v410_v1  ;;  %v3799_v15 = vpack.i.bf16 %v3035_v62, %v3034_v61  ;;  %v3058_v40 = vunpack.c.l.bf16 %v3192_v24  ;;  %v3059_v41 = vunpack.c.h.bf16 %v3192_v24 }
  0xf6   : > { %2329 = vst.msk [vmem:[%s3914_s23 + $0x370] sm:$0xff] %vm2218_vm1, %v3482_v37  ;;  %2330 = vst.msk [vmem:[%s3914_s23 + $0x378] sm:$0xff] %vm2218_vm1, %v3483_v36  ;;  %v413_v14 = vld [vmem:[%s3906_s20 + $0x7a0] sm:$0xff]  ;;  %v3047_v36 = vunpack.c.h.bf16 %v3189_v19  ;;  %v418_v37 = vld [vmem:[%s3906_s20 + $0x7c8] sm:$0xff] }
  0xf7   : > { %2327 = vst.msk [vmem:[%s3914_s23 + $0x360] sm:$0xff] %vm2218_vm1, %v3477_v39  ;;  %2328 = vst.msk [vmem:[%s3914_s23 + $0x368] sm:$0xff] %vm2218_vm1, %v3478_v38  ;;  %v3491_v48 = vpop.permute.xlu1 %3490  ;;  %v3486_v49 = vpop.permute.xlu0 %3485  ;;  %v422_v53 = vld [vmem:[%s3906_s20 + $0x7e8] sm:$0xff]  ;;  %v3829_v58 = vpack.i.bf16 %v3059_v41, %v3058_v40 }
  0xf8   : > { %v3493_v54 = vunpack.i.h.bf16 %v3491_v48  ;;  %v3492_v55 = vunpack.i.l.bf16 %v3491_v48  ;;  %v3488_v56 = vunpack.i.h.bf16 %v3486_v49  ;;  %v3487_v57 = vunpack.i.l.bf16 %v3486_v49  ;;  %672 = vst.msk [vmem:[%s3914_s23 + $0x7b0] sm:$0xff] %vm425_vm0, %v415_v12  ;;  %673 = vst.msk [vmem:[%s3914_s23 + $0x7b8] sm:$0xff] %vm425_vm0, %v416_v13  ;;  %v423_v48 = vld [vmem:[%s3906_s20 + $0x7f0] sm:$0xff]  ;;  %v424_v49 = vld [vmem:[%s3906_s20 + $0x7f8] sm:$0xff] }
  0xf9   : > { %3780 = vrot.lane.b32.xlu1 %v3779_v43, %s3852_s16  ;;  %3775 = vrot.lane.b32.xlu0 %v3774_v44, %s3852_s16  ;;  %670 = vst.msk [vmem:[%s3914_s23 + $0x7a0] sm:$0xff] %vm425_vm0, %v413_v14  ;;  %671 = vst.msk [vmem:[%s3914_s23 + $0x7a8] sm:$0xff] %vm425_vm0, %v414_v17  ;;  %v3055_v43 = vunpack.c.h.bf16 %v3191_v25  ;;  %v3814_v52 = vpack.i.bf16 %v3047_v36, %v3046_v35 }
  0xfa   : > { %2333 = vst.msk [vmem:[%s3914_s23 + $0x390] sm:$0xff] %vm2218_vm1, %v3492_v55  ;;  %2334 = vst.msk [vmem:[%s3914_s23 + $0x398] sm:$0xff] %vm2218_vm1, %v3493_v54  ;;  %v3194_v54 = vld [vmem:[%s3882_s15 + $0x3f8] sm:$0xff]   ;;  %v3193_v55 = vld [vmem:[%s3882_s15 + $0x3f0] sm:$0xff]  }
  0xfb   : > { %2331 = vst.msk [vmem:[%s3914_s23 + $0x380] sm:$0xff] %vm2218_vm1, %v3487_v57  ;;  %2332 = vst.msk [vmem:[%s3914_s23 + $0x388] sm:$0xff] %vm2218_vm1, %v3488_v56  ;;  %v3501_v2 = vpop.permute.xlu1 %3500  ;;  %v3496_v3 = vpop.permute.xlu0 %3495  ;;  %v3824_v59 = vpack.i.bf16 %v3055_v43, %v3054_v42  ;;  %v3066_v0 = vunpack.c.l.bf16 %v3194_v54  ;;  %v3067_v1 = vunpack.c.h.bf16 %v3194_v54 }
  0xfc   : > { %v3503_v8 = vunpack.i.h.bf16 %v3501_v2  ;;  %v3502_v9 = vunpack.i.l.bf16 %v3501_v2  ;;  %v3498_v10 = vunpack.i.h.bf16 %v3496_v3  ;;  %v3497_v11 = vunpack.i.l.bf16 %v3496_v3  ;;  %676 = vst.msk [vmem:[%s3914_s23 + $0x7d0] sm:$0xff] %vm425_vm0, %v419_v30  ;;  %677 = vst.msk [vmem:[%s3914_s23 + $0x7d8] sm:$0xff] %vm425_vm0, %v420_v31 }
  0xfd   : > { %3790 = vrot.lane.b32.xlu1 %v3789_v50, %s3852_s16  ;;  %3785 = vrot.lane.b32.xlu0 %v3784_v51, %s3852_s16  ;;  %674 = vst.msk [vmem:[%s3914_s23 + $0x7c0] sm:$0xff] %vm425_vm0, %v417_v32  ;;  %675 = vst.msk [vmem:[%s3914_s23 + $0x7c8] sm:$0xff] %vm425_vm0, %v418_v37  ;;  %v3819_v51 = vpack.i.bf16 %v3051_v34, %v3050_v33  ;;  %v3062_v2 = vunpack.c.l.bf16 %v3193_v55  ;;  %v3063_v3 = vunpack.c.h.bf16 %v3193_v55 }
  0xfe   : > { %2337 = vst.msk [vmem:[%s3914_s23 + $0x3b0] sm:$0xff] %vm2218_vm1, %v3502_v9  ;;  %2338 = vst.msk [vmem:[%s3914_s23 + $0x3b8] sm:$0xff] %vm2218_vm1, %v3503_v8  ;;  %v421_v50 = vld [vmem:[%s3906_s20 + $0x7e0] sm:$0xff] }
  0xff   : > { %2335 = vst.msk [vmem:[%s3914_s23 + $0x3a0] sm:$0xff] %vm2218_vm1, %v3497_v11  ;;  %2336 = vst.msk [vmem:[%s3914_s23 + $0x3a8] sm:$0xff] %vm2218_vm1, %v3498_v10  ;;  %v3511_v20 = vpop.permute.xlu1 %3510  ;;  %v3506_v21 = vpop.permute.xlu0 %3505  ;;  %v3839_v10 = vpack.i.bf16 %v3067_v1, %v3066_v0  ;;  %v3834_v11 = vpack.i.bf16 %v3063_v3, %v3062_v2 }
 0x100   : > { %v3513_v26 = vunpack.i.h.bf16 %v3511_v20  ;;  %v3512_v27 = vunpack.i.l.bf16 %v3511_v20  ;;  %v3508_v28 = vunpack.i.h.bf16 %v3506_v21  ;;  %v3507_v29 = vunpack.i.l.bf16 %v3506_v21  ;;  %680 = vst.msk [vmem:[%s3914_s23 + $0x7f0] sm:$0xff] %vm425_vm0, %v423_v48  ;;  %681 = vst.msk [vmem:[%s3914_s23 + $0x7f8] sm:$0xff] %vm425_vm0, %v424_v49 }
 0x101   : > { %3800 = vrot.lane.b32.xlu1 %v3799_v15, %s3852_s16  ;;  %3795 = vrot.lane.b32.xlu0 %v3794_v16, %s3852_s16  ;;  %678 = vst.msk [vmem:[%s3914_s23 + $0x7e0] sm:$0xff] %vm425_vm0, %v421_v50  ;;  %679 = vst.msk [vmem:[%s3914_s23 + $0x7e8] sm:$0xff] %vm425_vm0, %v422_v53 }
 0x102   : > { %2341 = vst.msk [vmem:[%s3914_s23 + $0x3d0] sm:$0xff] %vm2218_vm1, %v3512_v27  ;;  %2342 = vst.msk [vmem:[%s3914_s23 + $0x3d8] sm:$0xff] %vm2218_vm1, %v3513_v26 }
 0x103   : > { %2339 = vst.msk [vmem:[%s3914_s23 + $0x3c0] sm:$0xff] %vm2218_vm1, %v3507_v29  ;;  %2340 = vst.msk [vmem:[%s3914_s23 + $0x3c8] sm:$0xff] %vm2218_vm1, %v3508_v28  ;;  %v3521_v38 = vpop.permute.xlu1 %3520  ;;  %v3516_v39 = vpop.permute.xlu0 %3515 }
 0x104   : > { %v3523_v44 = vunpack.i.h.bf16 %v3521_v38  ;;  %v3522_v45 = vunpack.i.l.bf16 %v3521_v38  ;;  %v3518_v46 = vunpack.i.h.bf16 %v3516_v39  ;;  %v3517_v47 = vunpack.i.l.bf16 %v3516_v39 }
 0x105   : > { %3810 = vrot.lane.b32.xlu1 %v3809_v22, %s3852_s16  ;;  %3805 = vrot.lane.b32.xlu0 %v3804_v23, %s3852_s16 }
 0x106   : > { %2345 = vst.msk [vmem:[%s3914_s23 + $0x3f0] sm:$0xff] %vm2218_vm1, %v3522_v45  ;;  %2346 = vst.msk [vmem:[%s3914_s23 + $0x3f8] sm:$0xff] %vm2218_vm1, %v3523_v44 }
 0x107   : > { %2343 = vst.msk [vmem:[%s3914_s23 + $0x3e0] sm:$0xff] %vm2218_vm1, %v3517_v47  ;;  %2344 = vst.msk [vmem:[%s3914_s23 + $0x3e8] sm:$0xff] %vm2218_vm1, %v3518_v46  ;;  %v3531_v56 = vpop.permute.xlu1 %3530  ;;  %v3526_v57 = vpop.permute.xlu0 %3525 }
 0x108   : > { %v3533_v60 = vunpack.i.h.bf16 %v3531_v56  ;;  %v3532_v61 = vunpack.i.l.bf16 %v3531_v56  ;;  %v3528_v62 = vunpack.i.h.bf16 %v3526_v57  ;;  %v3527_v63 = vunpack.i.l.bf16 %v3526_v57 }
 0x109   : > { %3820 = vrot.lane.b32.xlu1 %v3819_v51, %s3852_s16  ;;  %3815 = vrot.lane.b32.xlu0 %v3814_v52, %s3852_s16 }
 0x10a   : > { %2349 = vst.msk [vmem:[%s3914_s23 + $0x410] sm:$0xff] %vm2218_vm1, %v3532_v61  ;;  %2350 = vst.msk [vmem:[%s3914_s23 + $0x418] sm:$0xff] %vm2218_vm1, %v3533_v60 }
 0x10b   : > { %2347 = vst.msk [vmem:[%s3914_s23 + $0x400] sm:$0xff] %vm2218_vm1, %v3527_v63  ;;  %2348 = vst.msk [vmem:[%s3914_s23 + $0x408] sm:$0xff] %vm2218_vm1, %v3528_v62  ;;  %v3541_v4 = vpop.permute.xlu1 %3540  ;;  %v3536_v5 = vpop.permute.xlu0 %3535 }
 0x10c   : > { %v3543_v6 = vunpack.i.h.bf16 %v3541_v4  ;;  %v3542_v7 = vunpack.i.l.bf16 %v3541_v4  ;;  %v3538_v8 = vunpack.i.h.bf16 %v3536_v5  ;;  %v3537_v9 = vunpack.i.l.bf16 %v3536_v5 }
 0x10d   : > { %3830 = vrot.lane.b32.xlu1 %v3829_v58, %s3852_s16  ;;  %3825 = vrot.lane.b32.xlu0 %v3824_v59, %s3852_s16 }
 0x10e   : > { %2353 = vst.msk [vmem:[%s3914_s23 + $0x430] sm:$0xff] %vm2218_vm1, %v3542_v7  ;;  %2354 = vst.msk [vmem:[%s3914_s23 + $0x438] sm:$0xff] %vm2218_vm1, %v3543_v6 }
 0x10f   : > { %2351 = vst.msk [vmem:[%s3914_s23 + $0x420] sm:$0xff] %vm2218_vm1, %v3537_v9  ;;  %2352 = vst.msk [vmem:[%s3914_s23 + $0x428] sm:$0xff] %vm2218_vm1, %v3538_v8  ;;  %v3551_v12 = vpop.permute.xlu1 %3550  ;;  %v3546_v13 = vpop.permute.xlu0 %3545 }
 0x110   : > { %v3553_v14 = vunpack.i.h.bf16 %v3551_v12  ;;  %v3552_v15 = vunpack.i.l.bf16 %v3551_v12  ;;  %v3548_v16 = vunpack.i.h.bf16 %v3546_v13  ;;  %v3547_v17 = vunpack.i.l.bf16 %v3546_v13 }
 0x111   : > { %3840 = vrot.lane.b32.xlu1 %v3839_v10, %s3852_s16  ;;  %3835 = vrot.lane.b32.xlu0 %v3834_v11, %s3852_s16 }
 0x112   : > { %2357 = vst.msk [vmem:[%s3914_s23 + $0x450] sm:$0xff] %vm2218_vm1, %v3552_v15  ;;  %2358 = vst.msk [vmem:[%s3914_s23 + $0x458] sm:$0xff] %vm2218_vm1, %v3553_v14 }
 0x113   : > { %2355 = vst.msk [vmem:[%s3914_s23 + $0x440] sm:$0xff] %vm2218_vm1, %v3547_v17  ;;  %2356 = vst.msk [vmem:[%s3914_s23 + $0x448] sm:$0xff] %vm2218_vm1, %v3548_v16  ;;  %v3561_v18 = vpop.permute.xlu1 %3560  ;;  %v3556_v19 = vpop.permute.xlu0 %3555 }
 0x114   : > { %v3563_v20 = vunpack.i.h.bf16 %v3561_v18  ;;  %v3562_v21 = vunpack.i.l.bf16 %v3561_v18  ;;  %v3558_v22 = vunpack.i.h.bf16 %v3556_v19  ;;  %v3557_v23 = vunpack.i.l.bf16 %v3556_v19 }
 0x116   : > { %2361 = vst.msk [vmem:[%s3914_s23 + $0x470] sm:$0xff] %vm2218_vm1, %v3562_v21  ;;  %2362 = vst.msk [vmem:[%s3914_s23 + $0x478] sm:$0xff] %vm2218_vm1, %v3563_v20 }
 0x117   : > { %2359 = vst.msk [vmem:[%s3914_s23 + $0x460] sm:$0xff] %vm2218_vm1, %v3557_v23  ;;  %2360 = vst.msk [vmem:[%s3914_s23 + $0x468] sm:$0xff] %vm2218_vm1, %v3558_v22  ;;  %v3571_v24 = vpop.permute.xlu1 %3570  ;;  %v3566_v25 = vpop.permute.xlu0 %3565 }
 0x118   : > { %v3573_v26 = vunpack.i.h.bf16 %v3571_v24  ;;  %v3572_v27 = vunpack.i.l.bf16 %v3571_v24  ;;  %v3568_v28 = vunpack.i.h.bf16 %v3566_v25  ;;  %v3567_v29 = vunpack.i.l.bf16 %v3566_v25 }
 0x11a   : > { %2365 = vst.msk [vmem:[%s3914_s23 + $0x490] sm:$0xff] %vm2218_vm1, %v3572_v27  ;;  %2366 = vst.msk [vmem:[%s3914_s23 + $0x498] sm:$0xff] %vm2218_vm1, %v3573_v26 }
 0x11b   : > { %2363 = vst.msk [vmem:[%s3914_s23 + $0x480] sm:$0xff] %vm2218_vm1, %v3567_v29  ;;  %2364 = vst.msk [vmem:[%s3914_s23 + $0x488] sm:$0xff] %vm2218_vm1, %v3568_v28  ;;  %v3581_v30 = vpop.permute.xlu1 %3580  ;;  %v3576_v31 = vpop.permute.xlu0 %3575 }
 0x11c   : > { %v3583_v32 = vunpack.i.h.bf16 %v3581_v30  ;;  %v3582_v33 = vunpack.i.l.bf16 %v3581_v30  ;;  %v3578_v34 = vunpack.i.h.bf16 %v3576_v31  ;;  %v3577_v35 = vunpack.i.l.bf16 %v3576_v31 }
 0x11e   : > { %2369 = vst.msk [vmem:[%s3914_s23 + $0x4b0] sm:$0xff] %vm2218_vm1, %v3582_v33  ;;  %2370 = vst.msk [vmem:[%s3914_s23 + $0x4b8] sm:$0xff] %vm2218_vm1, %v3583_v32 }
 0x11f   : > { %2367 = vst.msk [vmem:[%s3914_s23 + $0x4a0] sm:$0xff] %vm2218_vm1, %v3577_v35  ;;  %2368 = vst.msk [vmem:[%s3914_s23 + $0x4a8] sm:$0xff] %vm2218_vm1, %v3578_v34  ;;  %v3591_v36 = vpop.permute.xlu1 %3590  ;;  %v3586_v37 = vpop.permute.xlu0 %3585 }
 0x120   : > { %v3593_v38 = vunpack.i.h.bf16 %v3591_v36  ;;  %v3592_v39 = vunpack.i.l.bf16 %v3591_v36  ;;  %v3588_v40 = vunpack.i.h.bf16 %v3586_v37  ;;  %v3587_v41 = vunpack.i.l.bf16 %v3586_v37 }
 0x122   : > { %2373 = vst.msk [vmem:[%s3914_s23 + $0x4d0] sm:$0xff] %vm2218_vm1, %v3592_v39  ;;  %2374 = vst.msk [vmem:[%s3914_s23 + $0x4d8] sm:$0xff] %vm2218_vm1, %v3593_v38 }
 0x123   : > { %2371 = vst.msk [vmem:[%s3914_s23 + $0x4c0] sm:$0xff] %vm2218_vm1, %v3587_v41  ;;  %2372 = vst.msk [vmem:[%s3914_s23 + $0x4c8] sm:$0xff] %vm2218_vm1, %v3588_v40  ;;  %v3601_v42 = vpop.permute.xlu1 %3600  ;;  %v3596_v43 = vpop.permute.xlu0 %3595 }
 0x124   : > { %v3603_v44 = vunpack.i.h.bf16 %v3601_v42  ;;  %v3602_v45 = vunpack.i.l.bf16 %v3601_v42  ;;  %v3598_v46 = vunpack.i.h.bf16 %v3596_v43  ;;  %v3597_v47 = vunpack.i.l.bf16 %v3596_v43 }
 0x126   : > { %2377 = vst.msk [vmem:[%s3914_s23 + $0x4f0] sm:$0xff] %vm2218_vm1, %v3602_v45  ;;  %2378 = vst.msk [vmem:[%s3914_s23 + $0x4f8] sm:$0xff] %vm2218_vm1, %v3603_v44 }
 0x127   : > { %2375 = vst.msk [vmem:[%s3914_s23 + $0x4e0] sm:$0xff] %vm2218_vm1, %v3597_v47  ;;  %2376 = vst.msk [vmem:[%s3914_s23 + $0x4e8] sm:$0xff] %vm2218_vm1, %v3598_v46  ;;  %v3611_v48 = vpop.permute.xlu1 %3610  ;;  %v3606_v49 = vpop.permute.xlu0 %3605 }
 0x128   : > { %v3613_v50 = vunpack.i.h.bf16 %v3611_v48  ;;  %v3612_v51 = vunpack.i.l.bf16 %v3611_v48  ;;  %v3608_v52 = vunpack.i.h.bf16 %v3606_v49  ;;  %v3607_v53 = vunpack.i.l.bf16 %v3606_v49 }
 0x12a   : > { %2381 = vst.msk [vmem:[%s3914_s23 + $0x510] sm:$0xff] %vm2218_vm1, %v3612_v51  ;;  %2382 = vst.msk [vmem:[%s3914_s23 + $0x518] sm:$0xff] %vm2218_vm1, %v3613_v50 }
 0x12b   : > { %2379 = vst.msk [vmem:[%s3914_s23 + $0x500] sm:$0xff] %vm2218_vm1, %v3607_v53  ;;  %2380 = vst.msk [vmem:[%s3914_s23 + $0x508] sm:$0xff] %vm2218_vm1, %v3608_v52  ;;  %v3621_v54 = vpop.permute.xlu1 %3620  ;;  %v3616_v55 = vpop.permute.xlu0 %3615 }
 0x12c   : > { %v3623_v56 = vunpack.i.h.bf16 %v3621_v54  ;;  %v3622_v57 = vunpack.i.l.bf16 %v3621_v54  ;;  %v3618_v58 = vunpack.i.h.bf16 %v3616_v55  ;;  %v3617_v59 = vunpack.i.l.bf16 %v3616_v55 }
 0x12e   : > { %2385 = vst.msk [vmem:[%s3914_s23 + $0x530] sm:$0xff] %vm2218_vm1, %v3622_v57  ;;  %2386 = vst.msk [vmem:[%s3914_s23 + $0x538] sm:$0xff] %vm2218_vm1, %v3623_v56 }
 0x12f   : > { %2383 = vst.msk [vmem:[%s3914_s23 + $0x520] sm:$0xff] %vm2218_vm1, %v3617_v59  ;;  %2384 = vst.msk [vmem:[%s3914_s23 + $0x528] sm:$0xff] %vm2218_vm1, %v3618_v58  ;;  %v3631_v60 = vpop.permute.xlu1 %3630  ;;  %v3626_v61 = vpop.permute.xlu0 %3625 }
 0x130   : > { %v3633_v62 = vunpack.i.h.bf16 %v3631_v60  ;;  %v3632_v63 = vunpack.i.l.bf16 %v3631_v60  ;;  %v3628_v0 = vunpack.i.h.bf16 %v3626_v61  ;;  %v3627_v1 = vunpack.i.l.bf16 %v3626_v61 }
 0x132   : > { %2389 = vst.msk [vmem:[%s3914_s23 + $0x550] sm:$0xff] %vm2218_vm1, %v3632_v63  ;;  %2390 = vst.msk [vmem:[%s3914_s23 + $0x558] sm:$0xff] %vm2218_vm1, %v3633_v62 }
 0x133   : > { %2387 = vst.msk [vmem:[%s3914_s23 + $0x540] sm:$0xff] %vm2218_vm1, %v3627_v1  ;;  %2388 = vst.msk [vmem:[%s3914_s23 + $0x548] sm:$0xff] %vm2218_vm1, %v3628_v0  ;;  %v3641_v2 = vpop.permute.xlu1 %3640  ;;  %v3636_v3 = vpop.permute.xlu0 %3635 }
 0x134   : > { %v3643_v4 = vunpack.i.h.bf16 %v3641_v2  ;;  %v3642_v5 = vunpack.i.l.bf16 %v3641_v2  ;;  %v3638_v6 = vunpack.i.h.bf16 %v3636_v3  ;;  %v3637_v7 = vunpack.i.l.bf16 %v3636_v3 }
 0x136   : > { %2393 = vst.msk [vmem:[%s3914_s23 + $0x570] sm:$0xff] %vm2218_vm1, %v3642_v5  ;;  %2394 = vst.msk [vmem:[%s3914_s23 + $0x578] sm:$0xff] %vm2218_vm1, %v3643_v4 }
 0x137   : > { %2391 = vst.msk [vmem:[%s3914_s23 + $0x560] sm:$0xff] %vm2218_vm1, %v3637_v7  ;;  %2392 = vst.msk [vmem:[%s3914_s23 + $0x568] sm:$0xff] %vm2218_vm1, %v3638_v6  ;;  %v3651_v8 = vpop.permute.xlu1 %3650  ;;  %v3646_v9 = vpop.permute.xlu0 %3645 }
 0x138   : > { %v3653_v10 = vunpack.i.h.bf16 %v3651_v8  ;;  %v3652_v11 = vunpack.i.l.bf16 %v3651_v8  ;;  %v3648_v12 = vunpack.i.h.bf16 %v3646_v9  ;;  %v3647_v13 = vunpack.i.l.bf16 %v3646_v9 }
 0x13a   : > { %2397 = vst.msk [vmem:[%s3914_s23 + $0x590] sm:$0xff] %vm2218_vm1, %v3652_v11  ;;  %2398 = vst.msk [vmem:[%s3914_s23 + $0x598] sm:$0xff] %vm2218_vm1, %v3653_v10 }
 0x13b   : > { %2395 = vst.msk [vmem:[%s3914_s23 + $0x580] sm:$0xff] %vm2218_vm1, %v3647_v13  ;;  %2396 = vst.msk [vmem:[%s3914_s23 + $0x588] sm:$0xff] %vm2218_vm1, %v3648_v12  ;;  %v3661_v14 = vpop.permute.xlu1 %3660  ;;  %v3656_v15 = vpop.permute.xlu0 %3655 }
 0x13c   : > { %v3663_v16 = vunpack.i.h.bf16 %v3661_v14  ;;  %v3662_v17 = vunpack.i.l.bf16 %v3661_v14  ;;  %v3658_v18 = vunpack.i.h.bf16 %v3656_v15  ;;  %v3657_v19 = vunpack.i.l.bf16 %v3656_v15 }
 0x13e   : > { %2401 = vst.msk [vmem:[%s3914_s23 + $0x5b0] sm:$0xff] %vm2218_vm1, %v3662_v17  ;;  %2402 = vst.msk [vmem:[%s3914_s23 + $0x5b8] sm:$0xff] %vm2218_vm1, %v3663_v16 }
 0x13f   : > { %2399 = vst.msk [vmem:[%s3914_s23 + $0x5a0] sm:$0xff] %vm2218_vm1, %v3657_v19  ;;  %2400 = vst.msk [vmem:[%s3914_s23 + $0x5a8] sm:$0xff] %vm2218_vm1, %v3658_v18  ;;  %v3671_v20 = vpop.permute.xlu1 %3670  ;;  %v3666_v21 = vpop.permute.xlu0 %3665 }
 0x140   : > { %v3673_v22 = vunpack.i.h.bf16 %v3671_v20  ;;  %v3672_v23 = vunpack.i.l.bf16 %v3671_v20  ;;  %v3668_v24 = vunpack.i.h.bf16 %v3666_v21  ;;  %v3667_v25 = vunpack.i.l.bf16 %v3666_v21 }
 0x142   : > { %2405 = vst.msk [vmem:[%s3914_s23 + $0x5d0] sm:$0xff] %vm2218_vm1, %v3672_v23  ;;  %2406 = vst.msk [vmem:[%s3914_s23 + $0x5d8] sm:$0xff] %vm2218_vm1, %v3673_v22 }
 0x143   : > { %2403 = vst.msk [vmem:[%s3914_s23 + $0x5c0] sm:$0xff] %vm2218_vm1, %v3667_v25  ;;  %2404 = vst.msk [vmem:[%s3914_s23 + $0x5c8] sm:$0xff] %vm2218_vm1, %v3668_v24  ;;  %v3681_v26 = vpop.permute.xlu1 %3680  ;;  %v3676_v27 = vpop.permute.xlu0 %3675 }
 0x144   : > { %v3683_v28 = vunpack.i.h.bf16 %v3681_v26  ;;  %v3682_v29 = vunpack.i.l.bf16 %v3681_v26  ;;  %v3678_v30 = vunpack.i.h.bf16 %v3676_v27  ;;  %v3677_v31 = vunpack.i.l.bf16 %v3676_v27 }
 0x146   : > { %2409 = vst.msk [vmem:[%s3914_s23 + $0x5f0] sm:$0xff] %vm2218_vm1, %v3682_v29  ;;  %2410 = vst.msk [vmem:[%s3914_s23 + $0x5f8] sm:$0xff] %vm2218_vm1, %v3683_v28 }
 0x147   : > { %2407 = vst.msk [vmem:[%s3914_s23 + $0x5e0] sm:$0xff] %vm2218_vm1, %v3677_v31  ;;  %2408 = vst.msk [vmem:[%s3914_s23 + $0x5e8] sm:$0xff] %vm2218_vm1, %v3678_v30  ;;  %v3691_v32 = vpop.permute.xlu1 %3690  ;;  %v3686_v33 = vpop.permute.xlu0 %3685 }
 0x148   : > { %v3693_v34 = vunpack.i.h.bf16 %v3691_v32  ;;  %v3692_v35 = vunpack.i.l.bf16 %v3691_v32  ;;  %v3688_v36 = vunpack.i.h.bf16 %v3686_v33  ;;  %v3687_v37 = vunpack.i.l.bf16 %v3686_v33 }
 0x14a   : > { %2413 = vst.msk [vmem:[%s3914_s23 + $0x610] sm:$0xff] %vm2218_vm1, %v3692_v35  ;;  %2414 = vst.msk [vmem:[%s3914_s23 + $0x618] sm:$0xff] %vm2218_vm1, %v3693_v34 }
 0x14b   : > { %2411 = vst.msk [vmem:[%s3914_s23 + $0x600] sm:$0xff] %vm2218_vm1, %v3687_v37  ;;  %2412 = vst.msk [vmem:[%s3914_s23 + $0x608] sm:$0xff] %vm2218_vm1, %v3688_v36  ;;  %v3701_v38 = vpop.permute.xlu1 %3700  ;;  %v3696_v39 = vpop.permute.xlu0 %3695 }
 0x14c   : > { %v3703_v40 = vunpack.i.h.bf16 %v3701_v38  ;;  %v3702_v41 = vunpack.i.l.bf16 %v3701_v38  ;;  %v3698_v42 = vunpack.i.h.bf16 %v3696_v39  ;;  %v3697_v43 = vunpack.i.l.bf16 %v3696_v39 }
 0x14e   : > { %2417 = vst.msk [vmem:[%s3914_s23 + $0x630] sm:$0xff] %vm2218_vm1, %v3702_v41  ;;  %2418 = vst.msk [vmem:[%s3914_s23 + $0x638] sm:$0xff] %vm2218_vm1, %v3703_v40 }
 0x14f   : > { %2415 = vst.msk [vmem:[%s3914_s23 + $0x620] sm:$0xff] %vm2218_vm1, %v3697_v43  ;;  %2416 = vst.msk [vmem:[%s3914_s23 + $0x628] sm:$0xff] %vm2218_vm1, %v3698_v42  ;;  %v3711_v44 = vpop.permute.xlu1 %3710  ;;  %v3706_v45 = vpop.permute.xlu0 %3705 }
 0x150   : > { %v3713_v46 = vunpack.i.h.bf16 %v3711_v44  ;;  %v3712_v47 = vunpack.i.l.bf16 %v3711_v44  ;;  %v3708_v48 = vunpack.i.h.bf16 %v3706_v45  ;;  %v3707_v49 = vunpack.i.l.bf16 %v3706_v45 }
 0x152   : > { %2421 = vst.msk [vmem:[%s3914_s23 + $0x650] sm:$0xff] %vm2218_vm1, %v3712_v47  ;;  %2422 = vst.msk [vmem:[%s3914_s23 + $0x658] sm:$0xff] %vm2218_vm1, %v3713_v46 }
 0x153   : > { %2419 = vst.msk [vmem:[%s3914_s23 + $0x640] sm:$0xff] %vm2218_vm1, %v3707_v49  ;;  %2420 = vst.msk [vmem:[%s3914_s23 + $0x648] sm:$0xff] %vm2218_vm1, %v3708_v48  ;;  %v3721_v50 = vpop.permute.xlu1 %3720  ;;  %v3716_v51 = vpop.permute.xlu0 %3715 }
 0x154   : > { %v3723_v52 = vunpack.i.h.bf16 %v3721_v50  ;;  %v3722_v53 = vunpack.i.l.bf16 %v3721_v50  ;;  %v3718_v54 = vunpack.i.h.bf16 %v3716_v51  ;;  %v3717_v55 = vunpack.i.l.bf16 %v3716_v51 }
 0x156   : > { %2425 = vst.msk [vmem:[%s3914_s23 + $0x670] sm:$0xff] %vm2218_vm1, %v3722_v53  ;;  %2426 = vst.msk [vmem:[%s3914_s23 + $0x678] sm:$0xff] %vm2218_vm1, %v3723_v52 }
 0x157   : > { %2423 = vst.msk [vmem:[%s3914_s23 + $0x660] sm:$0xff] %vm2218_vm1, %v3717_v55  ;;  %2424 = vst.msk [vmem:[%s3914_s23 + $0x668] sm:$0xff] %vm2218_vm1, %v3718_v54  ;;  %v3731_v56 = vpop.permute.xlu1 %3730  ;;  %v3726_v57 = vpop.permute.xlu0 %3725 }
 0x158   : > { %v3733_v58 = vunpack.i.h.bf16 %v3731_v56  ;;  %v3732_v59 = vunpack.i.l.bf16 %v3731_v56  ;;  %v3728_v60 = vunpack.i.h.bf16 %v3726_v57  ;;  %v3727_v61 = vunpack.i.l.bf16 %v3726_v57 }
 0x15a   : > { %2429 = vst.msk [vmem:[%s3914_s23 + $0x690] sm:$0xff] %vm2218_vm1, %v3732_v59  ;;  %2430 = vst.msk [vmem:[%s3914_s23 + $0x698] sm:$0xff] %vm2218_vm1, %v3733_v58 }
 0x15b   : > { %2427 = vst.msk [vmem:[%s3914_s23 + $0x680] sm:$0xff] %vm2218_vm1, %v3727_v61  ;;  %2428 = vst.msk [vmem:[%s3914_s23 + $0x688] sm:$0xff] %vm2218_vm1, %v3728_v60  ;;  %v3741_v62 = vpop.permute.xlu1 %3740  ;;  %v3736_v63 = vpop.permute.xlu0 %3735 }
 0x15c   : > { %v3743_v0 = vunpack.i.h.bf16 %v3741_v62  ;;  %v3742_v1 = vunpack.i.l.bf16 %v3741_v62  ;;  %v3738_v2 = vunpack.i.h.bf16 %v3736_v63  ;;  %v3737_v3 = vunpack.i.l.bf16 %v3736_v63 }
 0x15e   : > { %2433 = vst.msk [vmem:[%s3914_s23 + $0x6b0] sm:$0xff] %vm2218_vm1, %v3742_v1  ;;  %2434 = vst.msk [vmem:[%s3914_s23 + $0x6b8] sm:$0xff] %vm2218_vm1, %v3743_v0 }
 0x15f   : > { %2431 = vst.msk [vmem:[%s3914_s23 + $0x6a0] sm:$0xff] %vm2218_vm1, %v3737_v3  ;;  %2432 = vst.msk [vmem:[%s3914_s23 + $0x6a8] sm:$0xff] %vm2218_vm1, %v3738_v2  ;;  %v3751_v4 = vpop.permute.xlu1 %3750  ;;  %v3746_v5 = vpop.permute.xlu0 %3745 }
 0x160   : > { %v3753_v6 = vunpack.i.h.bf16 %v3751_v4  ;;  %v3752_v7 = vunpack.i.l.bf16 %v3751_v4  ;;  %v3748_v8 = vunpack.i.h.bf16 %v3746_v5  ;;  %v3747_v9 = vunpack.i.l.bf16 %v3746_v5 }
 0x162   : > { %2437 = vst.msk [vmem:[%s3914_s23 + $0x6d0] sm:$0xff] %vm2218_vm1, %v3752_v7  ;;  %2438 = vst.msk [vmem:[%s3914_s23 + $0x6d8] sm:$0xff] %vm2218_vm1, %v3753_v6 }
 0x163   : > { %2435 = vst.msk [vmem:[%s3914_s23 + $0x6c0] sm:$0xff] %vm2218_vm1, %v3747_v9  ;;  %2436 = vst.msk [vmem:[%s3914_s23 + $0x6c8] sm:$0xff] %vm2218_vm1, %v3748_v8  ;;  %v3761_v10 = vpop.permute.xlu1 %3760  ;;  %v3756_v11 = vpop.permute.xlu0 %3755 }
 0x164   : > { %v3763_v12 = vunpack.i.h.bf16 %v3761_v10  ;;  %v3762_v13 = vunpack.i.l.bf16 %v3761_v10  ;;  %v3758_v14 = vunpack.i.h.bf16 %v3756_v11  ;;  %v3757_v15 = vunpack.i.l.bf16 %v3756_v11 }
 0x166   : > { %2441 = vst.msk [vmem:[%s3914_s23 + $0x6f0] sm:$0xff] %vm2218_vm1, %v3762_v13  ;;  %2442 = vst.msk [vmem:[%s3914_s23 + $0x6f8] sm:$0xff] %vm2218_vm1, %v3763_v12 }
 0x167   : > { %2439 = vst.msk [vmem:[%s3914_s23 + $0x6e0] sm:$0xff] %vm2218_vm1, %v3757_v15  ;;  %2440 = vst.msk [vmem:[%s3914_s23 + $0x6e8] sm:$0xff] %vm2218_vm1, %v3758_v14  ;;  %v3771_v16 = vpop.permute.xlu1 %3770  ;;  %v3766_v17 = vpop.permute.xlu0 %3765 }
 0x168   : > { %v3773_v18 = vunpack.i.h.bf16 %v3771_v16  ;;  %v3772_v19 = vunpack.i.l.bf16 %v3771_v16  ;;  %v3768_v20 = vunpack.i.h.bf16 %v3766_v17  ;;  %v3767_v21 = vunpack.i.l.bf16 %v3766_v17 }
 0x16a   : > { %2445 = vst.msk [vmem:[%s3914_s23 + $0x710] sm:$0xff] %vm2218_vm1, %v3772_v19  ;;  %2446 = vst.msk [vmem:[%s3914_s23 + $0x718] sm:$0xff] %vm2218_vm1, %v3773_v18 }
 0x16b   : > { %2443 = vst.msk [vmem:[%s3914_s23 + $0x700] sm:$0xff] %vm2218_vm1, %v3767_v21  ;;  %2444 = vst.msk [vmem:[%s3914_s23 + $0x708] sm:$0xff] %vm2218_vm1, %v3768_v20  ;;  %v3781_v22 = vpop.permute.xlu1 %3780  ;;  %v3776_v23 = vpop.permute.xlu0 %3775 }
 0x16c   : > { %v3783_v24 = vunpack.i.h.bf16 %v3781_v22  ;;  %v3782_v25 = vunpack.i.l.bf16 %v3781_v22  ;;  %v3778_v26 = vunpack.i.h.bf16 %v3776_v23  ;;  %v3777_v27 = vunpack.i.l.bf16 %v3776_v23 }
 0x16e   : > { %2449 = vst.msk [vmem:[%s3914_s23 + $0x730] sm:$0xff] %vm2218_vm1, %v3782_v25  ;;  %2450 = vst.msk [vmem:[%s3914_s23 + $0x738] sm:$0xff] %vm2218_vm1, %v3783_v24 }
 0x16f   : > { %2447 = vst.msk [vmem:[%s3914_s23 + $0x720] sm:$0xff] %vm2218_vm1, %v3777_v27  ;;  %2448 = vst.msk [vmem:[%s3914_s23 + $0x728] sm:$0xff] %vm2218_vm1, %v3778_v26  ;;  %v3791_v28 = vpop.permute.xlu1 %3790  ;;  %v3786_v29 = vpop.permute.xlu0 %3785 }
 0x170   : > { %v3793_v30 = vunpack.i.h.bf16 %v3791_v28  ;;  %v3792_v31 = vunpack.i.l.bf16 %v3791_v28  ;;  %v3788_v32 = vunpack.i.h.bf16 %v3786_v29  ;;  %v3787_v33 = vunpack.i.l.bf16 %v3786_v29 }
 0x172   : > { %2453 = vst.msk [vmem:[%s3914_s23 + $0x750] sm:$0xff] %vm2218_vm1, %v3792_v31  ;;  %2454 = vst.msk [vmem:[%s3914_s23 + $0x758] sm:$0xff] %vm2218_vm1, %v3793_v30 }
 0x173   : > { %2451 = vst.msk [vmem:[%s3914_s23 + $0x740] sm:$0xff] %vm2218_vm1, %v3787_v33  ;;  %2452 = vst.msk [vmem:[%s3914_s23 + $0x748] sm:$0xff] %vm2218_vm1, %v3788_v32  ;;  %v3801_v34 = vpop.permute.xlu1 %3800  ;;  %v3796_v35 = vpop.permute.xlu0 %3795 }
 0x174   : > { %v3803_v36 = vunpack.i.h.bf16 %v3801_v34  ;;  %v3802_v37 = vunpack.i.l.bf16 %v3801_v34  ;;  %v3798_v38 = vunpack.i.h.bf16 %v3796_v35  ;;  %v3797_v39 = vunpack.i.l.bf16 %v3796_v35 }
 0x176   : > { %2457 = vst.msk [vmem:[%s3914_s23 + $0x770] sm:$0xff] %vm2218_vm1, %v3802_v37  ;;  %2458 = vst.msk [vmem:[%s3914_s23 + $0x778] sm:$0xff] %vm2218_vm1, %v3803_v36 }
 0x177   : > { %2455 = vst.msk [vmem:[%s3914_s23 + $0x760] sm:$0xff] %vm2218_vm1, %v3797_v39  ;;  %2456 = vst.msk [vmem:[%s3914_s23 + $0x768] sm:$0xff] %vm2218_vm1, %v3798_v38  ;;  %v3811_v40 = vpop.permute.xlu1 %3810  ;;  %v3806_v41 = vpop.permute.xlu0 %3805 }
 0x178   : > { %v3813_v42 = vunpack.i.h.bf16 %v3811_v40  ;;  %v3812_v43 = vunpack.i.l.bf16 %v3811_v40  ;;  %v3808_v44 = vunpack.i.h.bf16 %v3806_v41  ;;  %v3807_v45 = vunpack.i.l.bf16 %v3806_v41 }
 0x17a   : > { %2461 = vst.msk [vmem:[%s3914_s23 + $0x790] sm:$0xff] %vm2218_vm1, %v3812_v43  ;;  %2462 = vst.msk [vmem:[%s3914_s23 + $0x798] sm:$0xff] %vm2218_vm1, %v3813_v42 }
 0x17b   : > { %2459 = vst.msk [vmem:[%s3914_s23 + $0x780] sm:$0xff] %vm2218_vm1, %v3807_v45  ;;  %2460 = vst.msk [vmem:[%s3914_s23 + $0x788] sm:$0xff] %vm2218_vm1, %v3808_v44  ;;  %v3821_v46 = vpop.permute.xlu1 %3820  ;;  %v3816_v47 = vpop.permute.xlu0 %3815 }
 0x17c   : > { %v3823_v48 = vunpack.i.h.bf16 %v3821_v46  ;;  %v3822_v49 = vunpack.i.l.bf16 %v3821_v46  ;;  %v3818_v50 = vunpack.i.h.bf16 %v3816_v47  ;;  %v3817_v51 = vunpack.i.l.bf16 %v3816_v47 }
 0x17e   : > { %2465 = vst.msk [vmem:[%s3914_s23 + $0x7b0] sm:$0xff] %vm2218_vm1, %v3822_v49  ;;  %2466 = vst.msk [vmem:[%s3914_s23 + $0x7b8] sm:$0xff] %vm2218_vm1, %v3823_v48 }
 0x17f   : > { %2463 = vst.msk [vmem:[%s3914_s23 + $0x7a0] sm:$0xff] %vm2218_vm1, %v3817_v51  ;;  %2464 = vst.msk [vmem:[%s3914_s23 + $0x7a8] sm:$0xff] %vm2218_vm1, %v3818_v50  ;;  %v3831_v52 = vpop.permute.xlu1 %3830  ;;  %v3826_v53 = vpop.permute.xlu0 %3825 }
 0x180   : > { %v3833_v54 = vunpack.i.h.bf16 %v3831_v52  ;;  %v3832_v55 = vunpack.i.l.bf16 %v3831_v52  ;;  %v3828_v56 = vunpack.i.h.bf16 %v3826_v53  ;;  %v3827_v57 = vunpack.i.l.bf16 %v3826_v53 }
 0x182   : > { %2469 = vst.msk [vmem:[%s3914_s23 + $0x7d0] sm:$0xff] %vm2218_vm1, %v3832_v55  ;;  %2470 = vst.msk [vmem:[%s3914_s23 + $0x7d8] sm:$0xff] %vm2218_vm1, %v3833_v54 }
 0x183   : > { %2467 = vst.msk [vmem:[%s3914_s23 + $0x7c0] sm:$0xff] %vm2218_vm1, %v3827_v57  ;;  %2468 = vst.msk [vmem:[%s3914_s23 + $0x7c8] sm:$0xff] %vm2218_vm1, %v3828_v56  ;;  %v3841_v58 = vpop.permute.xlu1 %3840  ;;  %v3836_v59 = vpop.permute.xlu0 %3835 }
 0x184   : > { %v3843_v60 = vunpack.i.h.bf16 %v3841_v58  ;;  %v3842_v61 = vunpack.i.l.bf16 %v3841_v58  ;;  %v3838_v62 = vunpack.i.h.bf16 %v3836_v59  ;;  %v3837_v63 = vunpack.i.l.bf16 %v3836_v59 }
 0x186   : > { %2473 = vst.msk [vmem:[%s3914_s23 + $0x7f0] sm:$0xff] %vm2218_vm1, %v3842_v61  ;;  %2474 = vst.msk [vmem:[%s3914_s23 + $0x7f8] sm:$0xff] %vm2218_vm1, %v3843_v60 }
 0x187   : > { %2471 = vst.msk [vmem:[%s3914_s23 + $0x7e0] sm:$0xff] %vm2218_vm1, %v3837_v63  ;;  %2472 = vst.msk [vmem:[%s3914_s23 + $0x7e8] sm:$0xff] %vm2218_vm1, %v3838_v62 }
 0x188 PF: > { %s12_s9 = sadd.s32 1, %s3850_s9  }
 0x189   : > { %p9_p4 = scmp.ge.s32.totalorder %s12_s9, 4  }
 0x18b   :  { %11 = sbr.rel (!%p9_p4) target bundleno = 1 (0x1), region = 61 }

</bundles_post_ra>
